<compile_context>
chip_gen: v6e
topology: v6e:2x2x1
jax: 0.10.0
libtpu: 0.0.40
codegen_flags: <defaults>
</compile_context>

<pallas_src>
import functools
import math

import jax
import jax.numpy as jnp
from jax.experimental import pallas as pl
from jax.experimental.pallas import tpu as pltpu

# ---- model hyper-parameters (match the PyTorch module) ----------------------
D_MODEL = 128
N_LAYERS = 2
NHEAD = 8
HEAD_DIM = D_MODEL // NHEAD        # 16
DIM_FF = 512
FF_CHUNK = 256                     # FF processed in DIM_FF // FF_CHUNK chunks
LN_EPS = 1e-5

S_PAD = 32                         # fixed sequence bucket (power of two)
HS = NHEAD * S_PAD                 # 256 = all-head score width
NEG_INF = -1e30                    # additive key-padding mask (kept in f32)


# -----------------------------------------------------------------------------
# Pallas kernel: N autoregressive forward passes of the full encoder stack.
# -----------------------------------------------------------------------------
def _ar_transformer_kernel(
    seqlen_ref,    # SMEM (1,)  int32   initial valid-token count (k + 1)
    head_b_ref,    # SMEM (1,)  f32     head bias
    prefix_ref,    # VMEM (S_PAD, 1) f32  coeff column; row 0 = 0 (start token)
    base_ref,      # VMEM (S_PAD, D) f32  pe + (start_token | coeff_b) per row
    coeff_w_ref,   # VMEM (1, D)  f32     coeff_proj weight row
    head_w_ref,    # VMEM (1, D)  f32
    g2_ref,        # VMEM (HS, S_PAD) bf16  sublane-tiling selector (0/1)
    blkmask_ref,   # VMEM (HS, D) bf16      block-diagonal head mask (0/1)
    qkv_w_ref,     # VMEM (L, D, 3D) bf16   1/sqrt(hd) pre-folded into Q cols
    qkv_b_ref,     # VMEM (L, 1, 3D) f32
    out_w_ref,     # VMEM (L, D, D) bf16
    out_b_ref,     # VMEM (L, 1, D) f32
    ln1_g_ref, ln1_b_ref, ln2_g_ref, ln2_b_ref,   # VMEM (L, 1, D) f32
    ff1_w_ref,     # VMEM (L, D, FF) bf16
    ff1_b_ref,     # VMEM (L, 1, FF) f32
    ff2_w_ref,     # VMEM (L, FF, D) bf16
    ff2_b_ref,     # VMEM (L, 1, D) f32
    o_ref,         # VMEM (n_steps, D) f32  each prediction broadcast over lanes
    x_scr,         # VMEM scratch (S_PAD, D) f32  token+PE embeddings (grows)
):
    S, D = base_ref.shape
    L = qkv_w_ref.shape[0]
    n_steps = o_ref.shape[0]

    # hoisted integer constants (built once per kernel call)
    key_t = jax.lax.broadcasted_iota(jnp.int32, (1, HS), 1) & (S - 1)   # key idx / col
    row_ids = jax.lax.broadcasted_iota(jnp.int32, (S, 1), 0)

    # initial embeddings (in-kernel embedding + positional-encoding glue):
    #   row 0      = start_token + pe[0]
    #   row i >= 1 = a_{i-1} * W_coeff + b_coeff + pe[i]
    x_scr[...] = base_ref[...] + prefix_ref[...] * coeff_w_ref[...]

    seq0 = seqlen_ref[0]

    def layer_norm(v, g, b):
        mu = jnp.mean(v, axis=-1, keepdims=True)
        d = v - mu
        var = jnp.mean(d * d, axis=-1, keepdims=True)
        return d * jax.lax.rsqrt(var + LN_EPS) * g + b

    def ar_step(step, carry):
        cur_len = seq0 + step
        # additive key-padding mask, built once per step, shared by all heads/layers
        key_bias = jnp.where(key_t < cur_len, 0.0, NEG_INF).astype(jnp.float32)

        x = x_scr[...]                                   # (S, D) f32
        for l in range(L):
            # ---- fused QKV projection: one lane-dense bf16 MXU matmul ---------
            qkv = jnp.dot(x.astype(jnp.bfloat16), qkv_w_ref[l],
                          preferred_element_type=jnp.float32) + qkv_b_ref[l]
            q = qkv[:, 0:D].astype(jnp.bfloat16)          # scale already folded in
            k = qkv[:, D:2 * D].astype(jnp.bfloat16)
            v = qkv[:, 2 * D:3 * D].astype(jnp.bfloat16)

            # ---- block-diagonal K / V slabs (HS, D): head h occupies rows
            #      [h*S,(h+1)*S) x cols [h*hd,(h+1)*hd); everything lane-dense.
            k_blk = (jnp.dot(g2_ref[...], k, preferred_element_type=jnp.float32)
                     .astype(jnp.bfloat16) * blkmask_ref[...])
            v_blk = (jnp.dot(g2_ref[...], v, preferred_element_type=jnp.float32)
                     .astype(jnp.bfloat16) * blkmask_ref[...])

            # ---- all-head scores in ONE matmul: (S, HS), col = h*S + key_t ----
            s = jax.lax.dot_general(q, k_blk, (((1,), (1,)), ((), ())),
                                    preferred_element_type=jnp.float32)
            s = s + key_bias                              # mask applied in f32
            m = jnp.max(s, axis=-1, keepdims=True)        # per-row shift (exact softmax)
            e = jnp.exp(s - m)                            # masked keys -> exactly 0
            e_bf = e.astype(jnp.bfloat16)

            # numerator = concatenated per-head contexts; denominator = per-head
            # softmax sums broadcast over that head's 16 columns.  Two matmuls,
            # no ctx scratch, no masked stores.
            num = jnp.dot(e_bf, v_blk, preferred_element_type=jnp.float32)         # (S,D)
            den = jnp.dot(e_bf, blkmask_ref[...], preferred_element_type=jnp.float32)
            ctx = num * pl.reciprocal(den + 1e-30, approx=True)

            attn = jnp.dot(ctx.astype(jnp.bfloat16), out_w_ref[l],
                           preferred_element_type=jnp.float32) + out_b_ref[l]
            x = layer_norm(x + attn, ln1_g_ref[l], ln1_b_ref[l])

            # ---- feed-forward in two 256-wide chunks (bounds h1 live range) ----
            x_bf = x.astype(jnp.bfloat16)
            ff = jnp.zeros((S, D), jnp.float32)
            for c in range(DIM_FF // FF_CHUNK):
                sl = slice(c * FF_CHUNK, (c + 1) * FF_CHUNK)
                h1 = (jnp.dot(x_bf, ff1_w_ref[l, :, sl],
                              preferred_element_type=jnp.float32)
                      + ff1_b_ref[l, :, sl])
                h1 = jnp.maximum(h1, 0.0)
                ff = ff + jnp.dot(h1.astype(jnp.bfloat16), ff2_w_ref[l, sl, :],
                                  preferred_element_type=jnp.float32)
            x = layer_norm(x + ff + ff2_b_ref[l], ln2_g_ref[l], ln2_b_ref[l])

        # ---- scalar head on the LAST VALID row only (VPU dot + one-hot select)
        hv = jnp.sum(x * head_w_ref[...], axis=-1, keepdims=True)            # (S, 1)
        val = jnp.sum(jnp.where(row_ids == cur_len - 1, hv, 0.0),
                      axis=0, keepdims=True) + head_b_ref[0]                  # (1, 1)
        o_ref[pl.ds(step, 1), :] = jnp.broadcast_to(val, (1, D))

        # ---- append the generated coefficient as the next token embedding
        @pl.when(cur_len < S)
        def _():
            x_scr[pl.ds(cur_len, 1), :] = (
                val * coeff_w_ref[...] + base_ref[pl.ds(cur_len, 1), :])

        return carry

    jax.lax.fori_loop(0, n_steps, ar_step, jnp.int32(0))


# -----------------------------------------------------------------------------
# Parameter construction / one-time packing
# -----------------------------------------------------------------------------
def _sinusoidal_pe(max_len, d_model):
    """Exactly the spec's _SinusoidalPositionalEncoding table."""
    position = jnp.arange(max_len, dtype=jnp.float32)[:, None]
    div_term = jnp.exp(jnp.arange(0, d_model, 2, dtype=jnp.float32)
                       * (-math.log(10000.0) / d_model))
    pe = jnp.zeros((max_len, d_model), jnp.float32)
    pe = pe.at[:, 0::2].set(jnp.sin(position * div_term))
    pe = pe.at[:, 1::2].set(jnp.cos(position * div_term))
    return pe


def init_params(key):
    """Deterministic synthetic parameters with the PyTorch module's shapes."""
    keys = jax.random.split(key, 16)
    D, FF, L = D_MODEL, DIM_FF, N_LAYERS
    scale = 0.02
    params = {
        "start_token": jnp.zeros((D,), jnp.float32),
        "coeff_w": scale * jax.random.normal(keys[0], (D, 1)),
        "coeff_b": scale * jax.random.normal(keys[1], (D,)),
        "head_w": scale * jax.random.normal(keys[2], (1, D)),
        "head_b": scale * jax.random.normal(keys[3], (1,)),
        "layers": [],
    }
    for l in range(L):
        lk = jax.random.split(keys[4 + l], 8)
        params["layers"].append(dict(
            in_proj_w=scale * jax.random.normal(lk[0], (3 * D, D)),
            in_proj_b=scale * jax.random.normal(lk[1], (3 * D,)),
            out_proj_w=scale * jax.random.normal(lk[2], (D, D)),
            out_proj_b=scale * jax.random.normal(lk[3], (D,)),
            ln1_g=jnp.ones((D,), jnp.float32), ln1_b=jnp.zeros((D,), jnp.float32),
            ln2_g=jnp.ones((D,), jnp.float32), ln2_b=jnp.zeros((D,), jnp.float32),
            ff1_w=scale * jax.random.normal(lk[4], (FF, D)),
            ff1_b=scale * jax.random.normal(lk[5], (FF,)),
            ff2_w=scale * jax.random.normal(lk[6], (D, FF)),
            ff2_b=scale * jax.random.normal(lk[7], (D,)),
        ))
    return params


def pack_params(params):
    """One-time: stack/transpose/cast weights and build all kernel constants."""
    D = D_MODEL
    inv_sqrt_hd = 1.0 / math.sqrt(HEAD_DIM)

    def stack(name, transpose=False, as_row=False, dtype=None, q_scale=False):
        mats = []
        for p in params["layers"]:
            m = p[name]
            if q_scale:                         # fold 1/sqrt(hd) into Q block
                m = m.at[:D].multiply(inv_sqrt_hd)
            if transpose:
                m = m.T
            if as_row:
                m = m[None, :]
            mats.append(m)
        out = jnp.stack(mats, axis=0)
        return out.astype(dtype) if dtype is not None else out

    # embedding base: row 0 = start_token + pe[0]; rows i>=1 = coeff_b + pe[i]
    pe = _sinusoidal_pe(S_PAD, D)
    tok_bias = jnp.concatenate(
        [params["start_token"][None, :],
         jnp.broadcast_to(params["coeff_b"][None, :], (S_PAD - 1, D))], axis=0)
    base = pe + tok_bias

    # block-diagonal helper constants (0/1), DMA'd once with the weights
    r = jnp.arange(HS)[:, None]
    g2 = ((r % S_PAD) == jnp.arange(S_PAD)[None, :]).astype(jnp.bfloat16)        # (HS, S)
    blkmask = ((r // S_PAD) == (jnp.arange(D)[None, :] // HEAD_DIM)
               ).astype(jnp.bfloat16)                                            # (HS, D)

    return dict(
        base=base,
        coeff_w_row=params["coeff_w"][:, 0][None, :],          # (1, D)
        head_w=params["head_w"],                                # (1, D) f32
        head_b=params["head_b"],                                # (1,)   f32
        g2=g2, blkmask=blkmask,
        qkv_w=stack("in_proj_w", transpose=True, dtype=jnp.bfloat16, q_scale=True),
        qkv_b=stack("in_proj_b", as_row=True, q_scale=True),
        out_w=stack("out_proj_w", transpose=True, dtype=jnp.bfloat16),
        out_b=stack("out_proj_b", as_row=True),
        ln1_g=stack("ln1_g", as_row=True), ln1_b=stack("ln1_b", as_row=True),
        ln2_g=stack("ln2_g", as_row=True), ln2_b=stack("ln2_b", as_row=True),
        ff1_w=stack("ff1_w", transpose=True, dtype=jnp.bfloat16),
        ff1_b=stack("ff1_b", as_row=True),
        ff2_w=stack("ff2_w", transpose=True, dtype=jnp.bfloat16),
        ff2_b=stack("ff2_b", as_row=True),
    )


# -----------------------------------------------------------------------------
# pallas_call wrapper (gridless; weights VMEM-resident across all AR steps)
# -----------------------------------------------------------------------------
def _pallas_generate(seq_arr, prefix_col, packed, n_steps):
    vmem = pl.BlockSpec(memory_space=pltpu.MemorySpace.VMEM)
    smem = pl.BlockSpec(memory_space=pltpu.MemorySpace.SMEM)
    return pl.pallas_call(
        _ar_transformer_kernel,
        out_shape=jax.ShapeDtypeStruct((n_steps, D_MODEL), jnp.float32),
        in_specs=[smem, smem] + [vmem] * 18,
        out_specs=vmem,
        scratch_shapes=[pltpu.VMEM((S_PAD, D_MODEL), jnp.float32)],
    )(
        seq_arr, packed["head_b"],
        prefix_col, packed["base"], packed["coeff_w_row"], packed["head_w"],
        packed["g2"], packed["blkmask"],
        packed["qkv_w"], packed["qkv_b"], packed["out_w"], packed["out_b"],
        packed["ln1_g"], packed["ln1_b"], packed["ln2_g"], packed["ln2_b"],
        packed["ff1_w"], packed["ff1_b"], packed["ff2_w"], packed["ff2_b"],
    )


@functools.partial(jax.jit, static_argnames=("n_steps",))
def _generate(prefix_col, seq_len, packed, n_steps):
    seq_arr = jnp.reshape(seq_len, (1,)).astype(jnp.int32)
    out = _pallas_generate(seq_arr, prefix_col, packed, n_steps)
    return out[:, 0]                                          # (n_steps,)


def generate_coeffs(prefix, packed, n_steps=1):
    """Run n_steps autoregressive forward passes of _ARTransformerCoeffNet in
    ONE pallas_call (weights loaded once, per-step glue fused in-kernel)."""
    prefix = jnp.asarray(prefix, jnp.float32)
    assert prefix.ndim == 1, "prefix must be a 1-D tensor of coefficients."
    k = prefix.shape[0]
    assert k + 1 + n_steps <= S_PAD, "prefix + generated steps exceed the S_PAD bucket"
    prefix_col = jnp.zeros((S_PAD, 1), jnp.float32).at[1:k + 1, 0].set(prefix)
    return _generate(prefix_col, jnp.int32(k + 1), packed, n_steps)


def ar_transformer_coeff_net(prefix, packed):
    """Single forward pass (one predicted coefficient) — the module's forward()."""
    return generate_coeffs(prefix, packed, n_steps=1)[0]


# -----------------------------------------------------------------------------
if __name__ == "__main__":
    key = jax.random.PRNGKey(0)
    pkey, ckey = jax.random.split(key)

    params = init_params(pkey)
    packed = pack_params(params)          # one-time weight packing / casting

    prefix = jax.random.normal(ckey, (5,), jnp.float32)   # [a0..a4]

    # 4 AR steps fused into a single pallas_call / single dispatch
    coeffs = jax.block_until_ready(generate_coeffs(prefix, packed, n_steps=4))
    assert coeffs.shape == (4,), "expected 4 generated coefficients"
    assert bool(jnp.all(jnp.isfinite(coeffs))), "non-finite output"

    # self-consistency: step 2 of the fused generation must match a fresh
    # single-step forward on the prefix extended by the first prediction.
    longer = jnp.concatenate([prefix, coeffs[:1]])
    one = jax.block_until_ready(generate_coeffs(longer, packed, n_steps=1))
    assert bool(jnp.isfinite(one[0])), "non-finite output (single-step call)"
    assert bool(jnp.allclose(coeffs[1], one[0], rtol=1e-4, atol=1e-4)), (
        "fused multi-step generation disagrees with single-step forward")

    print("KERNEL_OK")
</pallas_src>

<mosaic_0001>
module attributes {stable_mosaic.version = 11 : i64} {
  func.func @_ar_transformer_kernel(%arg0: memref<1xi32, #tpu.memory_space<smem>>, %arg1: memref<1xf32, #tpu.memory_space<smem>>, %arg2: memref<32x1xf32, #tpu.memory_space<vmem>>, %arg3: memref<32x128xf32, #tpu.memory_space<vmem>>, %arg4: memref<1x128xf32, #tpu.memory_space<vmem>>, %arg5: memref<1x128xf32, #tpu.memory_space<vmem>>, %arg6: memref<256x32xbf16, #tpu.memory_space<vmem>>, %arg7: memref<256x128xbf16, #tpu.memory_space<vmem>>, %arg8: memref<2x128x384xbf16, #tpu.memory_space<vmem>>, %arg9: memref<2x1x384xf32, #tpu.memory_space<vmem>>, %arg10: memref<2x128x128xbf16, #tpu.memory_space<vmem>>, %arg11: memref<2x1x128xf32, #tpu.memory_space<vmem>>, %arg12: memref<2x1x128xf32, #tpu.memory_space<vmem>>, %arg13: memref<2x1x128xf32, #tpu.memory_space<vmem>>, %arg14: memref<2x1x128xf32, #tpu.memory_space<vmem>>, %arg15: memref<2x1x128xf32, #tpu.memory_space<vmem>>, %arg16: memref<2x128x512xbf16, #tpu.memory_space<vmem>>, %arg17: memref<2x1x512xf32, #tpu.memory_space<vmem>>, %arg18: memref<2x512x128xbf16, #tpu.memory_space<vmem>>, %arg19: memref<2x1x128xf32, #tpu.memory_space<vmem>>, %arg20: memref<4x128xf32, #tpu.memory_space<vmem>>, %arg21: memref<32x128xf32, #tpu.memory_space<vmem>>) attributes {dimension_semantics = [], scalar_prefetch = 0 : i64, scratch_operands = 1 : i64, tpu.core_type = #tpu.core_type<tc>} {
    %0 = tpu.iota {dimensions = array<i32: 1>} : vector<1x256xi32>
    %c31_i32 = arith.constant 31 : i32
    %1 = vector.broadcast %c31_i32 : i32 to vector<1x256xi32>
    %2 = arith.andi %0, %1 : vector<1x256xi32>
    %3 = tpu.iota {dimensions = array<i32: 0>} : vector<32x1xi32>
    %c0 = arith.constant 0 : index
    %c0_0 = arith.constant 0 : index
    %4 = vector.load %arg3[%c0, %c0_0] : memref<32x128xf32, #tpu.memory_space<vmem>>, vector<32x128xf32>
    %c0_1 = arith.constant 0 : index
    %c0_2 = arith.constant 0 : index
    %5 = vector.load %arg2[%c0_1, %c0_2] : memref<32x1xf32, #tpu.memory_space<vmem>>, vector<32x1xf32>
    %c0_3 = arith.constant 0 : index
    %c0_4 = arith.constant 0 : index
    %6 = vector.load %arg4[%c0_3, %c0_4] : memref<1x128xf32, #tpu.memory_space<vmem>>, vector<1x128xf32>
    %7 = vector.broadcast %5 : vector<32x1xf32> to vector<32x128xf32>
    %8 = vector.broadcast %6 : vector<1x128xf32> to vector<32x128xf32>
    %9 = arith.mulf %7, %8 : vector<32x128xf32>
    %10 = arith.addf %4, %9 : vector<32x128xf32>
    %c0_5 = arith.constant 0 : index
    %c0_6 = arith.constant 0 : index
    %11 = vector.load %arg21[%c0_5, %c0_6] : memref<32x128xf32, #tpu.memory_space<vmem>>, vector<32x128xf32>
    tpu.vector_store %arg21[%c0_5, %c0_6], %10 {strides = array<i32>} : memref<32x128xf32, #tpu.memory_space<vmem>>, vector<32x128xf32>,
    %c0_7 = arith.constant 0 : index
    %12 = memref.load %arg0[%c0_7] : memref<1xi32, #tpu.memory_space<smem>>
    %c0_i32 = arith.constant 0 : i32
    %c4_i32 = arith.constant 4 : i32
    %13 = arith.addi %c0_i32, %c4_i32 : i32
    %c1_i32 = arith.constant 1 : i32
    scf.for %arg22 = %c0_i32 to %13 step %c1_i32  : i32 {
      %14 = arith.addi %12, %arg22 : i32
      %15 = vector.broadcast %14 : i32 to vector<1x256xi32>
      %16 = arith.cmpi slt, %2, %15 : vector<1x256xi32>
      %cst = arith.constant 0.000000e+00 : f32
      %cst_9 = arith.constant -1.000000e+30 : f32
      %17 = vector.broadcast %cst : f32 to vector<1x256xf32>
      %18 = vector.broadcast %cst_9 : f32 to vector<1x256xf32>
      %19 = arith.select %16, %17, %18 : vector<1x256xi1>, vector<1x256xf32>
      %c0_10 = arith.constant 0 : index
      %c0_11 = arith.constant 0 : index
      %20 = vector.load %arg21[%c0_10, %c0_11] : memref<32x128xf32, #tpu.memory_space<vmem>>, vector<32x128xf32>
      %21 = arith.truncf %20 : vector<32x128xf32> to vector<32x128xbf16>
      %c0_12 = arith.constant 0 : index
      %c0_13 = arith.constant 0 : index
      %c0_14 = arith.constant 0 : index
      %22 = vector.load %arg8[%c0_12, %c0_13, %c0_14] : memref<2x128x384xbf16, #tpu.memory_space<vmem>>, vector<1x128x384xbf16>
      %23 = vector.shape_cast %22 : vector<1x128x384xbf16> to vector<128x384xbf16>
      %cst_15 = arith.constant dense<0.000000e+00> : vector<32x384xf32>
      %24 = tpu.matmul %21, %23, %cst_15 {dimension_numbers = #tpu.dot_dimension_numbers<[1], [0], [0], [1], [0, 0, 1, 1], [], []>} : vector<32x128xbf16>, vector<128x384xbf16>, vector<32x384xf32> -> vector<32x384xf32>
      %c0_16 = arith.constant 0 : index
      %c0_17 = arith.constant 0 : index
      %c0_18 = arith.constant 0 : index
      %25 = vector.load %arg9[%c0_16, %c0_17, %c0_18] : memref<2x1x384xf32, #tpu.memory_space<vmem>>, vector<1x1x384xf32>
      %26 = vector.shape_cast %25 : vector<1x1x384xf32> to vector<1x384xf32>
      %27 = vector.broadcast %26 : vector<1x384xf32> to vector<32x384xf32>
      %28 = arith.addf %24, %27 : vector<32x384xf32>
      %29 = vector.extract_strided_slice %28 {offsets = [0, 0], sizes = [32, 128], strides = [1, 1]} : vector<32x384xf32> to vector<32x128xf32>
      %30 = arith.truncf %29 : vector<32x128xf32> to vector<32x128xbf16>
      %31 = vector.extract_strided_slice %28 {offsets = [0, 128], sizes = [32, 128], strides = [1, 1]} : vector<32x384xf32> to vector<32x128xf32>
      %32 = arith.truncf %31 : vector<32x128xf32> to vector<32x128xbf16>
      %33 = vector.extract_strided_slice %28 {offsets = [0, 256], sizes = [32, 128], strides = [1, 1]} : vector<32x384xf32> to vector<32x128xf32>
      %34 = arith.truncf %33 : vector<32x128xf32> to vector<32x128xbf16>
      %c0_19 = arith.constant 0 : index
      %c0_20 = arith.constant 0 : index
      %35 = vector.load %arg6[%c0_19, %c0_20] : memref<256x32xbf16, #tpu.memory_space<vmem>>, vector<256x32xbf16>
      %cst_21 = arith.constant dense<0.000000e+00> : vector<256x128xf32>
      %36 = tpu.matmul %35, %32, %cst_21 {dimension_numbers = #tpu.dot_dimension_numbers<[1], [0], [0], [1], [0, 0, 1, 1], [], []>} : vector<256x32xbf16>, vector<32x128xbf16>, vector<256x128xf32> -> vector<256x128xf32>
      %37 = arith.truncf %36 : vector<256x128xf32> to vector<256x128xbf16>
      %c0_22 = arith.constant 0 : index
      %c0_23 = arith.constant 0 : index
      %38 = vector.load %arg7[%c0_22, %c0_23] : memref<256x128xbf16, #tpu.memory_space<vmem>>, vector<256x128xbf16>
      %39 = arith.mulf %37, %38 : vector<256x128xbf16>
      %c0_24 = arith.constant 0 : index
      %c0_25 = arith.constant 0 : index
      %40 = vector.load %arg6[%c0_24, %c0_25] : memref<256x32xbf16, #tpu.memory_space<vmem>>, vector<256x32xbf16>
      %cst_26 = arith.constant dense<0.000000e+00> : vector<256x128xf32>
      %41 = tpu.matmul %40, %34, %cst_26 {dimension_numbers = #tpu.dot_dimension_numbers<[1], [0], [0], [1], [0, 0, 1, 1], [], []>} : vector<256x32xbf16>, vector<32x128xbf16>, vector<256x128xf32> -> vector<256x128xf32>
      %42 = arith.truncf %41 : vector<256x128xf32> to vector<256x128xbf16>
      %c0_27 = arith.constant 0 : index
      %c0_28 = arith.constant 0 : index
      %43 = vector.load %arg7[%c0_27, %c0_28] : memref<256x128xbf16, #tpu.memory_space<vmem>>, vector<256x128xbf16>
      %44 = arith.mulf %42, %43 : vector<256x128xbf16>
      %cst_29 = arith.constant dense<0.000000e+00> : vector<32x256xf32>
      %45 = tpu.matmul %30, %39, %cst_29 {dimension_numbers = #tpu.dot_dimension_numbers<[1], [1], [0], [0], [0, 0, 1, 0], [], []>} : vector<32x128xbf16>, vector<256x128xbf16>, vector<32x256xf32> -> vector<32x256xf32>
      %46 = vector.broadcast %19 : vector<1x256xf32> to vector<32x256xf32>
      %47 = arith.addf %45, %46 : vector<32x256xf32>
      %cst_30 = arith.constant dense<0xFF800000> : vector<32xf32>
      %48 = vector.multi_reduction <maximumf>, %47, %cst_30 [1] : vector<32x256xf32> to vector<32xf32>
      %49 = vector.shape_cast %48 : vector<32xf32> to vector<32x1xf32>
      %50 = vector.broadcast %49 : vector<32x1xf32> to vector<32x256xf32>
      %51 = arith.subf %47, %50 : vector<32x256xf32>
      %52 = math.exp %51 : vector<32x256xf32>
      %53 = arith.truncf %52 : vector<32x256xf32> to vector<32x256xbf16>
      %cst_31 = arith.constant dense<0.000000e+00> : vector<32x128xf32>
      %54 = tpu.matmul %53, %44, %cst_31 {dimension_numbers = #tpu.dot_dimension_numbers<[1], [0], [0], [1], [0, 0, 1, 1], [], []>} : vector<32x256xbf16>, vector<256x128xbf16>, vector<32x128xf32> -> vector<32x128xf32>
      %c0_32 = arith.constant 0 : index
      %c0_33 = arith.constant 0 : index
      %55 = vector.load %arg7[%c0_32, %c0_33] : memref<256x128xbf16, #tpu.memory_space<vmem>>, vector<256x128xbf16>
      %cst_34 = arith.constant dense<0.000000e+00> : vector<32x128xf32>
      %56 = tpu.matmul %53, %55, %cst_34 {dimension_numbers = #tpu.dot_dimension_numbers<[1], [0], [0], [1], [0, 0, 1, 1], [], []>} : vector<32x256xbf16>, vector<256x128xbf16>, vector<32x128xf32> -> vector<32x128xf32>
      %cst_35 = arith.constant 1.000000e-30 : f32
      %57 = vector.broadcast %cst_35 : f32 to vector<32x128xf32>
      %58 = arith.addf %56, %57 : vector<32x128xf32>
      %59 = tpu.reciprocal %58 {approx = true} : vector<32x128xf32> -> vector<32x128xf32>
      %60 = arith.mulf %54, %59 : vector<32x128xf32>
      %61 = arith.truncf %60 : vector<32x128xf32> to vector<32x128xbf16>
      %c0_36 = arith.constant 0 : index
      %c0_37 = arith.constant 0 : index
      %c0_38 = arith.constant 0 : index
      %62 = vector.load %arg10[%c0_36, %c0_37, %c0_38] : memref<2x128x128xbf16, #tpu.memory_space<vmem>>, vector<1x128x128xbf16>
      %63 = vector.shape_cast %62 : vector<1x128x128xbf16> to vector<128x128xbf16>
      %cst_39 = arith.constant dense<0.000000e+00> : vector<32x128xf32>
      %64 = tpu.matmul %61, %63, %cst_39 {dimension_numbers = #tpu.dot_dimension_numbers<[1], [0], [0], [1], [0, 0, 1, 1], [], []>} : vector<32x128xbf16>, vector<128x128xbf16>, vector<32x128xf32> -> vector<32x128xf32>
      %c0_40 = arith.constant 0 : index
      %c0_41 = arith.constant 0 : index
      %c0_42 = arith.constant 0 : index
      %65 = vector.load %arg11[%c0_40, %c0_41, %c0_42] : memref<2x1x128xf32, #tpu.memory_space<vmem>>, vector<1x1x128xf32>
      %66 = vector.shape_cast %65 : vector<1x1x128xf32> to vector<1x128xf32>
      %67 = vector.broadcast %66 : vector<1x128xf32> to vector<32x128xf32>
      %68 = arith.addf %64, %67 : vector<32x128xf32>
      %69 = arith.addf %20, %68 : vector<32x128xf32>
      %c0_43 = arith.constant 0 : index
      %c0_44 = arith.constant 0 : index
      %c0_45 = arith.constant 0 : index
      %70 = vector.load %arg12[%c0_43, %c0_44, %c0_45] : memref<2x1x128xf32, #tpu.memory_space<vmem>>, vector<1x1x128xf32>
      %71 = vector.shape_cast %70 : vector<1x1x128xf32> to vector<1x128xf32>
      %c0_46 = arith.constant 0 : index
      %c0_47 = arith.constant 0 : index
      %c0_48 = arith.constant 0 : index
      %72 = vector.load %arg13[%c0_46, %c0_47, %c0_48] : memref<2x1x128xf32, #tpu.memory_space<vmem>>, vector<1x1x128xf32>
      %73 = vector.shape_cast %72 : vector<1x1x128xf32> to vector<1x128xf32>
      %cst_49 = arith.constant dense<0.000000e+00> : vector<32xf32>
      %74 = vector.multi_reduction <add>, %69, %cst_49 [1] : vector<32x128xf32> to vector<32xf32>
      %75 = vector.shape_cast %74 : vector<32xf32> to vector<32x1xf32>
      %cst_50 = arith.constant 1.280000e+02 : f32
      %76 = vector.broadcast %cst_50 : f32 to vector<32x1xf32>
      %77 = arith.divf %75, %76 : vector<32x1xf32>
      %78 = vector.broadcast %77 : vector<32x1xf32> to vector<32x128xf32>
      %79 = arith.subf %69, %78 : vector<32x128xf32>
      %80 = arith.mulf %79, %79 : vector<32x128xf32>
      %cst_51 = arith.constant dense<0.000000e+00> : vector<32xf32>
      %81 = vector.multi_reduction <add>, %80, %cst_51 [1] : vector<32x128xf32> to vector<32xf32>
      %82 = vector.shape_cast %81 : vector<32xf32> to vector<32x1xf32>
      %cst_52 = arith.constant 1.280000e+02 : f32
      %83 = vector.broadcast %cst_52 : f32 to vector<32x1xf32>
      %84 = arith.divf %82, %83 : vector<32x1xf32>
      %cst_53 = arith.constant 9.99999974E-6 : f32
      %85 = vector.broadcast %cst_53 : f32 to vector<32x1xf32>
      %86 = arith.addf %84, %85 : vector<32x1xf32>
      %87 = math.rsqrt %86 : vector<32x1xf32>
      %88 = vector.broadcast %87 : vector<32x1xf32> to vector<32x128xf32>
      %89 = arith.mulf %79, %88 : vector<32x128xf32>
      %90 = vector.broadcast %71 : vector<1x128xf32> to vector<32x128xf32>
      %91 = arith.mulf %89, %90 : vector<32x128xf32>
      %92 = vector.broadcast %73 : vector<1x128xf32> to vector<32x128xf32>
      %93 = arith.addf %91, %92 : vector<32x128xf32>
      %94 = arith.truncf %93 : vector<32x128xf32> to vector<32x128xbf16>
      %cst_54 = arith.constant 0.000000e+00 : f32
      %95 = vector.broadcast %cst_54 : f32 to vector<32x128xf32>
      %c0_55 = arith.constant 0 : index
      %c0_56 = arith.constant 0 : index
      %c0_57 = arith.constant 0 : index
      %96 = vector.load %arg16[%c0_55, %c0_56, %c0_57] : memref<2x128x512xbf16, #tpu.memory_space<vmem>>, vector<1x128x256xbf16>
      %97 = vector.shape_cast %96 : vector<1x128x256xbf16> to vector<128x256xbf16>
      %cst_58 = arith.constant dense<0.000000e+00> : vector<32x256xf32>
      %98 = tpu.matmul %94, %97, %cst_58 {dimension_numbers = #tpu.dot_dimension_numbers<[1], [0], [0], [1], [0, 0, 1, 1], [], []>} : vector<32x128xbf16>, vector<128x256xbf16>, vector<32x256xf32> -> vector<32x256xf32>
      %c0_59 = arith.constant 0 : index
      %c0_60 = arith.constant 0 : index
      %c0_61 = arith.constant 0 : index
      %99 = vector.load %arg17[%c0_59, %c0_60, %c0_61] : memref<2x1x512xf32, #tpu.memory_space<vmem>>, vector<1x1x256xf32>
      %100 = vector.shape_cast %99 : vector<1x1x256xf32> to vector<1x256xf32>
      %101 = vector.broadcast %100 : vector<1x256xf32> to vector<32x256xf32>
      %102 = arith.addf %98, %101 : vector<32x256xf32>
      %cst_62 = arith.constant 0.000000e+00 : f32
      %103 = vector.broadcast %cst_62 : f32 to vector<32x256xf32>
      %104 = arith.maximumf %102, %103 : vector<32x256xf32>
      %105 = arith.truncf %104 : vector<32x256xf32> to vector<32x256xbf16>
      %c0_63 = arith.constant 0 : index
      %c0_64 = arith.constant 0 : index
      %c0_65 = arith.constant 0 : index
      %106 = vector.load %arg18[%c0_63, %c0_64, %c0_65] : memref<2x512x128xbf16, #tpu.memory_space<vmem>>, vector<1x256x128xbf16>
      %107 = vector.shape_cast %106 : vector<1x256x128xbf16> to vector<256x128xbf16>
      %cst_66 = arith.constant dense<0.000000e+00> : vector<32x128xf32>
      %108 = tpu.matmul %105, %107, %cst_66 {dimension_numbers = #tpu.dot_dimension_numbers<[1], [0], [0], [1], [0, 0, 1, 1], [], []>} : vector<32x256xbf16>, vector<256x128xbf16>, vector<32x128xf32> -> vector<32x128xf32>
      %109 = arith.addf %95, %108 : vector<32x128xf32>
      %c0_67 = arith.constant 0 : index
      %c0_68 = arith.constant 0 : index
      %c256 = arith.constant 256 : index
      %110 = vector.load %arg16[%c0_67, %c0_68, %c256] : memref<2x128x512xbf16, #tpu.memory_space<vmem>>, vector<1x128x256xbf16>
      %111 = vector.shape_cast %110 : vector<1x128x256xbf16> to vector<128x256xbf16>
      %cst_69 = arith.constant dense<0.000000e+00> : vector<32x256xf32>
      %112 = tpu.matmul %94, %111, %cst_69 {dimension_numbers = #tpu.dot_dimension_numbers<[1], [0], [0], [1], [0, 0, 1, 1], [], []>} : vector<32x128xbf16>, vector<128x256xbf16>, vector<32x256xf32> -> vector<32x256xf32>
      %c0_70 = arith.constant 0 : index
      %c0_71 = arith.constant 0 : index
      %c256_72 = arith.constant 256 : index
      %113 = vector.load %arg17[%c0_70, %c0_71, %c256_72] : memref<2x1x512xf32, #tpu.memory_space<vmem>>, vector<1x1x256xf32>
      %114 = vector.shape_cast %113 : vector<1x1x256xf32> to vector<1x256xf32>
      %115 = vector.broadcast %114 : vector<1x256xf32> to vector<32x256xf32>
      %116 = arith.addf %112, %115 : vector<32x256xf32>
      %cst_73 = arith.constant 0.000000e+00 : f32
      %117 = vector.broadcast %cst_73 : f32 to vector<32x256xf32>
      %118 = arith.maximumf %116, %117 : vector<32x256xf32>
      %119 = arith.truncf %118 : vector<32x256xf32> to vector<32x256xbf16>
      %c0_74 = arith.constant 0 : index
      %c256_75 = arith.constant 256 : index
      %c0_76 = arith.constant 0 : index
      %120 = vector.load %arg18[%c0_74, %c256_75, %c0_76] : memref<2x512x128xbf16, #tpu.memory_space<vmem>>, vector<1x256x128xbf16>
      %121 = vector.shape_cast %120 : vector<1x256x128xbf16> to vector<256x128xbf16>
      %cst_77 = arith.constant dense<0.000000e+00> : vector<32x128xf32>
      %122 = tpu.matmul %119, %121, %cst_77 {dimension_numbers = #tpu.dot_dimension_numbers<[1], [0], [0], [1], [0, 0, 1, 1], [], []>} : vector<32x256xbf16>, vector<256x128xbf16>, vector<32x128xf32> -> vector<32x128xf32>
      %123 = arith.addf %109, %122 : vector<32x128xf32>
      %124 = arith.addf %93, %123 : vector<32x128xf32>
      %c0_78 = arith.constant 0 : index
      %c0_79 = arith.constant 0 : index
      %c0_80 = arith.constant 0 : index
      %125 = vector.load %arg19[%c0_78, %c0_79, %c0_80] : memref<2x1x128xf32, #tpu.memory_space<vmem>>, vector<1x1x128xf32>
      %126 = vector.shape_cast %125 : vector<1x1x128xf32> to vector<1x128xf32>
      %127 = vector.broadcast %126 : vector<1x128xf32> to vector<32x128xf32>
      %128 = arith.addf %124, %127 : vector<32x128xf32>
      %c0_81 = arith.constant 0 : index
      %c0_82 = arith.constant 0 : index
      %c0_83 = arith.constant 0 : index
      %129 = vector.load %arg14[%c0_81, %c0_82, %c0_83] : memref<2x1x128xf32, #tpu.memory_space<vmem>>, vector<1x1x128xf32>
      %130 = vector.shape_cast %129 : vector<1x1x128xf32> to vector<1x128xf32>
      %c0_84 = arith.constant 0 : index
      %c0_85 = arith.constant 0 : index
      %c0_86 = arith.constant 0 : index
      %131 = vector.load %arg15[%c0_84, %c0_85, %c0_86] : memref<2x1x128xf32, #tpu.memory_space<vmem>>, vector<1x1x128xf32>
      %132 = vector.shape_cast %131 : vector<1x1x128xf32> to vector<1x128xf32>
      %cst_87 = arith.constant dense<0.000000e+00> : vector<32xf32>
      %133 = vector.multi_reduction <add>, %128, %cst_87 [1] : vector<32x128xf32> to vector<32xf32>
      %134 = vector.shape_cast %133 : vector<32xf32> to vector<32x1xf32>
      %cst_88 = arith.constant 1.280000e+02 : f32
      %135 = vector.broadcast %cst_88 : f32 to vector<32x1xf32>
      %136 = arith.divf %134, %135 : vector<32x1xf32>
      %137 = vector.broadcast %136 : vector<32x1xf32> to vector<32x128xf32>
      %138 = arith.subf %128, %137 : vector<32x128xf32>
      %139 = arith.mulf %138, %138 : vector<32x128xf32>
      %cst_89 = arith.constant dense<0.000000e+00> : vector<32xf32>
      %140 = vector.multi_reduction <add>, %139, %cst_89 [1] : vector<32x128xf32> to vector<32xf32>
      %141 = vector.shape_cast %140 : vector<32xf32> to vector<32x1xf32>
      %cst_90 = arith.constant 1.280000e+02 : f32
      %142 = vector.broadcast %cst_90 : f32 to vector<32x1xf32>
      %143 = arith.divf %141, %142 : vector<32x1xf32>
      %cst_91 = arith.constant 9.99999974E-6 : f32
      %144 = vector.broadcast %cst_91 : f32 to vector<32x1xf32>
      %145 = arith.addf %143, %144 : vector<32x1xf32>
      %146 = math.rsqrt %145 : vector<32x1xf32>
      %147 = vector.broadcast %146 : vector<32x1xf32> to vector<32x128xf32>
      %148 = arith.mulf %138, %147 : vector<32x128xf32>
      %149 = vector.broadcast %130 : vector<1x128xf32> to vector<32x128xf32>
      %150 = arith.mulf %148, %149 : vector<32x128xf32>
      %151 = vector.broadcast %132 : vector<1x128xf32> to vector<32x128xf32>
      %152 = arith.addf %150, %151 : vector<32x128xf32>
      %153 = arith.truncf %152 : vector<32x128xf32> to vector<32x128xbf16>
      %c1 = arith.constant 1 : index
      %c0_92 = arith.constant 0 : index
      %c0_93 = arith.constant 0 : index
      %154 = vector.load %arg8[%c1, %c0_92, %c0_93] : memref<2x128x384xbf16, #tpu.memory_space<vmem>>, vector<1x128x384xbf16>
      %155 = vector.shape_cast %154 : vector<1x128x384xbf16> to vector<128x384xbf16>
      %cst_94 = arith.constant dense<0.000000e+00> : vector<32x384xf32>
      %156 = tpu.matmul %153, %155, %cst_94 {dimension_numbers = #tpu.dot_dimension_numbers<[1], [0], [0], [1], [0, 0, 1, 1], [], []>} : vector<32x128xbf16>, vector<128x384xbf16>, vector<32x384xf32> -> vector<32x384xf32>
      %c1_95 = arith.constant 1 : index
      %c0_96 = arith.constant 0 : index
      %c0_97 = arith.constant 0 : index
      %157 = vector.load %arg9[%c1_95, %c0_96, %c0_97] : memref<2x1x384xf32, #tpu.memory_space<vmem>>, vector<1x1x384xf32>
      %158 = vector.shape_cast %157 : vector<1x1x384xf32> to vector<1x384xf32>
      %159 = vector.broadcast %158 : vector<1x384xf32> to vector<32x384xf32>
      %160 = arith.addf %156, %159 : vector<32x384xf32>
      %161 = vector.extract_strided_slice %160 {offsets = [0, 0], sizes = [32, 128], strides = [1, 1]} : vector<32x384xf32> to vector<32x128xf32>
      %162 = arith.truncf %161 : vector<32x128xf32> to vector<32x128xbf16>
      %163 = vector.extract_strided_slice %160 {offsets = [0, 128], sizes = [32, 128], strides = [1, 1]} : vector<32x384xf32> to vector<32x128xf32>
      %164 = arith.truncf %163 : vector<32x128xf32> to vector<32x128xbf16>
      %165 = vector.extract_strided_slice %160 {offsets = [0, 256], sizes = [32, 128], strides = [1, 1]} : vector<32x384xf32> to vector<32x128xf32>
      %166 = arith.truncf %165 : vector<32x128xf32> to vector<32x128xbf16>
      %c0_98 = arith.constant 0 : index
      %c0_99 = arith.constant 0 : index
      %167 = vector.load %arg6[%c0_98, %c0_99] : memref<256x32xbf16, #tpu.memory_space<vmem>>, vector<256x32xbf16>
      %cst_100 = arith.constant dense<0.000000e+00> : vector<256x128xf32>
      %168 = tpu.matmul %167, %164, %cst_100 {dimension_numbers = #tpu.dot_dimension_numbers<[1], [0], [0], [1], [0, 0, 1, 1], [], []>} : vector<256x32xbf16>, vector<32x128xbf16>, vector<256x128xf32> -> vector<256x128xf32>
      %169 = arith.truncf %168 : vector<256x128xf32> to vector<256x128xbf16>
      %c0_101 = arith.constant 0 : index
      %c0_102 = arith.constant 0 : index
      %170 = vector.load %arg7[%c0_101, %c0_102] : memref<256x128xbf16, #tpu.memory_space<vmem>>, vector<256x128xbf16>
      %171 = arith.mulf %169, %170 : vector<256x128xbf16>
      %c0_103 = arith.constant 0 : index
      %c0_104 = arith.constant 0 : index
      %172 = vector.load %arg6[%c0_103, %c0_104] : memref<256x32xbf16, #tpu.memory_space<vmem>>, vector<256x32xbf16>
      %cst_105 = arith.constant dense<0.000000e+00> : vector<256x128xf32>
      %173 = tpu.matmul %172, %166, %cst_105 {dimension_numbers = #tpu.dot_dimension_numbers<[1], [0], [0], [1], [0, 0, 1, 1], [], []>} : vector<256x32xbf16>, vector<32x128xbf16>, vector<256x128xf32> -> vector<256x128xf32>
      %174 = arith.truncf %173 : vector<256x128xf32> to vector<256x128xbf16>
      %c0_106 = arith.constant 0 : index
      %c0_107 = arith.constant 0 : index
      %175 = vector.load %arg7[%c0_106, %c0_107] : memref<256x128xbf16, #tpu.memory_space<vmem>>, vector<256x128xbf16>
      %176 = arith.mulf %174, %175 : vector<256x128xbf16>
      %cst_108 = arith.constant dense<0.000000e+00> : vector<32x256xf32>
      %177 = tpu.matmul %162, %171, %cst_108 {dimension_numbers = #tpu.dot_dimension_numbers<[1], [1], [0], [0], [0, 0, 1, 0], [], []>} : vector<32x128xbf16>, vector<256x128xbf16>, vector<32x256xf32> -> vector<32x256xf32>
      %178 = vector.broadcast %19 : vector<1x256xf32> to vector<32x256xf32>
      %179 = arith.addf %177, %178 : vector<32x256xf32>
      %cst_109 = arith.constant dense<0xFF800000> : vector<32xf32>
      %180 = vector.multi_reduction <maximumf>, %179, %cst_109 [1] : vector<32x256xf32> to vector<32xf32>
      %181 = vector.shape_cast %180 : vector<32xf32> to vector<32x1xf32>
      %182 = vector.broadcast %181 : vector<32x1xf32> to vector<32x256xf32>
      %183 = arith.subf %179, %182 : vector<32x256xf32>
      %184 = math.exp %183 : vector<32x256xf32>
      %185 = arith.truncf %184 : vector<32x256xf32> to vector<32x256xbf16>
      %cst_110 = arith.constant dense<0.000000e+00> : vector<32x128xf32>
      %186 = tpu.matmul %185, %176, %cst_110 {dimension_numbers = #tpu.dot_dimension_numbers<[1], [0], [0], [1], [0, 0, 1, 1], [], []>} : vector<32x256xbf16>, vector<256x128xbf16>, vector<32x128xf32> -> vector<32x128xf32>
      %c0_111 = arith.constant 0 : index
      %c0_112 = arith.constant 0 : index
      %187 = vector.load %arg7[%c0_111, %c0_112] : memref<256x128xbf16, #tpu.memory_space<vmem>>, vector<256x128xbf16>
      %cst_113 = arith.constant dense<0.000000e+00> : vector<32x128xf32>
      %188 = tpu.matmul %185, %187, %cst_113 {dimension_numbers = #tpu.dot_dimension_numbers<[1], [0], [0], [1], [0, 0, 1, 1], [], []>} : vector<32x256xbf16>, vector<256x128xbf16>, vector<32x128xf32> -> vector<32x128xf32>
      %cst_114 = arith.constant 1.000000e-30 : f32
      %189 = vector.broadcast %cst_114 : f32 to vector<32x128xf32>
      %190 = arith.addf %188, %189 : vector<32x128xf32>
      %191 = tpu.reciprocal %190 {approx = true} : vector<32x128xf32> -> vector<32x128xf32>
      %192 = arith.mulf %186, %191 : vector<32x128xf32>
      %193 = arith.truncf %192 : vector<32x128xf32> to vector<32x128xbf16>
      %c1_115 = arith.constant 1 : index
      %c0_116 = arith.constant 0 : index
      %c0_117 = arith.constant 0 : index
      %194 = vector.load %arg10[%c1_115, %c0_116, %c0_117] : memref<2x128x128xbf16, #tpu.memory_space<vmem>>, vector<1x128x128xbf16>
      %195 = vector.shape_cast %194 : vector<1x128x128xbf16> to vector<128x128xbf16>
      %cst_118 = arith.constant dense<0.000000e+00> : vector<32x128xf32>
      %196 = tpu.matmul %193, %195, %cst_118 {dimension_numbers = #tpu.dot_dimension_numbers<[1], [0], [0], [1], [0, 0, 1, 1], [], []>} : vector<32x128xbf16>, vector<128x128xbf16>, vector<32x128xf32> -> vector<32x128xf32>
      %c1_119 = arith.constant 1 : index
      %c0_120 = arith.constant 0 : index
      %c0_121 = arith.constant 0 : index
      %197 = vector.load %arg11[%c1_119, %c0_120, %c0_121] : memref<2x1x128xf32, #tpu.memory_space<vmem>>, vector<1x1x128xf32>
      %198 = vector.shape_cast %197 : vector<1x1x128xf32> to vector<1x128xf32>
      %199 = vector.broadcast %198 : vector<1x128xf32> to vector<32x128xf32>
      %200 = arith.addf %196, %199 : vector<32x128xf32>
      %201 = arith.addf %152, %200 : vector<32x128xf32>
      %c1_122 = arith.constant 1 : index
      %c0_123 = arith.constant 0 : index
      %c0_124 = arith.constant 0 : index
      %202 = vector.load %arg12[%c1_122, %c0_123, %c0_124] : memref<2x1x128xf32, #tpu.memory_space<vmem>>, vector<1x1x128xf32>
      %203 = vector.shape_cast %202 : vector<1x1x128xf32> to vector<1x128xf32>
      %c1_125 = arith.constant 1 : index
      %c0_126 = arith.constant 0 : index
      %c0_127 = arith.constant 0 : index
      %204 = vector.load %arg13[%c1_125, %c0_126, %c0_127] : memref<2x1x128xf32, #tpu.memory_space<vmem>>, vector<1x1x128xf32>
      %205 = vector.shape_cast %204 : vector<1x1x128xf32> to vector<1x128xf32>
      %cst_128 = arith.constant dense<0.000000e+00> : vector<32xf32>
      %206 = vector.multi_reduction <add>, %201, %cst_128 [1] : vector<32x128xf32> to vector<32xf32>
      %207 = vector.shape_cast %206 : vector<32xf32> to vector<32x1xf32>
      %cst_129 = arith.constant 1.280000e+02 : f32
      %208 = vector.broadcast %cst_129 : f32 to vector<32x1xf32>
      %209 = arith.divf %207, %208 : vector<32x1xf32>
      %210 = vector.broadcast %209 : vector<32x1xf32> to vector<32x128xf32>
      %211 = arith.subf %201, %210 : vector<32x128xf32>
      %212 = arith.mulf %211, %211 : vector<32x128xf32>
      %cst_130 = arith.constant dense<0.000000e+00> : vector<32xf32>
      %213 = vector.multi_reduction <add>, %212, %cst_130 [1] : vector<32x128xf32> to vector<32xf32>
      %214 = vector.shape_cast %213 : vector<32xf32> to vector<32x1xf32>
      %cst_131 = arith.constant 1.280000e+02 : f32
      %215 = vector.broadcast %cst_131 : f32 to vector<32x1xf32>
      %216 = arith.divf %214, %215 : vector<32x1xf32>
      %cst_132 = arith.constant 9.99999974E-6 : f32
      %217 = vector.broadcast %cst_132 : f32 to vector<32x1xf32>
      %218 = arith.addf %216, %217 : vector<32x1xf32>
      %219 = math.rsqrt %218 : vector<32x1xf32>
      %220 = vector.broadcast %219 : vector<32x1xf32> to vector<32x128xf32>
      %221 = arith.mulf %211, %220 : vector<32x128xf32>
      %222 = vector.broadcast %203 : vector<1x128xf32> to vector<32x128xf32>
      %223 = arith.mulf %221, %222 : vector<32x128xf32>
      %224 = vector.broadcast %205 : vector<1x128xf32> to vector<32x128xf32>
      %225 = arith.addf %223, %224 : vector<32x128xf32>
      %226 = arith.truncf %225 : vector<32x128xf32> to vector<32x128xbf16>
      %cst_133 = arith.constant 0.000000e+00 : f32
      %227 = vector.broadcast %cst_133 : f32 to vector<32x128xf32>
      %c1_134 = arith.constant 1 : index
      %c0_135 = arith.constant 0 : index
      %c0_136 = arith.constant 0 : index
      %228 = vector.load %arg16[%c1_134, %c0_135, %c0_136] : memref<2x128x512xbf16, #tpu.memory_space<vmem>>, vector<1x128x256xbf16>
      %229 = vector.shape_cast %228 : vector<1x128x256xbf16> to vector<128x256xbf16>
      %cst_137 = arith.constant dense<0.000000e+00> : vector<32x256xf32>
      %230 = tpu.matmul %226, %229, %cst_137 {dimension_numbers = #tpu.dot_dimension_numbers<[1], [0], [0], [1], [0, 0, 1, 1], [], []>} : vector<32x128xbf16>, vector<128x256xbf16>, vector<32x256xf32> -> vector<32x256xf32>
      %c1_138 = arith.constant 1 : index
      %c0_139 = arith.constant 0 : index
      %c0_140 = arith.constant 0 : index
      %231 = vector.load %arg17[%c1_138, %c0_139, %c0_140] : memref<2x1x512xf32, #tpu.memory_space<vmem>>, vector<1x1x256xf32>
      %232 = vector.shape_cast %231 : vector<1x1x256xf32> to vector<1x256xf32>
      %233 = vector.broadcast %232 : vector<1x256xf32> to vector<32x256xf32>
      %234 = arith.addf %230, %233 : vector<32x256xf32>
      %cst_141 = arith.constant 0.000000e+00 : f32
      %235 = vector.broadcast %cst_141 : f32 to vector<32x256xf32>
      %236 = arith.maximumf %234, %235 : vector<32x256xf32>
      %237 = arith.truncf %236 : vector<32x256xf32> to vector<32x256xbf16>
      %c1_142 = arith.constant 1 : index
      %c0_143 = arith.constant 0 : index
      %c0_144 = arith.constant 0 : index
      %238 = vector.load %arg18[%c1_142, %c0_143, %c0_144] : memref<2x512x128xbf16, #tpu.memory_space<vmem>>, vector<1x256x128xbf16>
      %239 = vector.shape_cast %238 : vector<1x256x128xbf16> to vector<256x128xbf16>
      %cst_145 = arith.constant dense<0.000000e+00> : vector<32x128xf32>
      %240 = tpu.matmul %237, %239, %cst_145 {dimension_numbers = #tpu.dot_dimension_numbers<[1], [0], [0], [1], [0, 0, 1, 1], [], []>} : vector<32x256xbf16>, vector<256x128xbf16>, vector<32x128xf32> -> vector<32x128xf32>
      %241 = arith.addf %227, %240 : vector<32x128xf32>
      %c1_146 = arith.constant 1 : index
      %c0_147 = arith.constant 0 : index
      %c256_148 = arith.constant 256 : index
      %242 = vector.load %arg16[%c1_146, %c0_147, %c256_148] : memref<2x128x512xbf16, #tpu.memory_space<vmem>>, vector<1x128x256xbf16>
      %243 = vector.shape_cast %242 : vector<1x128x256xbf16> to vector<128x256xbf16>
      %cst_149 = arith.constant dense<0.000000e+00> : vector<32x256xf32>
      %244 = tpu.matmul %226, %243, %cst_149 {dimension_numbers = #tpu.dot_dimension_numbers<[1], [0], [0], [1], [0, 0, 1, 1], [], []>} : vector<32x128xbf16>, vector<128x256xbf16>, vector<32x256xf32> -> vector<32x256xf32>
      %c1_150 = arith.constant 1 : index
      %c0_151 = arith.constant 0 : index
      %c256_152 = arith.constant 256 : index
      %245 = vector.load %arg17[%c1_150, %c0_151, %c256_152] : memref<2x1x512xf32, #tpu.memory_space<vmem>>, vector<1x1x256xf32>
      %246 = vector.shape_cast %245 : vector<1x1x256xf32> to vector<1x256xf32>
      %247 = vector.broadcast %246 : vector<1x256xf32> to vector<32x256xf32>
      %248 = arith.addf %244, %247 : vector<32x256xf32>
      %cst_153 = arith.constant 0.000000e+00 : f32
      %249 = vector.broadcast %cst_153 : f32 to vector<32x256xf32>
      %250 = arith.maximumf %248, %249 : vector<32x256xf32>
      %251 = arith.truncf %250 : vector<32x256xf32> to vector<32x256xbf16>
      %c1_154 = arith.constant 1 : index
      %c256_155 = arith.constant 256 : index
      %c0_156 = arith.constant 0 : index
      %252 = vector.load %arg18[%c1_154, %c256_155, %c0_156] : memref<2x512x128xbf16, #tpu.memory_space<vmem>>, vector<1x256x128xbf16>
      %253 = vector.shape_cast %252 : vector<1x256x128xbf16> to vector<256x128xbf16>
      %cst_157 = arith.constant dense<0.000000e+00> : vector<32x128xf32>
      %254 = tpu.matmul %251, %253, %cst_157 {dimension_numbers = #tpu.dot_dimension_numbers<[1], [0], [0], [1], [0, 0, 1, 1], [], []>} : vector<32x256xbf16>, vector<256x128xbf16>, vector<32x128xf32> -> vector<32x128xf32>
      %255 = arith.addf %241, %254 : vector<32x128xf32>
      %256 = arith.addf %225, %255 : vector<32x128xf32>
      %c1_158 = arith.constant 1 : index
      %c0_159 = arith.constant 0 : index
      %c0_160 = arith.constant 0 : index
      %257 = vector.load %arg19[%c1_158, %c0_159, %c0_160] : memref<2x1x128xf32, #tpu.memory_space<vmem>>, vector<1x1x128xf32>
      %258 = vector.shape_cast %257 : vector<1x1x128xf32> to vector<1x128xf32>
      %259 = vector.broadcast %258 : vector<1x128xf32> to vector<32x128xf32>
      %260 = arith.addf %256, %259 : vector<32x128xf32>
      %c1_161 = arith.constant 1 : index
      %c0_162 = arith.constant 0 : index
      %c0_163 = arith.constant 0 : index
      %261 = vector.load %arg14[%c1_161, %c0_162, %c0_163] : memref<2x1x128xf32, #tpu.memory_space<vmem>>, vector<1x1x128xf32>
      %262 = vector.shape_cast %261 : vector<1x1x128xf32> to vector<1x128xf32>
      %c1_164 = arith.constant 1 : index
      %c0_165 = arith.constant 0 : index
      %c0_166 = arith.constant 0 : index
      %263 = vector.load %arg15[%c1_164, %c0_165, %c0_166] : memref<2x1x128xf32, #tpu.memory_space<vmem>>, vector<1x1x128xf32>
      %264 = vector.shape_cast %263 : vector<1x1x128xf32> to vector<1x128xf32>
      %cst_167 = arith.constant dense<0.000000e+00> : vector<32xf32>
      %265 = vector.multi_reduction <add>, %260, %cst_167 [1] : vector<32x128xf32> to vector<32xf32>
      %266 = vector.shape_cast %265 : vector<32xf32> to vector<32x1xf32>
      %cst_168 = arith.constant 1.280000e+02 : f32
      %267 = vector.broadcast %cst_168 : f32 to vector<32x1xf32>
      %268 = arith.divf %266, %267 : vector<32x1xf32>
      %269 = vector.broadcast %268 : vector<32x1xf32> to vector<32x128xf32>
      %270 = arith.subf %260, %269 : vector<32x128xf32>
      %271 = arith.mulf %270, %270 : vector<32x128xf32>
      %cst_169 = arith.constant dense<0.000000e+00> : vector<32xf32>
      %272 = vector.multi_reduction <add>, %271, %cst_169 [1] : vector<32x128xf32> to vector<32xf32>
      %273 = vector.shape_cast %272 : vector<32xf32> to vector<32x1xf32>
      %cst_170 = arith.constant 1.280000e+02 : f32
      %274 = vector.broadcast %cst_170 : f32 to vector<32x1xf32>
      %275 = arith.divf %273, %274 : vector<32x1xf32>
      %cst_171 = arith.constant 9.99999974E-6 : f32
      %276 = vector.broadcast %cst_171 : f32 to vector<32x1xf32>
      %277 = arith.addf %275, %276 : vector<32x1xf32>
      %278 = math.rsqrt %277 : vector<32x1xf32>
      %279 = vector.broadcast %278 : vector<32x1xf32> to vector<32x128xf32>
      %280 = arith.mulf %270, %279 : vector<32x128xf32>
      %281 = vector.broadcast %262 : vector<1x128xf32> to vector<32x128xf32>
      %282 = arith.mulf %280, %281 : vector<32x128xf32>
      %283 = vector.broadcast %264 : vector<1x128xf32> to vector<32x128xf32>
      %284 = arith.addf %282, %283 : vector<32x128xf32>
      %c0_172 = arith.constant 0 : index
      %c0_173 = arith.constant 0 : index
      %285 = vector.load %arg5[%c0_172, %c0_173] : memref<1x128xf32, #tpu.memory_space<vmem>>, vector<1x128xf32>
      %286 = vector.broadcast %285 : vector<1x128xf32> to vector<32x128xf32>
      %287 = arith.mulf %284, %286 : vector<32x128xf32>
      %cst_174 = arith.constant dense<0.000000e+00> : vector<32xf32>
      %288 = vector.multi_reduction <add>, %287, %cst_174 [1] : vector<32x128xf32> to vector<32xf32>
      %289 = vector.shape_cast %288 : vector<32xf32> to vector<32x1xf32>
      %c1_i32_175 = arith.constant 1 : i32
      %290 = arith.subi %14, %c1_i32_175 : i32
      %291 = vector.broadcast %290 : i32 to vector<32x1xi32>
      %292 = arith.cmpi eq, %3, %291 : vector<32x1xi32>
      %cst_176 = arith.constant 0.000000e+00 : f32
      %293 = vector.broadcast %cst_176 : f32 to vector<32x1xf32>
      %294 = arith.select %292, %289, %293 : vector<32x1xi1>, vector<32x1xf32>
      %cst_177 = arith.constant dense<0.000000e+00> : vector<1xf32>
      %295 = vector.multi_reduction <add>, %294, %cst_177 [0] : vector<32x1xf32> to vector<1xf32>
      %296 = vector.shape_cast %295 : vector<1xf32> to vector<1x1xf32>
      %c0_178 = arith.constant 0 : index
      %297 = memref.load %arg1[%c0_178] : memref<1xf32, #tpu.memory_space<smem>>
      %298 = vector.broadcast %297 : f32 to vector<1x1xf32>
      %299 = arith.addf %296, %298 : vector<1x1xf32>
      %300 = vector.shape_cast %299 : vector<1x1xf32> to vector<1x1xf32>
      %301 = vector.broadcast %300 : vector<1x1xf32> to vector<1x128xf32>
      %302 = arith.index_cast %arg22 : i32 to index
      %c0_179 = arith.constant 0 : index
      %303 = vector.load %arg20[%302, %c0_179] : memref<4x128xf32, #tpu.memory_space<vmem>>, vector<1x128xf32>
      tpu.vector_store %arg20[%302, %c0_179], %301 {strides = array<i32>} : memref<4x128xf32, #tpu.memory_space<vmem>>, vector<1x128xf32>,
      %c32_i32 = arith.constant 32 : i32
      %304 = arith.cmpi slt, %14, %c32_i32 : i32
      %305 = arith.extui %304 : i1 to i32
      %c0_i32_180 = arith.constant 0 : i32
      %306 = arith.cmpi ne, %305, %c0_i32_180 : i32
      scf.if %306 {
        %c0_181 = arith.constant 0 : index
        %c0_182 = arith.constant 0 : index
        %307 = vector.load %arg4[%c0_181, %c0_182] : memref<1x128xf32, #tpu.memory_space<vmem>>, vector<1x128xf32>
        %308 = vector.broadcast %299 : vector<1x1xf32> to vector<1x128xf32>
        %309 = arith.mulf %308, %307 : vector<1x128xf32>
        %310 = arith.index_cast %14 : i32 to index
        %c0_183 = arith.constant 0 : index
        %311 = vector.load %arg3[%310, %c0_183] : memref<32x128xf32, #tpu.memory_space<vmem>>, vector<1x128xf32>
        %312 = arith.addf %309, %311 : vector<1x128xf32>
        %313 = arith.index_cast %14 : i32 to index
        %c0_184 = arith.constant 0 : index
        %314 = vector.load %arg21[%313, %c0_184] : memref<32x128xf32, #tpu.memory_space<vmem>>, vector<1x128xf32>
        tpu.vector_store %arg21[%313, %c0_184], %312 {strides = array<i32>} : memref<32x128xf32, #tpu.memory_space<vmem>>, vector<1x128xf32>,
      } else {
      }
    }
    %c4_i32_8 = arith.constant 4 : i32
    return
  }
}

</mosaic_0001>

<bundles_post_ra>
// kernel: _generate.1
= control target key start
LH: loop header
LB: loop body
LE: loop exit
PB: predicated region body
PF: predicated region fallthrough
CT: control target
= control target key end

     0   :  { %s6787_s0 = inlined_call_operand.<no memory space> [shape: s32[1], index: 0, kind: input, shape index: {}]   ;;  %s6788_s1 = inlined_call_operand.<no memory space> [shape: f32[1], index: 1, kind: input, shape index: {}]   ;;  %s6789_s2 = inlined_call_operand.vmem [shape: f32[32,1], index: 2, kind: input, shape index: {}]   ;;  %s6790_s3 = inlined_call_operand.vmem [shape: f32[32,128], index: 3, kind: input, shape index: {}]   ;;  %s6791_s4 = inlined_call_operand.vmem [shape: f32[1,128], index: 4, kind: input, shape index: {}]   ;;  %s6792_s5 = inlined_call_operand.hbm [shape: f32[1,128], index: 5, kind: input, shape index: {}]   ;;  %s6793_s6 = inlined_call_operand.vmem [shape: bf16[256,32], index: 6, kind: input, shape index: {}]   ;;  %s6794_s7 = inlined_call_operand.vmem [shape: bf16[256,128], index: 7, kind: input, shape index: {}]   ;;  %s6795_s8 = inlined_call_operand.hbm [shape: bf16[2,128,384], index: 8, kind: input, shape index: {}]   ;;  %s6796_s9 = inlined_call_operand.vmem [shape: f32[2,1,384], index: 9, kind: input, shape index: {}]   ;;  %s6797_s10 = inlined_call_operand.hbm [shape: bf16[2,128,128], index: 10, kind: input, shape index: {}]   ;;  %s6798_s11 = inlined_call_operand.vmem [shape: f32[2,1,128], index: 11, kind: input, shape index: {}]   ;;  %s6799_s12 = inlined_call_operand.vmem [shape: f32[2,1,128], index: 12, kind: input, shape index: {}]   ;;  %s6800_s13 = inlined_call_operand.vmem [shape: f32[2,1,128], index: 13, kind: input, shape index: {}]   ;;  %s6801_s14 = inlined_call_operand.vmem [shape: f32[2,1,128], index: 14, kind: input, shape index: {}]   ;;  %s6802_s15 = inlined_call_operand.vmem [shape: f32[2,1,128], index: 15, kind: input, shape index: {}]   ;;  %s6803_s16 = inlined_call_operand.hbm [shape: bf16[2,128,512], index: 16, kind: input, shape index: {}]   ;;  %s6804_s17 = inlined_call_operand.vmem [shape: f32[2,1,512], index: 17, kind: input, shape index: {}]   ;;  %s6805_s18 = inlined_call_operand.hbm [shape: bf16[2,512,128], index: 18, kind: input, shape index: {}]   ;;  %s6806_s19 = inlined_call_operand.hbm [shape: f32[2,1,128], index: 19, kind: input, shape index: {}]   ;;  %s6807_s20 = inlined_call_operand.vmem [shape: f32[4,128], index: 20, kind: output, shape index: {}]  }
   0x1   :  { %6822 = sst [smem:[#allocation28_spill]] %s6787_s0 }
   0x2   :  { %6823 = sst [smem:[#allocation29_spill]] %s6788_s1 }
   0x3   :  { %6824 = sst [smem:[#allocation30_spill]] %s6789_s2 }
   0x4   :  { %6825 = sst [smem:[#allocation31_spill]] %s6790_s3 }
   0x5   :  { %6826 = sst [smem:[#allocation32_spill]] %s6791_s4 }
   0x6   :  { %s6827_s23 = sld [smem:[#allocation29_spill]] }
   0xc   :  { %26 = sst [smem:[#allocation4]] %s6827_s23 }
   0xd   :  { %27 = vsyncpa [#allocation6], 0 }
   0xe   :  { %28 = vsyncpa [#allocation8], 0 }
   0xf   :  { %29 = vsyncpa [#allocation11], 0 }
  0x10   :  { %30 = vsyncpa [#allocation14], 0  ;;  %s5752_s24 = smov [#allocation7]  }
  0x11   :  { %s60_s2 = sshll.u32 %s5752_s24, 4  ;;  %s61_s2 = int_to_ptr.vmem [resolvable:$true] %s60_s2 }
  0x12   :  { %s5624_s25 = scalar_lea.vmem %s61_s2, 6144  ;;  %p5629_p1 = scmp.lt.s32.totalorder %s61_s2, %s61_s2 }
  0x13   :  { %p5625_p0 = scmp.ne.s32.totalorder %s61_s2, %s5624_s25  ;;  %p5630_p2 = scmp.lt.s32.totalorder %s5624_s25, %s5624_s25 }
  0x15   :  { %p5631_p3 = por %p5630_p2, %p5629_p1 }
  0x17   :  { %p5632_p4 = pnand %p5631_p3, %p5625_p0 }
  0x19   :  { %5635 = shalt.err (!%p5632_p4)
}
  0x1a   :  { %s5753_s3 = smov 192   ;;  %s5754_s26 = smov 12  }
  0x1b   :  { %66 = dma.hbm_to_vmem [thread:$0]  %s6795_s8, 6144, %s61_s2, [#allocation8], %s5753_s3, %s5753_s3, %s5754_s26  }
  0x1c   :  { %s5755_s4 = smov [#allocation10]  }
  0x1d   :  { %s96_s29 = sshll.u32 %s5755_s4, 4  ;;  %s97_s29 = int_to_ptr.vmem [resolvable:$true] %s96_s29 }
  0x1e   :  { %s5644_s30 = scalar_lea.vmem %s97_s29, 8192  ;;  %p5649_p6 = scmp.lt.s32.totalorder %s97_s29, %s97_s29 }
  0x1f   :  { %p5645_p5 = scmp.ne.s32.totalorder %s97_s29, %s5644_s30  ;;  %p5650_p7 = scmp.lt.s32.totalorder %s5644_s30, %s5644_s30 }
  0x21   :  { %p5651_p8 = por %p5650_p7, %p5649_p6 }
  0x23   :  { %p5652_p9 = pnand %p5651_p8, %p5645_p5 }
  0x25   :  { %5655 = shalt.err (!%p5652_p9)
}
  0x26   :  { %s5756_s0 = smov 256   ;;  %s5757_s21 = smov 16  }
  0x27   :  { %102 = dma.hbm_to_vmem [thread:$0]  %s6803_s16, 8192, %s97_s29, [#allocation11], %s5756_s0, %s5756_s0, %s5757_s21  }
  0x28   :  { %s5758_s23 = smov [#allocation5]   ;;  %s5759_s8 = smov [#allocation9]  }
  0x29   :  { %s47_s24 = sshll.u32 %s5758_s23, 4  ;;  %s74_s2 = sshll.u32 %s5759_s8, 4  ;;  %s48_s24 = int_to_ptr.vmem [resolvable:$true] %s47_s24  ;;  %s75_s2 = int_to_ptr.vmem [resolvable:$true] %s74_s2 }
  0x2a   :  { %s5664_s25 = scalar_lea.vmem %s48_s24, 16  ;;  %s5668_s3 = scalar_lea.vmem %s48_s24, 32 }
  0x2b   :  { %p5665_p10 = scmp.ne.s32.totalorder %s48_s24, %s5664_s25  ;;  %p5669_p11 = scmp.lt.s32.totalorder %s48_s24, %s48_s24 }
  0x2c   :  { %p5670_p12 = scmp.lt.s32.totalorder %s5668_s3, %s5664_s25 }
  0x2e   :  { %p5671_p13 = por %p5670_p12, %p5669_p11 }
  0x30   :  { %p5672_p0 = pnand %p5671_p13, %p5665_p10 }
  0x32   :  { %5675 = shalt.err (!%p5672_p0)
}
  0x33   :  { %50 = dma.hbm_to_vmem [thread:$0]  %s6792_s5, 16, %s48_s24, [#allocation6]  }
  0x34   :  { %s5684_s28 = scalar_lea.vmem %s75_s2, 2048  ;;  %p5689_p2 = scmp.lt.s32.totalorder %s75_s2, %s75_s2 }
  0x35   :  { %p5685_p1 = scmp.ne.s32.totalorder %s75_s2, %s5684_s28  ;;  %p5690_p3 = scmp.lt.s32.totalorder %s5684_s28, %s5684_s28 }
  0x37   :  { %p5691_p4 = por %p5690_p3, %p5689_p2 }
  0x39   :  { %p5692_p5 = pnand %p5691_p4, %p5685_p1 }
  0x3b   :  { %5695 = shalt.err (!%p5692_p5)
}
  0x3c   :  { %s5760_s16 = smov 64   ;;  %s5761_s4 = smov 4  }
  0x3d   :  { %80 = dma.hbm_to_vmem [thread:$0]  %s6797_s10, 2048, %s75_s2, [#allocation8], %s5760_s16, %s5760_s16, %s5761_s4  }
  0x3e   :  { %s5762_s0 = smov [#allocation12]   ;;  %s5763_s22 = smov [#allocation13]  }
  0x3f   :  { %s110_s1 = sshll.u32 %s5762_s0, 4  ;;  %s122_s23 = sshll.u32 %s5763_s22, 4  ;;  %s111_s1 = int_to_ptr.vmem [resolvable:$true] %s110_s1  ;;  %s123_s23 = int_to_ptr.vmem [resolvable:$true] %s122_s23 }
  0x40   :  { %s5704_s5 = scalar_lea.vmem %s111_s1, 8192  ;;  %p5709_p7 = scmp.lt.s32.totalorder %s111_s1, %s111_s1 }
  0x41   :  { %p5705_p6 = scmp.ne.s32.totalorder %s111_s1, %s5704_s5  ;;  %p5710_p8 = scmp.lt.s32.totalorder %s5704_s5, %s5704_s5 }
  0x43   :  { %p5711_p9 = por %p5710_p8, %p5709_p7 }
  0x45   :  { %p5712_p10 = pnand %p5711_p9, %p5705_p6 }
  0x47   :  { %5715 = shalt.err (!%p5712_p10)
}
  0x48   :  { %116 = dma.hbm_to_vmem [thread:$0]  %s6805_s18, 8192, %s111_s1, [#allocation11], %s5760_s16, %s5760_s16, %s5761_s4  }
  0x49   :  { %s5724_s25 = scalar_lea.vmem %s123_s23, 32  ;;  %p5729_p12 = scmp.lt.s32.totalorder %s123_s23, %s123_s23 }
  0x4a   :  { %p5725_p11 = scmp.ne.s32.totalorder %s123_s23, %s5724_s25  ;;  %p5730_p13 = scmp.lt.s32.totalorder %s5724_s25, %s5724_s25 }
  0x4c   :  { %p5731_p0 = por %p5730_p13, %p5729_p12 }
  0x4e   :  { %p5732_p1 = pnand %p5731_p0, %p5725_p11 }
  0x50   :  { %5735 = shalt.err (!%p5732_p1)
}
  0x51   :  { %s5764_s10 = smov 1  }
  0x52   :  { %128 = dma.hbm_to_vmem [thread:$0]  %s6806_s19, 32, %s123_s23, [#allocation14], %s5757_s21, %s5757_s21, %s5764_s10  }
  0x53   :  { %5740 = dma.done.wait [#allocation6], 16  }
  0x54   :  { %5741 = vsyncadd [#allocation6], 4294967280 }
  0x55   :  { %5742 = dma.done.wait [#allocation8], 8192  }
  0x56   :  { %5743 = vsyncadd [#allocation8], 4294959104 }
  0x57   :  { %5744 = dma.done.wait [#allocation11], 16384  }
  0x58   :  { %5745 = vsyncadd [#allocation11], 4294950912 }
  0x59   :  { %5746 = dma.done.wait [#allocation14], 32  }
  0x5a   :  { %5747 = vsyncadd [#allocation14], 4294967264  ;;  %v5765_v0 = vmov 0   ;;  %v148_v1 = vlaneseq  ;;  %s6828_s27 = sld [smem:[#allocation30_spill]]  ;;  %s5942_s18 = smov 0  }
  0x5b   :  { %5227 = vset.pattern.permute.xlu1 %v5765_v0  ;;  %5226 = vset.pattern.permute.xlu0 %v5765_v0  ;;  %s6835_s1 = sld [smem:[#allocation32_spill]] }
  0x5c   :  { %v5903_v4 = vand.u32 127, %v148_v1  ;;  %v5914_v8 = vshrl.u32 %v148_v1, 7  ;;  %s6836_s5 = sld [smem:[#allocation31_spill]] }
  0x5e   :  { %6829 = vst [vmem:[#allocation19_spill] sm:$0xff] %v5903_v4  ;;  %v5912_v7 = vadd.s32 128, %v5903_v4  ;;  %6831 = vst [vmem:[#allocation21_spill] sm:$0xff] %v5914_v8  ;;  %v5919_v11 = vadd.s32 8, %v5914_v8  ;;  %v5922_v12 = vadd.s32 16, %v5914_v8  ;;  %v5925_v13 = vadd.s32 24, %v5914_v8 }
  0x60   :  { %v164_v2 = vld [vmem:[%s6828_s27 + $0x10] sm:$0xff]  ;;  %v162_v3 = vld [vmem:[%s6828_s27] sm:$0xff]  ;;  %v165_v5 = vld [vmem:[%s6828_s27 + $0x18] sm:$0xff]  ;;  %6830 = vst [vmem:[#allocation20_spill] sm:$0xff] %v5912_v7 }
  0x61   :  { %179 = vperm.xlu1 %5227, %v164_v2   ;;  %169 = vperm.xlu0 %5226, %v162_v3   ;;  %v163_v6 = vld [vmem:[%s6828_s27 + $0x8] sm:$0xff]  ;;  %6832 = vst [vmem:[#allocation22_spill] sm:$0xff] %v5919_v11  ;;  %6833 = vst [vmem:[#allocation23_spill] sm:$0xff] %v5922_v12  ;;  %v4290_v14 = vld [vmem:[%s6835_s1] ss:$0 sm:$0xff] }
  0x62   :  { %6834 = vst [vmem:[#allocation24_spill] sm:$0xff] %v5925_v13  ;;  %v160_v16 = vld [vmem:[%s6836_s5 + $0x10] sm:$0xff]  ;;  %v158_v18 = vld [vmem:[%s6836_s5] sm:$0xff]  ;;  %v161_v24 = vld [vmem:[%s6836_s5 + $0x18] sm:$0xff] }
  0x63   :  { %v159_v26 = vld [vmem:[%s6836_s5 + $0x8] sm:$0xff] }
  0x65   :  { %184 = vperm.xlu1 %5227, %v165_v5   ;;  %174 = vperm.xlu0 %5226, %v163_v6  }
  0xdc   :  { %v180_v15 = vpop.permute.xlu1 %179  ;;  %v170_v17 = vpop.permute.xlu0 %169 }
  0xdd   :  { %v195_v19 = vmul.f32 %v4290_v14, %v180_v15  ;;  %v193_v20 = vmul.f32 %v4290_v14, %v170_v17 }
  0xdf   :  { %v199_v21 = vadd.f32 %v195_v19, %v160_v16  ;;  %v197_v22 = vadd.f32 %v193_v20, %v158_v18 }
  0xe0   :  { %v185_v23 = vpop.permute.xlu1 %184  ;;  %v175_v25 = vpop.permute.xlu0 %174 }
  0xe1   :  { %203 = vst [vmem:[#allocation2 + $0x10] sm:$0xff] %v199_v21  ;;  %201 = vst [vmem:[#allocation2] sm:$0xff] %v197_v22  ;;  %v196_v27 = vmul.f32 %v4290_v14, %v185_v23  ;;  %v194_v28 = vmul.f32 %v4290_v14, %v175_v25 }
  0xe3   :  { %v200_v29 = vadd.f32 %v196_v27, %v161_v24  ;;  %v198_v30 = vadd.f32 %v194_v28, %v159_v26 }
  0xe5   :  { %204 = vst [vmem:[#allocation2 + $0x18] sm:$0xff] %v200_v29  ;;  %202 = vst [vmem:[#allocation2 + $0x8] sm:$0xff] %v198_v30 }
  0xe6 LB: > { %v6837_v8 = vld [vmem:[#allocation21_spill] sm:$0xff]  ;;  %v6811_v33 = vmov 0   ;;  %v5234_v36 = vld [vmem:[#allocation7 + $0x7c] ss:$12 sps:$4 sm:$0xff]   ;;  %v5239_v40 = vld [vmem:[#allocation7 + $0x60] ss:$12 sps:$4 sm:$0xff]   ;;  %s4259_s5 = scalar_lea.vmem %s6807_s20, %s5750_s18  ;;  %s5750_s18 = sphi %s5942_s18, %s211_s18  }
  0xe7   : > { %v5228_v31 = vld [vmem:[#allocation7 + $0xac] ss:$12 sps:$4 sm:$0xff]   ;;  %v5230_v32 = vld [vmem:[#allocation7 + $0xa8] ss:$12 sps:$4 sm:$0xff]   ;;  %433 = vmatprep.mubr.bf16.mxu0 %v6811_v33  ;;  %v5233_v35 = vld [vmem:[#allocation7 + $0x90] ss:$12 sps:$4 sm:$0xff]  }
  0xe8   : > { %401 = vmatprep.subr.bf16.mxu0 %v5228_v31  ;;  %v5231_v34 = vld [vmem:[#allocation7 + $0x94] ss:$12 sps:$4 sm:$0xff]   ;;  %v5236_v37 = vld [vmem:[#allocation7 + $0x78] ss:$12 sps:$4 sm:$0xff]   ;;  %v5252_v44 = vld [vmem:[#allocation7 + $0xb0] ss:$12 sps:$4 sm:$0xff]  }
  0xe9   : > { %402 = vmatpush1.bf16.msra.mxu0 %v5230_v32  ;;  %v5237_v38 = vld [vmem:[#allocation7 + $0x64] ss:$12 sps:$4 sm:$0xff]   ;;  %v5240_v41 = vld [vmem:[#allocation7 + $0x4c] ss:$12 sps:$4 sm:$0xff]   ;;  %v5242_v46 = vld [vmem:[#allocation7 + $0x48] ss:$12 sps:$4 sm:$0xff]   ;;  %4978 = vmatprep.subr.bf16.mxu1 %v5252_v44 }
  0xea   : > { %403 = vmatprep.subr.bf16.mxu0 %v5231_v34  ;;  %v218_v39 = vld [vmem:[#allocation2] sm:$0xff]  ;;  %4979 = vmatpush3.bf16.msra.mxu1 %v5252_v44  ;;  %v5255_v51 = vld [vmem:[#allocation7 + $0x68] ss:$12 sps:$4 sm:$0xff]   ;;  %vm621_vm0 = vcmask 261120   ;;  %v5955_v63 = vsub.s32 0, %v6837_v8  ;;  %v5964_v18 = vsub.s32 1, %v6837_v8 }
  0xeb   : > { %v5253_v45 = vld [vmem:[#allocation7 + $0x98] ss:$12 sps:$4 sm:$0xff]   ;;  %v5243_v47 = vld [vmem:[#allocation7 + $0x34] ss:$12 sps:$4 sm:$0xff]   ;;  %v5245_v49 = vld [vmem:[#allocation7 + $0x30] ss:$12 sps:$4 sm:$0xff]  }
  0xec   : > { %v219_v42 = vld [vmem:[#allocation2 + $0x8] sm:$0xff]  ;;  %4980 = vmatprep.subr.bf16.mxu1 %v5253_v45  ;;  %v5256_v54 = vld [vmem:[#allocation7 + $0x50] ss:$12 sps:$4 sm:$0xff]   ;;  %6838 = vst [vmem:[#allocation25_spill] sm:$0xff] %v5955_v63  ;;  %6839 = vst [vmem:[#allocation26_spill] sm:$0xff] %v5964_v18  ;;  %s6842_s30 = sld [smem:[#allocation28_spill]] }
  0xed   : > { %404 = vmatpush1.bf16.msra.mxu0 %v5233_v35  ;;  %v222_v43 = vpack.c.bf16 %v219_v42, %v218_v39  ;;  %v5254_v48 = vld [vmem:[#allocation7 + $0x80] ss:$12 sps:$4 sm:$0xff]   ;;  %v5246_v50 = vld [vmem:[#allocation7 + $0x1c] ss:$12 sps:$4 sm:$0xff]   ;;  %v5248_v52 = vld [vmem:[#allocation7 + $0x18] ss:$12 sps:$4 sm:$0xff]  }
  0xee   : > { %405 = vmatprep.subr.bf16.mxu0 %v5234_v36  ;;  %4981 = vmatpush3.bf16.msra.mxu1 %v5253_v45  ;;  %v5249_v53 = vld [vmem:[#allocation7 + $0x4] ss:$12 sps:$4 sm:$0xff]   ;;  %v5251_v55 = vld [vmem:[#allocation7] ss:$12 sps:$4 sm:$0xff]   ;;  %v221_v58 = vld [vmem:[#allocation2 + $0x18] sm:$0xff]  ;;  %v6810_v45 = vsub.s32 2, %v6837_v8 }
  0xef   : > { %4994 = vmatprep.mubr.bf16.mxu1 %v222_v43  ;;  %4982 = vmatprep.subr.bf16.mxu1 %v5254_v48  ;;  %v5257_v56 = vld [vmem:[#allocation7 + $0x38] ss:$12 sps:$4 sm:$0xff]   ;;  %v220_v57 = vld [vmem:[#allocation2 + $0x10] sm:$0xff]  ;;  %v256_v0 = vld [vmem:[%s6796_s9] sm:$0x7]  ;;  %s4256_s1 = sld [smem:[#allocation4]] }
  0xf0   : > { %v223_v59 = vpack.c.bf16 %v221_v58, %v220_v57  ;;  %v5258_v60 = vld [vmem:[#allocation7 + $0x20] ss:$12 sps:$4 sm:$0xff]   ;;  %v5259_v61 = vld [vmem:[#allocation7 + $0x8] ss:$12 sps:$4 sm:$0xff]   ;;  %v261_v2 = vrot.slane %v256_v0, %v5955_v63  ;;  %v265_v22 = vrot.slane %v256_v0, %v5964_v18 }
  0xf1   : > { %406 = vmatpush1.bf16.msra.mxu0 %v5236_v37  ;;  %v5260_v62 = vld [vmem:[%s6793_s6] sm:$0xff]   ;;  %v5261_v32 = vld [vmem:[%s6793_s6 + $0x8] sm:$0xff]   ;;  %v5262_v34 = vld [vmem:[%s6793_s6 + $0x10] sm:$0xff]  }
  0xf2   : > { %407 = vmatprep.subr.bf16.mxu0 %v5237_v38  ;;  %4983 = vmatpush3.bf16.msra.mxu1 %v5254_v48  ;;  %v5263_v35 = vld [vmem:[%s6793_s6 + $0x18] sm:$0xff]   ;;  %v5264_v36 = vld [vmem:[%s6793_s6 + $0x20] sm:$0xff]   ;;  %v5265_v37 = vld [vmem:[%s6793_s6 + $0x28] sm:$0xff]   ;;  %v269_v48 = vrot.slane %v256_v0, %v6810_v45  ;;  %s6261_s0 = sadd.s32 %s5750_s18, %s6842_s30 }
  0xf3   : > { %4984 = vmatprep.subr.bf16.mxu1 %v5255_v51  ;;  %v5266_v38 = vld [vmem:[%s6793_s6 + $0x30] sm:$0xff]   ;;  %v5267_v39 = vld [vmem:[%s6793_s6 + $0x38] sm:$0xff]   ;;  %v5272_v44 = vld [vmem:[%s6793_s6 + $0x60] sm:$0xff]   ;;  %s4600_s30 = sadd.s32 4294967295, %s6261_s0  ;;  %p4601_p2 = scmp.ge.s32.totalorder %s6261_s0, 32 }
  0xf4   : > { %v5270_v42 = vld [vmem:[%s6793_s6 + $0x50] sm:$0xff]   ;;  %v6843_v4 = vld [vmem:[#allocation19_spill] sm:$0xff]  ;;  %s6863_s25 = sld [smem:[#allocation32_spill]] (!%p4601_p2)  ;;  %s4270_s27 = scalar_lea.vmem (!%p4601_p2), [#allocation2], %s6261_s0 }
  0xf5   : > { %408 = vmatpush1.bf16.msra.mxu0 %v5239_v40  ;;  %v5268_v40 = vld [vmem:[%s6793_s6 + $0x40] sm:$0xff]   ;;  %v6845_v7 = vld [vmem:[#allocation20_spill] sm:$0xff]  ;;  %s6864_s3 = sld [smem:[#allocation31_spill]] (!%p4601_p2) }
  0xf6   : > { %409 = vmatprep.subr.bf16.mxu0 %v5240_v41  ;;  %4985 = vmatpush3.bf16.msra.mxu1 %v5255_v51  ;;  %v5269_v41 = vld [vmem:[%s6793_s6 + $0x48] sm:$0xff]  }
  0xf7   : > { %4986 = vmatprep.subr.bf16.mxu1 %v5256_v54 }
  0xf9   : > { %410 = vmatpush1.bf16.msra.mxu0 %v5242_v46  ;;  %v5273_v46 = vld [vmem:[%s6793_s6 + $0x68] sm:$0xff]  }
  0xfa   : > { %411 = vmatprep.subr.bf16.mxu0 %v5243_v47  ;;  %4987 = vmatpush3.bf16.msra.mxu1 %v5256_v54  ;;  %v5274_v47 = vld [vmem:[%s6793_s6 + $0x70] sm:$0xff]  }
  0xfb   : > { %4988 = vmatprep.subr.bf16.mxu1 %v5257_v56  ;;  %s4267_s26 = scalar_lea.vmem (!%p4601_p2), %s6864_s3, %s6261_s0 }
  0xfd   : > { %412 = vmatpush1.bf16.msra.mxu0 %v5245_v49 }
  0xfe   : > { %413 = vmatprep.subr.bf16.mxu0 %v5246_v50  ;;  %4989 = vmatpush3.bf16.msra.mxu1 %v5257_v56 }
  0xff   : > { %4990 = vmatprep.subr.bf16.mxu1 %v5258_v60 }
 0x101   : > { %414 = vmatpush1.bf16.msra.mxu0 %v5248_v52 }
 0x102   : > { %415 = vmatprep.subr.bf16.mxu0 %v5249_v53  ;;  %4991 = vmatpush3.bf16.msra.mxu1 %v5258_v60  ;;  %v5275_v53 = vld [vmem:[%s6793_s6 + $0x78] sm:$0xff]  }
 0x103   : > { %4992 = vmatprep.subr.bf16.mxu1 %v5259_v61 }
 0x105   : > { %416 = vmatpush1.bf16.msra.mxu0 %v5251_v55 }
 0x106   : > { %4993 = vmatpush3.bf16.msra.mxu1 %v5259_v61 }
 0x108   : > { %434 = vmatmul.mubr.bf16.vlgmr.msra.gmra.mxu0 %v222_v43  ;;  %v5271_v43 = vld [vmem:[%s6793_s6 + $0x58] sm:$0xff]  }
 0x109   : > { %443 = vmatprep.mubr.bf16.mxu0 %v6811_v33  ;;  %4995 = vmatmul.mubr.bf16.vlgmr.msra.gmra.mxu1 %v223_v59 }
 0x10a   : > { %5002 = vmatprep.mubr.msk.bf16.mxu1 %vm621_vm0, %v5260_v62 }
 0x110   : > { %444 = vmatmul.mubr.bf16.gmra.mxu0 %v223_v59 }
 0x111   : > { %5038 = vmatprep.mubr.msk.bf16.mxu0 %vm621_vm0, %v5260_v62 }
 0x1c8   : > { %v435_v1 = vpop.f32.mrf.mxu0 }
 0x1c9   : > { %v436_v6 = vadd.f32 %v435_v1, %v261_v2  ;;  %v4996_v49 = vpop.f32.mrf.mxu1 }
 0x1ca   : > { %v437_v3 = vpop.f32.mrf.mxu0  ;;  %v497_v51 = vadd.f32 %v4996_v49, %v269_v48 }
 0x1cb   : > { %v438_v29 = vadd.f32 %v437_v3, %v265_v22  ;;  %v488_v50 = vpop.f32.mrf.mxu1 }
 0x1cc   : > { %v439_v5 = vpop.f32.mrf.mxu0  ;;  %v489_v54 = vadd.f32 %v488_v50, %v269_v48 }
 0x1cd   : > { %v440_v14 = vadd.f32 %v439_v5, %v261_v2  ;;  %v4997_v52 = vpop.f32.mrf.mxu1 }
 0x1ce   : > { %v441_v15 = vpop.f32.mrf.mxu0  ;;  %v500_v55 = vadd.f32 %v4997_v52, %v269_v48 }
 0x1cf   : > { %v5961_v16 = vpack.c.bf16 %v440_v14, %v436_v6  ;;  %v442_v25 = vadd.f32 %v441_v15, %v265_v22  ;;  %v491_v56 = vpop.f32.mrf.mxu1 }
 0x1d0   : > { %v445_v17 = vpop.f32.mrf.mxu0  ;;  %v508_v57 = vpack.c.bf16 %v500_v55, %v497_v51  ;;  %v492_v58 = vadd.f32 %v491_v56, %v269_v48  ;;  %v6095_v48 = vld [vmem:[%s6794_s7 + $0x70] sm:$0xff]  }
 0x1d1   : > { %v446_v19 = vadd.f32 %v445_v17, %v261_v2  ;;  %v505_v31 = vpack.c.bf16 %v442_v25, %v438_v29 }
 0x1d2   : > { %v447_v20 = vpop.f32.mrf.mxu0  ;;  %v507_v59 = vpack.c.bf16 %v492_v58, %v489_v54  ;;  %5034 = vmatprep.subr.bf16.mxu0 %v508_v57 }
 0x1d3   : > { %v448_v26 = vadd.f32 %v447_v20, %v265_v22  ;;  %5035 = vmatpush3.bf16.msra.mxu0 %v508_v57  ;;  %v6107_v57 = vld [vmem:[%s6794_s7 + $0x30] sm:$0xff]  }
 0x1d4   : > { %v449_v21 = vpop.f32.mrf.mxu0  ;;  %5036 = vmatprep.subr.bf16.mxu0 %v507_v59 }
 0x1d5   : > { %v450_v23 = vadd.f32 %v449_v21, %v261_v2 }
 0x1d6   : > { %v451_v24 = vpop.f32.mrf.mxu0 }
 0x1d7   : > { %v5967_v27 = vpack.c.bf16 %v450_v23, %v446_v19  ;;  %v452_v28 = vadd.f32 %v451_v24, %v265_v22  ;;  %5037 = vmatpush3.bf16.msra.mxu0 %v507_v59 }
 0x1d9   : > { %v506_v30 = vpack.c.bf16 %v452_v28, %v448_v26 }
 0x1da   : > { %5039 = vmatmul.mubr.msk.bf16.vlgmr.msra.gmra.mxu0 %vm621_vm0, %v5261_v32 }
 0x1db   : > { %4998 = vmatprep.subr.bf16.mxu1 %v506_v30  ;;  %5042 = vmatprep.mubr.msk.bf16.mxu0 %vm621_vm0, %v5262_v34 }
 0x1dc   : > { %4999 = vmatpush3.bf16.msra.mxu1 %v506_v30 }
 0x1dd   : > { %5000 = vmatprep.subr.bf16.mxu1 %v505_v31 }
 0x1e0   : > { %5001 = vmatpush3.bf16.msra.mxu1 %v505_v31 }
 0x1e2   : > { %5043 = vmatmul.mubr.msk.bf16.gmra.mxu0 %vm621_vm0, %v5263_v35 }
 0x1e3   : > { %5003 = vmatmul.mubr.msk.bf16.vlgmr.msra.gmra.mxu1 %vm621_vm0, %v5261_v32  ;;  %5046 = vmatprep.mubr.msk.bf16.mxu0 %vm621_vm0, %v5264_v36 }
 0x1e4   : > { %5006 = vmatprep.mubr.msk.bf16.mxu1 %vm621_vm0, %v5262_v34 }
 0x1ea   : > { %5047 = vmatmul.mubr.msk.bf16.gmra.mxu0 %vm621_vm0, %v5265_v37 }
 0x1eb   : > { %5007 = vmatmul.mubr.msk.bf16.gmra.mxu1 %vm621_vm0, %v5263_v35  ;;  %5050 = vmatprep.mubr.msk.bf16.mxu0 %vm621_vm0, %v5266_v38 }
 0x1ec   : > { %5010 = vmatprep.mubr.msk.bf16.mxu1 %vm621_vm0, %v5264_v36 }
 0x1f2   : > { %5051 = vmatmul.mubr.msk.bf16.gmra.mxu0 %vm621_vm0, %v5267_v39 }
 0x1f3   : > { %5011 = vmatmul.mubr.msk.bf16.gmra.mxu1 %vm621_vm0, %v5265_v37  ;;  %5054 = vmatprep.mubr.msk.bf16.mxu0 %vm621_vm0, %v5268_v40 }
 0x1f4   : > { %5014 = vmatprep.mubr.msk.bf16.mxu1 %vm621_vm0, %v5266_v38 }
 0x1fa   : > { %5055 = vmatmul.mubr.msk.bf16.gmra.mxu0 %vm621_vm0, %v5269_v41 }
 0x1fb   : > { %5015 = vmatmul.mubr.msk.bf16.gmra.mxu1 %vm621_vm0, %v5267_v39  ;;  %5058 = vmatprep.mubr.msk.bf16.mxu0 %vm621_vm0, %v5270_v42 }
 0x1fc   : > { %5018 = vmatprep.mubr.msk.bf16.mxu1 %vm621_vm0, %v5268_v40 }
 0x202   : > { %5059 = vmatmul.mubr.msk.bf16.gmra.mxu0 %vm621_vm0, %v5271_v43 }
 0x203   : > { %5019 = vmatmul.mubr.msk.bf16.gmra.mxu1 %vm621_vm0, %v5269_v41  ;;  %5062 = vmatprep.mubr.msk.bf16.mxu0 %vm621_vm0, %v5272_v44 }
 0x204   : > { %5022 = vmatprep.mubr.msk.bf16.mxu1 %vm621_vm0, %v5270_v42  ;;  %v6085_v42 = vld [vmem:[%s6794_s7 + $0x78] sm:$0xff]  }
 0x20a   : > { %5063 = vmatmul.mubr.msk.bf16.gmra.mxu0 %vm621_vm0, %v5273_v46 }
 0x20b   : > { %5023 = vmatmul.mubr.msk.bf16.gmra.mxu1 %vm621_vm0, %v5271_v43  ;;  %5066 = vmatprep.mubr.msk.bf16.mxu0 %vm621_vm0, %v5274_v47 }
 0x20c   : > { %5026 = vmatprep.mubr.msk.bf16.mxu1 %vm621_vm0, %v5272_v44  ;;  %v6090_v44 = vld [vmem:[%s6794_s7 + $0x38] sm:$0xff]  }
 0x212   : > { %5067 = vmatmul.mubr.msk.bf16.gmra.mxu0 %vm621_vm0, %v5275_v53 }
 0x213   : > { %5027 = vmatmul.mubr.msk.bf16.gmra.mxu1 %vm621_vm0, %v5273_v46 }
 0x214   : > { %5030 = vmatprep.mubr.msk.bf16.mxu1 %vm621_vm0, %v5274_v47 }
 0x21b   : > { %5031 = vmatmul.mubr.msk.bf16.gmra.mxu1 %vm621_vm0, %v5275_v53 }
 0x21c   : > { %4664 = vmatprep.mubr.bf16.mxu1 %v5961_v16 }
 0x29a   : > { %v6099_v53 = vpop.f32.mrf.mxu0 }
 0x29c   : > { %v6102_v55 = vpop.f32.mrf.mxu0 }
 0x29e   : > { %v6109_v58 = vpop.f32.mrf.mxu0 }
 0x2a3   : > { %v6048_v60 = vpop.f32.mrf.mxu1 }
 0x2a5   : > { %v6050_v61 = vpop.f32.mrf.mxu1 }
 0x2a7   : > { %v6052_v62 = vpop.f32.mrf.mxu1 }
 0x2a8   : > { %v832_v0 = vpack.c.bf16 %v6052_v62, %v6048_v60 }
 0x2a9   : > { %v6056_v1 = vpop.f32.mrf.mxu1 }
 0x2ab   : > { %v6058_v2 = vpop.f32.mrf.mxu1 }
 0x2ad   : > { %v6060_v3 = vpop.f32.mrf.mxu1 }
 0x2af   : > { %v6062_v5 = vpop.f32.mrf.mxu1 }
 0x2b0   : > { %v834_v6 = vpack.c.bf16 %v6062_v5, %v6058_v2 }
 0x2b1   : > { %v6066_v14 = vpop.f32.mrf.mxu1 }
 0x2b3   : > { %v5012_v15 = vpop.f32.mrf.mxu1 }
 0x2b5   : > { %v6068_v17 = vpop.f32.mrf.mxu1 }
 0x2b7   : > { %v5013_v19 = vpop.f32.mrf.mxu1 }
 0x2b9   : > { %v6070_v20 = vpop.f32.mrf.mxu1 }
 0x2bb   : > { %v5016_v21 = vpop.f32.mrf.mxu1 }
 0x2bd   : > { %v752_v22 = vpop.f32.mrf.mxu1 }
 0x2bf   : > { %v5017_v23 = vpop.f32.mrf.mxu1 }
 0x2c0   : > { %v838_v43 = vpack.c.bf16 %v5017_v23, %v5016_v21  ;;  %v6114_v21 = vld [vmem:[%s6794_s7 + $0x68] sm:$0xff]  }
 0x2c1   : > { %v755_v24 = vpop.f32.mrf.mxu1 }
 0x2c2   : > { %v982_v52 = vmul.bf16 %v6090_v44, %v838_v43  ;;  %v837_v56 = vpack.c.bf16 %v755_v24, %v752_v22 }
 0x2c3   : > { %v6072_v25 = vpop.f32.mrf.mxu1 }
 0x2c4   : > { %v981_v22 = vmul.bf16 %v6107_v57, %v837_v56 }
 0x2c5   : > { %v6074_v26 = vpop.f32.mrf.mxu1 }
 0x2c7   : > { %v6076_v28 = vpop.f32.mrf.mxu1 }
 0x2c8   : > { %v840_v29 = vpack.c.bf16 %v6076_v28, %v6072_v25 }
 0x2c9   : > { %v6080_v30 = vpop.f32.mrf.mxu1 }
 0x2cb   : > { %v5024_v31 = vpop.f32.mrf.mxu1 }
 0x2cd   : > { %v784_v32 = vpop.f32.mrf.mxu1 }
 0x2cf   : > { %v5025_v34 = vpop.f32.mrf.mxu1 }
 0x2d1   : > { %v787_v35 = vpop.f32.mrf.mxu1 }
 0x2d3   : > { %v5028_v36 = vpop.f32.mrf.mxu1 }
 0x2d5   : > { %v800_v37 = vpop.f32.mrf.mxu1 }
 0x2d7   : > { %v5029_v38 = vpop.f32.mrf.mxu1 }
 0x2d8   : > { %v844_v59 = vpack.c.bf16 %v5029_v38, %v5028_v36  ;;  %v836_v36 = vpack.c.bf16 %v5013_v19, %v5012_v15  ;;  %v6129_v38 = vld [vmem:[%s6794_s7 + $0x28] sm:$0xff]   ;;  %v835_v19 = vpack.c.bf16 %v6070_v20, %v6068_v17  ;;  %v6159_v17 = vld [vmem:[%s6794_s7 + $0x18] sm:$0xff]   ;;  %v841_v20 = vpack.c.bf16 %v787_v35, %v784_v32  ;;  %v6176_v32 = vld [vmem:[%s6794_s7 + $0x10] sm:$0xff]  }
 0x2d9   : > { %v803_v39 = vpop.f32.mrf.mxu1  ;;  %v6181_v35 = vld [vmem:[%s6794_s7 + $0x48] sm:$0xff]  }
 0x2da   : > { %v984_v5 = vmul.bf16 %v6181_v35, %v840_v29  ;;  %v831_v29 = vpack.c.bf16 %v6056_v1, %v6050_v61 }
 0x2db   : > { %v5032_v40 = vpop.f32.mrf.mxu1 }
 0x2dd   : > { %v816_v41 = vpop.f32.mrf.mxu1 }
 0x2df   : > { %v5033_v46 = vpop.f32.mrf.mxu1 }
 0x2e0   : > { %v846_v47 = vpack.c.bf16 %v5033_v46, %v5032_v40  ;;  %v6118_v40 = vpop.f32.mrf.mxu0 }
 0x2e1   : > { %v819_v49 = vpop.f32.mrf.mxu1 }
 0x2e2   : > { %v990_v50 = vmul.bf16 %v6085_v42, %v846_v47  ;;  %v845_v51 = vpack.c.bf16 %v819_v49, %v816_v41  ;;  %v6121_v24 = vpop.f32.mrf.mxu0  ;;  %v988_v41 = vmul.bf16 %v6114_v21, %v844_v59  ;;  %v843_v47 = vpack.c.bf16 %v803_v39, %v800_v37  ;;  %v6136_v49 = vld [vmem:[%s6794_s7 + $0x60] sm:$0xff]  }
 0x2e3   : > { %v6147_v37 = vld [vmem:[%s6794_s7 + $0x20] sm:$0xff]   ;;  %v842_v39 = vpack.c.bf16 %v5025_v34, %v5024_v31  ;;  %v6164_v31 = vld [vmem:[%s6794_s7 + $0x50] sm:$0xff]   ;;  %v978_v34 = vmul.bf16 %v6159_v17, %v834_v6  ;;  %v839_v6 = vpack.c.bf16 %v6080_v30, %v6074_v26 }
 0x2e4   : > { %v989_v54 = vmul.bf16 %v6095_v48, %v845_v51  ;;  %4648 = vmatprep.subr.bf16.mxu1 %v990_v50  ;;  %v6124_v43 = vpop.f32.mrf.mxu0  ;;  %v980_v51 = vmul.bf16 %v6129_v38, %v836_v36  ;;  %v987_v15 = vmul.bf16 %v6136_v49, %v843_v47  ;;  %v985_v59 = vmul.bf16 %v6164_v31, %v841_v20  ;;  %v6210_v26 = vld [vmem:[%s6794_s7] sm:$0xff]  }
 0x2e5   : > { %4649 = vmatpush3.bf16.xpose.msra.mxu1 %v982_v52  ;;  %v6152_v52 = vld [vmem:[%s6794_s7 + $0x58] sm:$0xff]   ;;  %v975_v30 = vmul.bf16 %v6210_v26, %v831_v29 }
 0x2e6   : > { %4650 = vmatprep.subr.bf16.mxu1 %v989_v54  ;;  %v6131_v46 = vpop.f32.mrf.mxu0  ;;  %v979_v54 = vmul.bf16 %v6147_v37, %v835_v19  ;;  %v986_v56 = vmul.bf16 %v6152_v52, %v842_v39 }
 0x2ed   : > { %4651 = vmatpush3.bf16.xpose.msra.mxu1 %v981_v22  ;;  %v833_v22 = vpack.c.bf16 %v6066_v14, %v6060_v3  ;;  %v6191_v3 = vld [vmem:[%s6794_s7 + $0x8] sm:$0xff]   ;;  %v6198_v14 = vld [vmem:[%s6794_s7 + $0x40] sm:$0xff]  }
 0x2ee   : > { %4652 = vmatprep.subr.bf16.mxu1 %v988_v41  ;;  %v976_v25 = vmul.bf16 %v6191_v3, %v832_v0  ;;  %v983_v28 = vmul.bf16 %v6198_v14, %v839_v6 }
 0x2ef   : > { %v977_v2 = vmul.bf16 %v6176_v32, %v833_v22 }
 0x2f5   : > { %4653 = vmatpush3.bf16.xpose.msra.mxu1 %v980_v51 }
 0x2f6   : > { %4654 = vmatprep.subr.bf16.mxu1 %v987_v15 }
 0x2fd   : > { %4655 = vmatpush3.bf16.xpose.msra.mxu1 %v979_v54 }
 0x2fe   : > { %4656 = vmatprep.subr.bf16.mxu1 %v986_v56 }
 0x305   : > { %4657 = vmatpush3.bf16.xpose.msra.mxu1 %v978_v34 }
 0x306   : > { %4658 = vmatprep.subr.bf16.mxu1 %v985_v59 }
 0x30d   : > { %4659 = vmatpush3.bf16.xpose.msra.mxu1 %v977_v2 }
 0x30e   : > { %4660 = vmatprep.subr.bf16.mxu1 %v984_v5 }
 0x315   : > { %4661 = vmatpush3.bf16.xpose.msra.mxu1 %v976_v25 }
 0x316   : > { %4662 = vmatprep.subr.bf16.mxu1 %v983_v28 }
 0x31d   : > { %4663 = vmatpush3.bf16.xpose.msra.mxu1 %v975_v30 }
 0x31e   : > { %4696 = vmatprep.subr.bf16.mxu1 %v6085_v42 }
 0x324   : > { %4665 = vmatmul.mubr.bf16.vlgmr.msra.gmra.mxu1 %v5961_v16  ;;  %v1044_v16 = vpop.f32.mrf.mxu0 }
 0x325   : > { %4666 = vmatprep.mubr.bf16.mxu1 %v5967_v27  ;;  %4697 = vmatpush3.bf16.msra.mxu1 %v6090_v44 }
 0x326   : > { %4698 = vmatprep.subr.bf16.mxu1 %v6095_v48 }
 0x329   : > { %4699 = vmatpush3.bf16.msra.mxu1 %v6107_v57 }
 0x32a   : > { %4700 = vmatprep.subr.bf16.mxu1 %v6114_v21 }
 0x32c   : > { %4667 = vmatmul.mubr.bf16.gmra.mxu1 %v5967_v27  ;;  %v5048_v27 = vpop.f32.mrf.mxu0 }
 0x32d   : > { %4701 = vmatpush3.bf16.msra.mxu1 %v6129_v38 }
 0x32e   : > { %4702 = vmatprep.subr.bf16.mxu1 %v6136_v49  ;;  %v1057_v60 = vpop.f32.mrf.mxu0 }
 0x330   : > { %v5049_v61 = vpop.f32.mrf.mxu0 }
 0x331   : > { %4703 = vmatpush3.bf16.msra.mxu1 %v6147_v37  ;;  %v1157_v13 = vpack.c.bf16 %v5049_v61, %v5048_v27 }
 0x332   : > { %4704 = vmatprep.subr.bf16.mxu1 %v6152_v52  ;;  %v1060_v62 = vpop.f32.mrf.mxu0 }
 0x334   : > { %v5052_v0 = vpop.f32.mrf.mxu0 }
 0x335   : > { %4705 = vmatpush3.bf16.msra.mxu1 %v6159_v17 }
 0x336   : > { %4706 = vmatprep.subr.bf16.mxu1 %v6164_v31  ;;  %v1073_v1 = vpop.f32.mrf.mxu0 }
 0x338   : > { %v5053_v41 = vpop.f32.mrf.mxu0 }
 0x339   : > { %4707 = vmatpush3.bf16.msra.mxu1 %v6176_v32  ;;  %v1159_v6 = vpack.c.bf16 %v5053_v41, %v5052_v0 }
 0x33a   : > { %4708 = vmatprep.subr.bf16.mxu1 %v6181_v35  ;;  %v1076_v36 = vpop.f32.mrf.mxu0 }
 0x33b   : > { %v1175_v30 = vmul.bf16 %v6090_v44, %v1159_v6  ;;  %v1158_v45 = vpack.c.bf16 %v1076_v36, %v1073_v1  ;;  %v1156_v44 = vpack.c.bf16 %v1060_v62, %v1057_v60 }
 0x33c   : > { %v5056_v47 = vpop.f32.mrf.mxu0 }
 0x33d   : > { %4709 = vmatpush3.bf16.msra.mxu1 %v6191_v3  ;;  %v1174_v12 = vmul.bf16 %v6107_v57, %v1158_v45 }
 0x33e   : > { %4710 = vmatprep.subr.bf16.mxu1 %v6198_v14  ;;  %v1089_v51 = vpop.f32.mrf.mxu0 }
 0x340   : > { %v5057_v15 = vpop.f32.mrf.mxu0 }
 0x341   : > { %4711 = vmatpush3.bf16.msra.mxu1 %v6210_v26 }
 0x342   : > { %v1092_v19 = vpop.f32.mrf.mxu0 }
 0x344   : > { %v5060_v39 = vpop.f32.mrf.mxu0 }
 0x346   : > { %v1105_v54 = vpop.f32.mrf.mxu0 }
 0x348   : > { %v5061_v56 = vpop.f32.mrf.mxu0 }
 0x349   : > { %v1163_v1 = vpack.c.bf16 %v5061_v56, %v5060_v39 }
 0x34a   : > { %v1108_v20 = vpop.f32.mrf.mxu0 }
 0x34c   : > { %v5064_v34 = vpop.f32.mrf.mxu0 }
 0x34e   : > { %v1121_v59 = vpop.f32.mrf.mxu0 }
 0x350   : > { %v5065_v22 = vpop.f32.mrf.mxu0 }
 0x351   : > { %v1165_v10 = vpack.c.bf16 %v5065_v22, %v5064_v34 }
 0x352   : > { %v1124_v2 = vpop.f32.mrf.mxu0 }
 0x353   : > { %v1181_v0 = vmul.bf16 %v6114_v21, %v1165_v10  ;;  %v1164_v41 = vpack.c.bf16 %v1124_v2, %v1121_v59  ;;  %v6840_v10 = vpack.c.bf16 %v6131_v46, %v6121_v24  ;;  %v6841_v24 = vpack.c.bf16 %v6109_v58, %v6099_v53 }
 0x354   : > { %v5068_v5 = vpop.f32.mrf.mxu0  ;;  %v213_v53 = vstv %s6261_s0  ;;  %v6844_v58 = vand.u32 31, %v6843_v4 }
 0x355   : > { %v1180_v36 = vmul.bf16 %v6136_v49, %v1164_v41  ;;  %v1171_v45 = vmul.bf16 %v6159_v17, %v6840_v10 }
 0x356   : > { %v1137_v25 = vpop.f32.mrf.mxu0  ;;  %vm214_vm1 = vcmp.lt.s32.totalorder %v6844_v58, %v213_v53  ;;  %v5292_v58 = vld [vmem:[#allocation9 + $0x38] sm:$0xff]  }
 0x358   : > { %v5069_v28 = vpop.f32.mrf.mxu0 }
 0x359   : > { %v1167_v29 = vpack.c.bf16 %v5069_v28, %v5068_v5  ;;  %v1173_v5 = vmul.bf16 %v6129_v38, %v1157_v13  ;;  %v1154_v13 = vpack.c.bf16 %v1044_v16, %v6124_v43  ;;  %v1169_v38 = vmul.bf16 %v6191_v3, %v6841_v24 }
 0x35a   : > { %v1140_v33 = vpop.f32.mrf.mxu0  ;;  %v1152_v43 = vpack.c.bf16 %v6118_v40, %v6102_v55  ;;  %v6846_v55 = vand.u32 31, %v6845_v7  ;;  %v5767_v40 = vmov -1e+30  }
 0x35b   : > { %v1183_v9 = vmul.bf16 %v6085_v42, %v1167_v29  ;;  %v1166_v23 = vpack.c.bf16 %v1140_v33, %v1137_v25  ;;  %v1172_v33 = vmul.bf16 %v6147_v37, %v1156_v44  ;;  %v1162_v42 = vpack.c.bf16 %v1108_v20, %v1105_v54 }
 0x35c   : > { %v1170_v57 = vmul.bf16 %v6176_v32, %v1154_v13  ;;  %v1168_v49 = vmul.bf16 %v6210_v26, %v1152_v43  ;;  %vm215_vm2 = vcmp.lt.s32.totalorder %v6846_v55, %v213_v53  ;;  %v6847_v53 = vmov 0   ;;  %v5293_v55 = vld [vmem:[#allocation9 + $0x30] sm:$0xff]  }
 0x35d   : > { %v1182_v50 = vmul.bf16 %v6095_v48, %v1166_v23  ;;  %4668 = vmatprep.subr.bf16.mxu0 %v1183_v9  ;;  %v1179_v9 = vmul.bf16 %v6152_v52, %v1163_v1  ;;  %v1178_v48 = vmul.bf16 %v6164_v31, %v1162_v42  ;;  %v1160_v23 = vpack.c.bf16 %v1092_v19, %v1089_v51 }
 0x35e   : > { %4669 = vmatpush3.bf16.msra.mxu0 %v1175_v30  ;;  %v6270_v52 = vsel %vm215_vm2, 0.0, %v5767_v40 }
 0x35f   : > { %4670 = vmatprep.subr.bf16.mxu0 %v1182_v50  ;;  %v1176_v46 = vmul.bf16 %v6198_v14, %v1160_v23  ;;  %v6268_v50 = vsel %vm214_vm1, 0.0, %v5767_v40  ;;  %v5294_v40 = vld [vmem:[#allocation9 + $0x28] sm:$0xff]  }
 0x362   : > { %4671 = vmatpush3.bf16.msra.mxu0 %v1174_v12  ;;  %v1161_v12 = vpack.c.bf16 %v5057_v15, %v5056_v47 }
 0x363   : > { %4672 = vmatprep.subr.bf16.mxu0 %v1181_v0 }
 0x364   : > { %v1177_v21 = vmul.bf16 %v6181_v35, %v1161_v12 }
 0x366   : > { %4673 = vmatpush3.bf16.msra.mxu0 %v1173_v5 }
 0x367   : > { %4674 = vmatprep.subr.bf16.mxu0 %v1180_v36 }
 0x36a   : > { %4675 = vmatpush3.bf16.msra.mxu0 %v1172_v33 }
 0x36b   : > { %4676 = vmatprep.subr.bf16.mxu0 %v1179_v9 }
 0x36e   : > { %4677 = vmatpush3.bf16.msra.mxu0 %v1171_v45 }
 0x36f   : > { %4678 = vmatprep.subr.bf16.mxu0 %v1178_v48 }
 0x372   : > { %4679 = vmatpush3.bf16.msra.mxu0 %v1170_v57 }
 0x373   : > { %4680 = vmatprep.subr.bf16.mxu0 %v1177_v21 }
 0x376   : > { %4681 = vmatpush3.bf16.msra.mxu0 %v1169_v38 }
 0x377   : > { %4682 = vmatprep.subr.bf16.mxu0 %v1176_v46 }
 0x37a   : > { %4683 = vmatpush3.bf16.msra.mxu0 %v1168_v49 }
 0x37b   : > { %5070 = vmatprep.subr.bf16.mxu0 %v5292_v58 }
 0x3e4   : > { %v1218_v37 = vpop.f32.mrf.mxu1 }
 0x3e5   : > { %v1219_v31 = vadd.f32 %v1218_v37, %v6268_v50  ;;  %v5295_v37 = vld [vmem:[#allocation9 + $0x20] sm:$0xff]  }
 0x3e6   : > { %v1220_v17 = vpop.f32.mrf.mxu1 }
 0x3e7   : > { %v1221_v32 = vadd.f32 %v1220_v17, %v6270_v52  ;;  %v5296_v17 = vld [vmem:[#allocation9 + $0x18] sm:$0xff]  }
 0x3e8   : > { %v1222_v35 = vpop.f32.mrf.mxu1 }
 0x3e9   : > { %v1237_v3 = vmax.f32 %v1219_v31, %v1221_v32  ;;  %v1223_v26 = vadd.f32 %v1222_v35, %v6268_v50  ;;  %v5299_v35 = vld [vmem:[#allocation9] sm:$0xff]  }
 0x3ea   : > { %v1224_v14 = vpop.f32.mrf.mxu1 }
 0x3eb   : > { %v1225_v16 = vadd.f32 %v1224_v14, %v6270_v52  ;;  %1238 = vmax.xlane.f32.xlu0 %v1237_v3 }
 0x3ec   : > { %v1228_v27 = vpop.f32.mrf.mxu1 }
 0x3ed   : > { %v1240_v60 = vmax.f32 %v1223_v26, %v1225_v16  ;;  %v1229_v62 = vadd.f32 %v1228_v27, %v6268_v50 }
 0x3ee   : > { %v1230_v61 = vpop.f32.mrf.mxu1 }
 0x3ef   : > { %v1231_v47 = vadd.f32 %v1230_v61, %v6270_v52  ;;  %1241 = vmax.xlane.f32.xlu0 %v1240_v60 }
 0x3f0   : > { %v1232_v51 = vpop.f32.mrf.mxu1 }
 0x3f1   : > { %v1243_v15 = vmax.f32 %v1229_v62, %v1231_v47  ;;  %v1233_v39 = vadd.f32 %v1232_v51, %v6268_v50 }
 0x3f2   : > { %v1234_v19 = vpop.f32.mrf.mxu1 }
 0x3f3   : > { %v1235_v54 = vadd.f32 %v1234_v19, %v6270_v52  ;;  %1244 = vmax.xlane.f32.xlu1 %v1243_v15 }
 0x3f5   : > { %v1246_v56 = vmax.f32 %v1233_v39, %v1235_v54 }
 0x3f7   : > { %1247 = vmax.xlane.f32.xlu1 %v1246_v56 }
 0x474   : > { %v1239_v20 = vpop.xlane.xlu0 %1238 }
 0x475   : > { %v1249_v34 = vsub.f32 %v1219_v31, %v1239_v20  ;;  %v1250_v59 = vsub.f32 %v1221_v32, %v1239_v20  ;;  %v5297_v31 = vld [vmem:[#allocation9 + $0x10] sm:$0xff]   ;;  %v5298_v32 = vld [vmem:[#allocation9 + $0x8] sm:$0xff]  }
 0x477   : > { %v1257_v22 = vmul.f32 1.442695, %v1249_v34  ;;  %v1259_v2 = vmul.f32 1.442695, %v1250_v59 }
 0x478   : > { %v1242_v6 = vpop.xlane.xlu0 %1241 }
 0x479   : > { %v1251_v25 = vsub.f32 %v1223_v26, %v1242_v6  ;;  %v1252_v28 = vsub.f32 %v1225_v16, %v1242_v6  ;;  %5500 = vpow2.f32 %v1257_v22 }
 0x47a   : > { %5502 = vpow2.f32 %v1259_v2 }
 0x47b   : > { %v1261_v29 = vmul.f32 1.442695, %v1251_v25  ;;  %v1263_v30 = vmul.f32 1.442695, %v1252_v28 }
 0x47c   : > { %v1245_v0 = vpop.xlane.xlu1 %1244 }
 0x47d   : > { %5504 = vpow2.f32 %v1261_v29  ;;  %v1253_v41 = vsub.f32 %v1229_v62, %v1245_v0  ;;  %v1254_v5 = vsub.f32 %v1231_v47, %v1245_v0 }
 0x47e   : > { %5506 = vpow2.f32 %v1263_v30 }
 0x47f   : > { %v1265_v44 = vmul.f32 1.442695, %v1253_v41  ;;  %v1267_v1 = vmul.f32 1.442695, %v1254_v5 }
 0x480   : > { %v1248_v36 = vpop.xlane.xlu1 %1247 }
 0x481   : > { %v1255_v33 = vsub.f32 %v1233_v39, %v1248_v36  ;;  %v1256_v9 = vsub.f32 %v1235_v54, %v1248_v36  ;;  %5508 = vpow2.f32 %v1265_v44 }
 0x482   : > { %5510 = vpow2.f32 %v1267_v1 }
 0x483   : > { %v1269_v42 = vmul.f32 1.442695, %v1255_v33  ;;  %v1271_v10 = vmul.f32 1.442695, %v1256_v9 }
 0x485   : > { %5512 = vpow2.f32 %v1269_v42 }
 0x486   : > { %5514 = vpow2.f32 %v1271_v10  ;;  %v5501_v45 = vpop.eup %5500 }
 0x487   : > { %v5503_v13 = vpop.eup %5502 }
 0x48a   : > { %v5505_v12 = vpop.eup %5504 }
 0x48b   : > { %v5507_v48 = vpop.eup %5506  ;;  %v1273_v57 = vpack.c.bf16 %v5505_v12, %v5501_v45 }
 0x48c   : > { %v1274_v21 = vpack.c.bf16 %v5507_v48, %v5503_v13 }
 0x48e   : > { %1309 = vmatprep.mubr.bf16.mxu0 %v1274_v21  ;;  %1358 = vmatprep.mubr.bf16.mxu1 %v1274_v21  ;;  %v5509_v23 = vpop.eup %5508 }
 0x48f   : > { %1310 = vmatmul.mubr.bf16.vlgmr.msra.gmra.mxu0 %v1273_v57  ;;  %1359 = vmatmul.mubr.bf16.vlgmr.msra.gmra.mxu1 %v1273_v57  ;;  %v5511_v24 = vpop.eup %5510  ;;  %v4379_v57 = vld [vmem:[%s6798_s11] ss:$0 sm:$0xff] }
 0x490   : > { %5071 = vmatpush3.bf16.msra.mxu0 %v5292_v58 }
 0x491   : > { %5072 = vmatprep.subr.bf16.mxu0 %v5293_v55 }
 0x492   : > { %v5513_v38 = vpop.eup %5512 }
 0x493   : > { %v5515_v43 = vpop.eup %5514  ;;  %v1275_v46 = vpack.c.bf16 %v5513_v38, %v5509_v23 }
 0x494   : > { %v1276_v49 = vpack.c.bf16 %v5515_v43, %v5511_v24  ;;  %5073 = vmatpush3.bf16.msra.mxu0 %v5293_v55  ;;  %v5580_v43 = vld [vmem:[#allocation2] sm:$0xff] }
 0x495   : > { %5074 = vmatprep.subr.bf16.mxu0 %v5294_v40 }
 0x496   : > { %1317 = vmatprep.mubr.bf16.mxu0 %v1276_v49  ;;  %1366 = vmatprep.mubr.bf16.mxu1 %v1276_v49 }
 0x497   : > { %1318 = vmatmul.mubr.bf16.gmra.mxu0 %v1275_v46  ;;  %1367 = vmatmul.mubr.bf16.gmra.mxu1 %v1275_v46 }
 0x498   : > { %1718 = vmatprep.mubr.bf16.mxu1 %v6847_v53  ;;  %5075 = vmatpush3.bf16.msra.mxu0 %v5294_v40  ;;  %v5581_v40 = vld [vmem:[#allocation2 + $0x8] sm:$0xff] }
 0x499   : > { %5076 = vmatprep.subr.bf16.mxu0 %v5295_v37 }
 0x49c   : > { %5077 = vmatpush3.bf16.msra.mxu0 %v5295_v37 }
 0x49d   : > { %5078 = vmatprep.subr.bf16.mxu0 %v5296_v17 }
 0x4a0   : > { %5079 = vmatpush3.bf16.msra.mxu0 %v5296_v17  ;;  %v5582_v17 = vld [vmem:[#allocation2 + $0x10] sm:$0xff] }
 0x4a1   : > { %5080 = vmatprep.subr.bf16.mxu0 %v5297_v31 }
 0x4a4   : > { %5081 = vmatpush3.bf16.msra.mxu0 %v5297_v31 }
 0x4a5   : > { %5082 = vmatprep.subr.bf16.mxu0 %v5298_v32 }
 0x4a8   : > { %5083 = vmatpush3.bf16.msra.mxu0 %v5298_v32  ;;  %v5583_v32 = vld [vmem:[#allocation2 + $0x18] sm:$0xff] }
 0x4a9   : > { %5084 = vmatprep.subr.bf16.mxu0 %v5299_v35 }
 0x4ac   : > { %5085 = vmatpush3.bf16.msra.mxu0 %v5299_v35 }
 0x54f   : > { %v4684_v3 = vpop.f32.mrf.mxu0  ;;  %v4712_v14 = vpop.f32.mrf.mxu1 }
 0x551   : > { %v4713_v26 = vpop.f32.mrf.mxu1  ;;  %v4685_v27 = vpop.f32.mrf.mxu0 }
 0x552   : > { %v4714_v16 = vadd.f32 %v4713_v26, %v4712_v14  ;;  %v4686_v29 = vadd.f32 %v4685_v27, %v4684_v3  ;;  %v5300_v3 = vld [vmem:[#allocation10 + $0xe0] ss:$16 sps:$4 sm:$0xff]   ;;  %v5302_v14 = vld [vmem:[#allocation10 + $0xe4] ss:$16 sps:$4 sm:$0xff]   ;;  %v5303_v26 = vld [vmem:[#allocation10 + $0xe8] ss:$16 sps:$4 sm:$0xff]  }
 0x553   : > { %v4715_v60 = vpop.f32.mrf.mxu1  ;;  %v4687_v51 = vpop.f32.mrf.mxu0  ;;  %1686 = vmatprep.subr.bf16.mxu1 %v5302_v14 }
 0x554   : > { %v1361_v61 = vadd.f32 1e-30, %v4714_v16  ;;  %v5305_v16 = vld [vmem:[#allocation10 + $0xec] ss:$16 sps:$4 sm:$0xff]   ;;  %1687 = vmatpush1.bf16.msra.mxu1 %v5300_v3 }
 0x555   : > { %v4716_v62 = vpop.f32.mrf.mxu1  ;;  %v4688_v56 = vpop.f32.mrf.mxu0  ;;  %1891 = vmatprep.subr.bf16.mxu0 %v5305_v16 }
 0x556   : > { %v4717_v47 = vadd.f32 %v4716_v62, %v4715_v60  ;;  %5516 = vrcp.f32 %v1361_v61  ;;  %v4689_v30 = vadd.f32 %v4688_v56, %v4687_v51 }
 0x557   : > { %v4718_v15 = vpop.f32.mrf.mxu1  ;;  %v4690_v2 = vpop.f32.mrf.mxu0 }
 0x558   : > { %v1364_v19 = vadd.f32 1e-30, %v4717_v47 }
 0x559   : > { %v4719_v39 = vpop.f32.mrf.mxu1  ;;  %v4691_v25 = vpop.f32.mrf.mxu0 }
 0x55a   : > { %5518 = vrcp.f32 %v1364_v19  ;;  %v4720_v54 = vadd.f32 %v4719_v39, %v4718_v15  ;;  %v4692_v9 = vadd.f32 %v4691_v25, %v4690_v2  ;;  %v5311_v25 = vld [vmem:[#allocation10 + $0xcc] ss:$16 sps:$4 sm:$0xff]  }
 0x55b   : > { %v4721_v20 = vpop.f32.mrf.mxu1  ;;  %v4693_v41 = vpop.f32.mrf.mxu0 }
 0x55c   : > { %v1369_v34 = vadd.f32 1e-30, %v4720_v54 }
 0x55d   : > { %v4722_v59 = vpop.f32.mrf.mxu1  ;;  %v4694_v36 = vpop.f32.mrf.mxu0 }
 0x55e   : > { %v4723_v22 = vadd.f32 %v4722_v59, %v4721_v20  ;;  %5520 = vrcp.f32 %v1369_v34  ;;  %v4695_v42 = vadd.f32 %v4694_v36, %v4693_v41  ;;  %v5312_v41 = vld [vmem:[#allocation10 + $0xa0] ss:$16 sps:$4 sm:$0xff]  }
 0x55f   : > { %v5318_v36 = vld [vmem:[#allocation10 + $0x80] ss:$16 sps:$4 sm:$0xff]  }
 0x560   : > { %v1372_v6 = vadd.f32 1e-30, %v4723_v22 }
 0x562   : > { %5522 = vrcp.f32 %v1372_v6  ;;  %v5308_v6 = vld [vmem:[#allocation10 + $0xc4] ss:$16 sps:$4 sm:$0xff]  }
 0x563   : > { %v5517_v28 = vpop.eup %5516  ;;  %1688 = vmatprep.subr.bf16.mxu1 %v5308_v6 }
 0x564   : > { %v1379_v5 = vmul.f32 %v5517_v28, %v4686_v29  ;;  %v5306_v28 = vld [vmem:[#allocation10 + $0xc0] ss:$16 sps:$4 sm:$0xff]   ;;  %v5309_v29 = vld [vmem:[#allocation10 + $0xc8] ss:$16 sps:$4 sm:$0xff]  }
 0x565   : > { %1689 = vmatpush1.bf16.msra.mxu1 %v5306_v28 }
 0x567   : > { %v5519_v0 = vpop.eup %5518 }
 0x568   : > { %v1380_v44 = vmul.f32 %v5519_v0, %v4689_v30  ;;  %v5314_v30 = vld [vmem:[#allocation10 + $0xa4] ss:$16 sps:$4 sm:$0xff]   ;;  %v5317_v0 = vld [vmem:[#allocation10 + $0xac] ss:$16 sps:$4 sm:$0xff]  }
 0x569   : > { %1690 = vmatprep.subr.bf16.mxu1 %v5314_v30 }
 0x56a   : > { %v1383_v1 = vpack.c.bf16 %v1380_v44, %v1379_v5  ;;  %v5315_v5 = vld [vmem:[#allocation10 + $0xa8] ss:$16 sps:$4 sm:$0xff]   ;;  %1691 = vmatpush1.bf16.msra.mxu1 %v5312_v41  ;;  %v5320_v44 = vld [vmem:[#allocation10 + $0x84] ss:$16 sps:$4 sm:$0xff]  }
 0x56b   : > { %v5521_v33 = vpop.eup %5520  ;;  %1692 = vmatprep.subr.bf16.mxu1 %v5320_v44  ;;  %v5351_v41 = vld [vmem:[#allocation12 + $0x38] sm:$0xff]   ;;  %v5353_v44 = vld [vmem:[#allocation12 + $0x70] sm:$0xff]  }
 0x56c   : > { %5086 = vmatprep.mubr.bf16.mxu0 %v1383_v1  ;;  %v1381_v45 = vmul.f32 %v5521_v33, %v4692_v9  ;;  %v5323_v1 = vld [vmem:[#allocation10 + $0x8c] ss:$16 sps:$4 sm:$0xff]   ;;  %v5321_v33 = vld [vmem:[#allocation10 + $0x88] ss:$16 sps:$4 sm:$0xff]   ;;  %v5326_v9 = vld [vmem:[#allocation10 + $0x64] ss:$16 sps:$4 sm:$0xff]  }
 0x56e   : > { %1693 = vmatpush1.bf16.msra.mxu1 %v5318_v36 }
 0x56f   : > { %v5523_v10 = vpop.eup %5522  ;;  %1694 = vmatprep.subr.bf16.mxu1 %v5326_v9  ;;  %v5357_v9 = vld [vmem:[#allocation12 + $0x68] sm:$0xff]  }
 0x570   : > { %v1382_v13 = vmul.f32 %v5523_v10, %v4695_v42  ;;  %v5329_v42 = vld [vmem:[#allocation10 + $0x6c] ss:$16 sps:$4 sm:$0xff]   ;;  %v5324_v10 = vld [vmem:[#allocation10 + $0x60] ss:$16 sps:$4 sm:$0xff]  }
 0x572   : > { %v1384_v12 = vpack.c.bf16 %v1382_v13, %v1381_v45  ;;  %v5327_v45 = vld [vmem:[#allocation10 + $0x68] ss:$16 sps:$4 sm:$0xff]   ;;  %1695 = vmatpush1.bf16.msra.mxu1 %v5324_v10  ;;  %v5332_v13 = vld [vmem:[#allocation10 + $0x44] ss:$16 sps:$4 sm:$0xff]  }
 0x573   : > { %1696 = vmatprep.subr.bf16.mxu1 %v5332_v13  ;;  %v5359_v13 = vld [vmem:[#allocation12 + $0x28] sm:$0xff]  }
 0x574   : > { %5087 = vmatmul.mubr.bf16.vlgmr.msra.gmra.mxu0 %v1384_v12  ;;  %v5335_v12 = vld [vmem:[#allocation10 + $0x4c] ss:$16 sps:$4 sm:$0xff]  }
 0x575   : > { %1923 = vmatprep.mubr.bf16.mxu0 %v6847_v53  ;;  %1892 = vmatpush1.bf16.msra.mxu0 %v5303_v26 }
 0x576   : > { %1893 = vmatprep.subr.bf16.mxu0 %v5311_v25 }
 0x579   : > { %1894 = vmatpush1.bf16.msra.mxu0 %v5309_v29 }
 0x57a   : > { %1895 = vmatprep.subr.bf16.mxu0 %v5317_v0  ;;  %v5350_v0 = vld [vmem:[#allocation12 + $0xb8] sm:$0xff]  }
 0x57d   : > { %1896 = vmatpush1.bf16.msra.mxu0 %v5315_v5  ;;  %v5352_v5 = vld [vmem:[#allocation12 + $0xf0] sm:$0xff]  }
 0x57e   : > { %1897 = vmatprep.subr.bf16.mxu0 %v5323_v1 }
 0x581   : > { %1898 = vmatpush1.bf16.msra.mxu0 %v5321_v33  ;;  %v5356_v33 = vld [vmem:[#allocation12 + $0xe8] sm:$0xff]  }
 0x582   : > { %1899 = vmatprep.subr.bf16.mxu0 %v5329_v42 }
 0x585   : > { %1900 = vmatpush1.bf16.msra.mxu0 %v5327_v45  ;;  %v5358_v45 = vld [vmem:[#allocation12 + $0xa8] sm:$0xff]  }
 0x586   : > { %1901 = vmatprep.subr.bf16.mxu0 %v5335_v12  ;;  %v5360_v12 = vld [vmem:[#allocation12 + $0xe0] sm:$0xff]  }
 0x634   : > { %v5088_v48 = vpop.f32.mrf.mxu0 }
 0x635   : > { %v1499_v38 = vadd.f32 %v5088_v48, %v4379_v57  ;;  %v5330_v48 = vld [vmem:[#allocation10 + $0x40] ss:$16 sps:$4 sm:$0xff]  }
 0x636   : > { %v1490_v21 = vpop.f32.mrf.mxu0  ;;  %1697 = vmatpush1.bf16.msra.mxu1 %v5330_v48  ;;  %v5361_v48 = vld [vmem:[#allocation12 + $0x60] sm:$0xff]  }
 0x637   : > { %v1491_v23 = vadd.f32 %v4379_v57, %v1490_v21  ;;  %v1507_v31 = vadd.f32 %v5582_v17, %v1499_v38  ;;  %v5338_v21 = vld [vmem:[#allocation10 + $0x24] ss:$16 sps:$4 sm:$0xff]   ;;  %v5339_v38 = vld [vmem:[#allocation10 + $0x28] ss:$16 sps:$4 sm:$0xff]  }
 0x638   : > { %v5089_v24 = vpop.f32.mrf.mxu0  ;;  %1698 = vmatprep.subr.bf16.mxu1 %v5338_v21  ;;  %v5363_v21 = vld [vmem:[#allocation12 + $0x20] sm:$0xff]  }
 0x639   : > { %v1505_v46 = vadd.f32 %v5580_v43, %v1491_v23  ;;  %v1502_v55 = vadd.f32 %v5089_v24, %v4379_v57  ;;  %v5341_v23 = vld [vmem:[#allocation10 + $0x2c] ss:$16 sps:$4 sm:$0xff]   ;;  %v5336_v24 = vld [vmem:[#allocation10 + $0x20] ss:$16 sps:$4 sm:$0xff]   ;;  %v5344_v43 = vld [vmem:[#allocation10 + $0x4] ss:$16 sps:$4 sm:$0xff]  }
 0x63a   : > { %v1493_v49 = vpop.f32.mrf.mxu0  ;;  %1699 = vmatpush1.bf16.msra.mxu1 %v5336_v24  ;;  %v5365_v24 = vld [vmem:[#allocation12 + $0x58] sm:$0xff]  }
 0x63b   : > { %v1494_v58 = vadd.f32 %v4379_v57, %v1493_v49  ;;  %1511 = vadd.xlane.f32.xlu0 %v1505_v46  ;;  %v1508_v35 = vadd.f32 %v5583_v32, %v1502_v55  ;;  %v5333_v57 = vld [vmem:[#allocation10 + $0x48] ss:$16 sps:$4 sm:$0xff]   ;;  %v5342_v49 = vld [vmem:[#allocation10] ss:$16 sps:$4 sm:$0xff]   ;;  %1700 = vmatprep.subr.bf16.mxu1 %v5344_v43 }
 0x63c   : > { %1902 = vmatpush1.bf16.msra.mxu0 %v5333_v57  ;;  %v5348_v55 = vld [vmem:[#allocation12 + $0xf8] sm:$0xff]   ;;  %v5362_v57 = vld [vmem:[#allocation12 + $0xa0] sm:$0xff]  }
 0x63d   : > { %v1506_v37 = vadd.f32 %v5581_v40, %v1494_v58  ;;  %1903 = vmatprep.subr.bf16.mxu0 %v5341_v23  ;;  %v5345_v58 = vld [vmem:[#allocation10 + $0x8] ss:$16 sps:$4 sm:$0xff]  }
 0x63e   : > { %1701 = vmatpush1.bf16.msra.mxu1 %v5342_v49  ;;  %v5349_v40 = vld [vmem:[#allocation12 + $0x78] sm:$0xff]   ;;  %v5369_v49 = vld [vmem:[#allocation12 + $0x50] sm:$0xff]  }
 0x63f   : > { %1513 = vadd.xlane.f32.xlu1 %v1506_v37  ;;  %1515 = vadd.xlane.f32.xlu0 %v1507_v31  ;;  %v5364_v23 = vld [vmem:[#allocation12 + $0xd8] sm:$0xff]  }
 0x640   : > { %1904 = vmatpush1.bf16.msra.mxu0 %v5339_v38  ;;  %4734 = vmatprep.subr.bf16.mxu1 %v5348_v55  ;;  %v5366_v38 = vld [vmem:[#allocation12 + $0x98] sm:$0xff]   ;;  %v5371_v55 = vld [vmem:[#allocation12 + $0x10] sm:$0xff]  }
 0x641   : > { %v5367_v43 = vld [vmem:[#allocation12 + $0x18] sm:$0xff]  }
 0x643   : > { %1517 = vadd.xlane.f32.xlu1 %v1508_v35 }
 0x6c4   : > { %v1512_v27 = vpop.xlane.xlu0 %1511 }
 0x6c5   : > { %v1520_v60 = vmul.f32 0.0078125, %v1512_v27 }
 0x6c7   : > { %v6285_v61 = vsub.f32 %v1505_v46, %v1520_v60  ;;  %v5347_v46 = vld [vmem:[#allocation10 + $0xc] ss:$16 sps:$4 sm:$0xff]  }
 0x6c8   : > { %v1514_v62 = vpop.xlane.xlu1 %1513  ;;  %v1516_v47 = vpop.xlane.xlu0 %1515  ;;  %1905 = vmatprep.subr.bf16.mxu0 %v5347_v46  ;;  %v5368_v46 = vld [vmem:[#allocation12 + $0xd0] sm:$0xff]  }
 0x6c9   : > { %v1521_v51 = vmul.f32 0.0078125, %v1514_v62  ;;  %v1522_v15 = vmul.f32 0.0078125, %v1516_v47  ;;  %v1528_v19 = vmul.f32 %v6285_v61, %v6285_v61  ;;  %1906 = vmatpush1.bf16.msra.mxu0 %v5345_v58  ;;  %v5370_v58 = vld [vmem:[#allocation12 + $0x90] sm:$0xff]  }
 0x6ca   : > { %4762 = vmatprep.subr.bf16.mxu0 %v5349_v40  ;;  %v5372_v40 = vld [vmem:[#allocation12 + $0xc8] sm:$0xff]  }
 0x6cb   : > { %v6289_v39 = vsub.f32 %v1506_v37, %v1521_v51  ;;  %v6291_v54 = vsub.f32 %v1507_v31, %v1522_v15  ;;  %1532 = vadd.xlane.f32.xlu0 %v1528_v19  ;;  %v4388_v15 = vld [vmem:[%s6799_s12] ss:$0 sm:$0xff] }
 0x6cc   : > { %v1518_v56 = vpop.xlane.xlu1 %1517 }
 0x6cd   : > { %v1523_v20 = vmul.f32 0.0078125, %v1518_v56  ;;  %v1529_v34 = vmul.f32 %v6289_v39, %v6289_v39  ;;  %v1530_v59 = vmul.f32 %v6291_v54, %v6291_v54 }
 0x6cf   : > { %v6297_v22 = vsub.f32 %v1508_v35, %v1523_v20  ;;  %1534 = vadd.xlane.f32.xlu1 %v1529_v34  ;;  %1536 = vadd.xlane.f32.xlu0 %v1530_v59  ;;  %v4389_v59 = vld [vmem:[%s6800_s13] ss:$0 sm:$0xff] }
 0x6d1   : > { %v1531_v2 = vmul.f32 %v6297_v22, %v6297_v22 }
 0x6d3   : > { %1538 = vadd.xlane.f32.xlu1 %v1531_v2 }
 0x754   : > { %v1533_v37 = vpop.xlane.xlu0 %1532 }
 0x755   : > { %v1540_v17 = vmul.f32 0.0078125, %v1533_v37  ;;  %v5373_v37 = vld [vmem:[#allocation12 + $0x48] sm:$0xff]  }
 0x757   : > { %v1544_v31 = vadd.f32 1e-05, %v1540_v17  ;;  %v5374_v17 = vld [vmem:[#allocation12 + $0x88] sm:$0xff]  }
 0x758   : > { %v1535_v32 = vpop.xlane.xlu1 %1534  ;;  %v1537_v35 = vpop.xlane.xlu0 %1536 }
 0x759   : > { %5524 = vrsqrt.f32 %v1544_v31  ;;  %v1541_v3 = vmul.f32 0.0078125, %v1535_v32  ;;  %v1542_v14 = vmul.f32 0.0078125, %v1537_v35  ;;  %v5375_v31 = vld [vmem:[#allocation12 + $0x8] sm:$0xff]   ;;  %v5376_v32 = vld [vmem:[#allocation12 + $0xc0] sm:$0xff]  }
 0x75a   : > { %v5377_v35 = vld [vmem:[#allocation12 + $0x40] sm:$0xff]  }
 0x75b   : > { %v1545_v26 = vadd.f32 1e-05, %v1541_v3  ;;  %v1546_v16 = vadd.f32 1e-05, %v1542_v14  ;;  %v5378_v3 = vld [vmem:[#allocation12 + $0x80] sm:$0xff]  }
 0x75c   : > { %v1539_v27 = vpop.xlane.xlu1 %1538  ;;  %v5379_v14 = vld [vmem:[#allocation12] sm:$0xff]  }
 0x75d   : > { %5526 = vrsqrt.f32 %v1545_v26  ;;  %v1543_v60 = vmul.f32 0.0078125, %v1539_v27  ;;  %v1594_v26 = vld [vmem:[%s6804_s17] sm:$0x3] }
 0x75e   : > { %5528 = vrsqrt.f32 %v1546_v16  ;;  %v1799_v16 = vld [vmem:[%s6804_s17 + $0x2] sm:$0x3] }
 0x75f   : > { %v1547_v62 = vadd.f32 1e-05, %v1543_v60 }
 0x761   : > { %5530 = vrsqrt.f32 %v1547_v62  ;;  %v1603_v62 = vrot.slane %v1594_v26, %v5964_v18 }
 0x766   : > { %v5525_v47 = vpop.eup %5524 }
 0x767   : > { %v1552_v51 = vmul.f32 %v5525_v47, %v6285_v61  ;;  %v1808_v47 = vrot.slane %v1799_v16, %v5964_v18 }
 0x769   : > { %v1562_v20 = vmul.f32 %v4388_v15, %v1552_v51  ;;  %v1599_v51 = vrot.slane %v1594_v26, %v5955_v63 }
 0x76a   : > { %v5527_v19 = vpop.eup %5526 }
 0x76b   : > { %v1553_v56 = vmul.f32 %v5527_v19, %v6289_v39  ;;  %v5529_v34 = vpop.eup %5528  ;;  %v6309_v25 = vadd.f32 %v4389_v59, %v1562_v20 }
 0x76c   : > { %v1554_v61 = vmul.f32 %v5529_v34, %v6291_v54  ;;  %v5354_v54 = vld [vmem:[#allocation12 + $0xb0] sm:$0xff]  }
 0x76d   : > { %v1563_v2 = vmul.f32 %v4388_v15, %v1553_v56 }
 0x76e   : > { %v5531_v6 = vpop.eup %5530  ;;  %v1564_v1 = vmul.f32 %v4388_v15, %v1554_v61 }
 0x76f   : > { %v6311_v28 = vadd.f32 %v4389_v59, %v1563_v2  ;;  %v1555_v29 = vmul.f32 %v5531_v6, %v6297_v22  ;;  %v5355_v22 = vld [vmem:[#allocation12 + $0x30] sm:$0xff]  }
 0x770   : > { %v6321_v42 = vadd.f32 %v4389_v59, %v1564_v1 }
 0x771   : > { %v1576_v30 = vpack.c.bf16 %v6311_v28, %v6309_v25  ;;  %v1565_v39 = vmul.f32 %v4388_v15, %v1555_v29  ;;  %v1804_v15 = vrot.slane %v1799_v16, %v5955_v63 }
 0x773   : > { %1719 = vmatmul.mubr.bf16.vlgmr.msra.gmra.mxu1 %v1576_v30  ;;  %1924 = vmatmul.mubr.bf16.vlgmr.msra.gmra.mxu0 %v1576_v30  ;;  %v6319_v36 = vadd.f32 %v4389_v59, %v1565_v39 }
 0x774   : > { %1728 = vmatprep.mubr.bf16.mxu1 %v6847_v53  ;;  %1933 = vmatprep.mubr.bf16.mxu0 %v6847_v53 }
 0x775   : > { %4735 = vmatpush3.bf16.msra.mxu1 %v5350_v0  ;;  %4763 = vmatpush3.bf16.msra.mxu0 %v5351_v41  ;;  %v1577_v10 = vpack.c.bf16 %v6319_v36, %v6321_v42 }
 0x776   : > { %4736 = vmatprep.subr.bf16.mxu1 %v5352_v5  ;;  %4764 = vmatprep.subr.bf16.mxu0 %v5353_v44 }
 0x779   : > { %4737 = vmatpush3.bf16.msra.mxu1 %v5354_v54  ;;  %4765 = vmatpush3.bf16.msra.mxu0 %v5355_v22 }
 0x77a   : > { %4738 = vmatprep.subr.bf16.mxu1 %v5356_v33  ;;  %4766 = vmatprep.subr.bf16.mxu0 %v5357_v9 }
 0x77b   : > { %1729 = vmatmul.mubr.bf16.gmra.mxu1 %v1577_v10  ;;  %1934 = vmatmul.mubr.bf16.gmra.mxu0 %v1577_v10 }
 0x77d   : > { %4739 = vmatpush3.bf16.msra.mxu1 %v5358_v45  ;;  %4767 = vmatpush3.bf16.msra.mxu0 %v5359_v13 }
 0x77e   : > { %4740 = vmatprep.subr.bf16.mxu1 %v5360_v12  ;;  %4768 = vmatprep.subr.bf16.mxu0 %v5361_v48 }
 0x781   : > { %4741 = vmatpush3.bf16.msra.mxu1 %v5362_v57  ;;  %4769 = vmatpush3.bf16.msra.mxu0 %v5363_v21 }
 0x782   : > { %4742 = vmatprep.subr.bf16.mxu1 %v5364_v23  ;;  %4770 = vmatprep.subr.bf16.mxu0 %v5365_v24 }
 0x785   : > { %4743 = vmatpush3.bf16.msra.mxu1 %v5366_v38  ;;  %4771 = vmatpush3.bf16.msra.mxu0 %v5367_v43 }
 0x786   : > { %4744 = vmatprep.subr.bf16.mxu1 %v5368_v46  ;;  %4772 = vmatprep.subr.bf16.mxu0 %v5369_v49 }
 0x789   : > { %4745 = vmatpush3.bf16.msra.mxu1 %v5370_v58  ;;  %4773 = vmatpush3.bf16.msra.mxu0 %v5371_v55 }
 0x78a   : > { %4746 = vmatprep.subr.bf16.mxu1 %v5372_v40  ;;  %4774 = vmatprep.subr.bf16.mxu0 %v5373_v37 }
 0x78d   : > { %4747 = vmatpush3.bf16.msra.mxu1 %v5374_v17  ;;  %4775 = vmatpush3.bf16.msra.mxu0 %v5375_v31 }
 0x78e   : > { %4748 = vmatprep.subr.bf16.mxu1 %v5376_v32  ;;  %4776 = vmatprep.subr.bf16.mxu0 %v5377_v35 }
 0x791   : > { %4749 = vmatpush3.bf16.msra.mxu1 %v5378_v3  ;;  %4777 = vmatpush3.bf16.msra.mxu0 %v5379_v14 }
 0x833   : > { %v1720_v27 = vpop.f32.mrf.mxu1  ;;  %v1925_v60 = vpop.f32.mrf.mxu0 }
 0x834   : > { %v1721_v29 = vadd.f32 %v1720_v27, %v1599_v51  ;;  %v1926_v30 = vadd.f32 %v1925_v60, %v1804_v15 }
 0x835   : > { %v1722_v19 = vpop.f32.mrf.mxu1  ;;  %v1927_v56 = vpop.f32.mrf.mxu0 }
 0x836   : > { %v1723_v59 = vadd.f32 %v1722_v19, %v1603_v62  ;;  %v1928_v2 = vadd.f32 %v1927_v56, %v1808_v47  ;;  %v1739_v13 = vmax.f32 %v1721_v29, 0.0  ;;  %v1944_v12 = vmax.f32 %v1926_v30, 0.0 }
 0x837   : > { %v1724_v20 = vpop.f32.mrf.mxu1  ;;  %v1929_v34 = vpop.f32.mrf.mxu0 }
 0x838   : > { %v1725_v6 = vadd.f32 %v1724_v20, %v1599_v51  ;;  %v1930_v61 = vadd.f32 %v1929_v34, %v1804_v15  ;;  %v1740_v33 = vmax.f32 %v1723_v59, 0.0  ;;  %v1945_v9 = vmax.f32 %v1928_v2, 0.0 }
 0x839   : > { %v1726_v39 = vpop.f32.mrf.mxu1  ;;  %v1931_v0 = vpop.f32.mrf.mxu0 }
 0x83a   : > { %v1727_v41 = vadd.f32 %v1726_v39, %v1603_v62  ;;  %v1932_v5 = vadd.f32 %v1931_v0, %v1808_v47  ;;  %v1741_v44 = vmax.f32 %v1725_v6, 0.0  ;;  %v1946_v1 = vmax.f32 %v1930_v61, 0.0 }
 0x83b   : > { %v1730_v54 = vpop.f32.mrf.mxu1  ;;  %v1935_v22 = vpop.f32.mrf.mxu0 }
 0x83c   : > { %v1742_v10 = vmax.f32 %v1727_v41, 0.0  ;;  %v1947_v45 = vmax.f32 %v1932_v5, 0.0  ;;  %v1747_v24 = vpack.c.bf16 %v1741_v44, %v1739_v13  ;;  %v1952_v38 = vpack.c.bf16 %v1946_v1, %v1944_v12  ;;  %v4454_v44 = vld [vmem:[#allocation13] ss:$0 sm:$0xff] }
 0x83d   : > { %v1732_v48 = vpop.f32.mrf.mxu1  ;;  %v1937_v57 = vpop.f32.mrf.mxu0  ;;  %v1731_v37 = vadd.f32 %v1730_v54, %v1599_v51  ;;  %v1936_v17 = vadd.f32 %v1935_v22, %v1804_v15 }
 0x83e   : > { %v1748_v21 = vpack.c.bf16 %v1742_v10, %v1740_v33  ;;  %v1953_v23 = vpack.c.bf16 %v1947_v45, %v1945_v9  ;;  %v1733_v43 = vadd.f32 %v1732_v48, %v1603_v62  ;;  %v1938_v58 = vadd.f32 %v1937_v57, %v1808_v47 }
 0x83f   : > { %v1734_v46 = vpop.f32.mrf.mxu1  ;;  %v1939_v49 = vpop.f32.mrf.mxu0  ;;  %v1743_v56 = vmax.f32 %v1731_v37, 0.0  ;;  %v1948_v20 = vmax.f32 %v1936_v17, 0.0 }
 0x840   : > { %v1735_v55 = vadd.f32 %v1734_v46, %v1599_v51  ;;  %v1940_v40 = vadd.f32 %v1939_v49, %v1804_v15  ;;  %2116 = vmatprep.mubr.bf16.mxu1 %v1953_v23  ;;  %2261 = vmatprep.mubr.bf16.mxu0 %v1748_v21  ;;  %v1744_v16 = vmax.f32 %v1733_v43, 0.0  ;;  %v1949_v27 = vmax.f32 %v1938_v58, 0.0 }
 0x841   : > { %v1736_v31 = vpop.f32.mrf.mxu1  ;;  %v1941_v32 = vpop.f32.mrf.mxu0  ;;  %2117 = vmatmul.mubr.bf16.vlgmr.msra.gmra.mxu1 %v1952_v38  ;;  %2262 = vmatmul.mubr.bf16.vlgmr.msra.gmra.mxu0 %v1747_v24 }
 0x842   : > { %v1737_v35 = vadd.f32 %v1736_v31, %v1603_v62  ;;  %v1942_v3 = vadd.f32 %v1941_v32, %v1808_v47  ;;  %v1745_v14 = vmax.f32 %v1735_v55, 0.0  ;;  %v1950_v26 = vmax.f32 %v1940_v40, 0.0  ;;  %v5380_v32 = vld [vmem:[#allocation7 + $0x168] ss:$12 sps:$4 sm:$0xff]  }
 0x844   : > { %v1746_v60 = vmax.f32 %v1737_v35, 0.0  ;;  %v1951_v19 = vmax.f32 %v1942_v3, 0.0  ;;  %v1749_v2 = vpack.c.bf16 %v1745_v14, %v1743_v56  ;;  %v1954_v6 = vpack.c.bf16 %v1950_v26, %v1948_v20 }
 0x846   : > { %v1750_v34 = vpack.c.bf16 %v1746_v60, %v1744_v16  ;;  %v1955_v59 = vpack.c.bf16 %v1951_v19, %v1949_v27 }
 0x848   : > { %2124 = vmatprep.mubr.bf16.mxu1 %v1955_v59  ;;  %2269 = vmatprep.mubr.bf16.mxu0 %v1750_v34 }
 0x849   : > { %2125 = vmatmul.mubr.bf16.gmra.mxu1 %v1954_v6  ;;  %2270 = vmatmul.mubr.bf16.gmra.mxu0 %v1749_v2 }
 0x84a   : > { %2572 = vmatprep.mubr.bf16.mxu1 %v6847_v53 }
 0x901   : > { %v4750_v62 = vpop.f32.mrf.mxu1  ;;  %v4778_v47 = vpop.f32.mrf.mxu0 }
 0x903   : > { %v4751_v51 = vpop.f32.mrf.mxu1  ;;  %v4779_v15 = vpop.f32.mrf.mxu0 }
 0x904   : > { %v4752_v61 = vadd.f32 %v4751_v51, %v4750_v62  ;;  %v4780_v29 = vadd.f32 %v4779_v15, %v4778_v47  ;;  %v5385_v62 = vld [vmem:[#allocation7 + $0x154] ss:$12 sps:$4 sm:$0xff]   ;;  %v5383_v47 = vld [vmem:[#allocation7 + $0x150] ss:$12 sps:$4 sm:$0xff]  }
 0x905   : > { %v4753_v30 = vpop.f32.mrf.mxu1  ;;  %v4781_v39 = vpop.f32.mrf.mxu0  ;;  %v5388_v51 = vld [vmem:[#allocation7 + $0x13c] ss:$12 sps:$4 sm:$0xff]  }
 0x906   : > { %v2264_v0 = vadd.f32 %v4780_v29, %v4752_v61  ;;  %v5389_v15 = vld [vmem:[#allocation7 + $0x170] ss:$12 sps:$4 sm:$0xff]   ;;  %v5386_v61 = vld [vmem:[#allocation7 + $0x138] ss:$12 sps:$4 sm:$0xff]  }
 0x907   : > { %v4754_v41 = vpop.f32.mrf.mxu1  ;;  %v4782_v5 = vpop.f32.mrf.mxu0  ;;  %5090 = vmatprep.subr.bf16.mxu0 %v5389_v15  ;;  %v5392_v29 = vld [vmem:[#allocation7 + $0x124] ss:$12 sps:$4 sm:$0xff]  }
 0x908   : > { %v4755_v1 = vadd.f32 %v4754_v41, %v4753_v30  ;;  %v4783_v54 = vadd.f32 %v4782_v5, %v4781_v39  ;;  %v2278_v22 = vadd.f32 %v2264_v0, %v6309_v25  ;;  %5091 = vmatpush3.bf16.msra.mxu0 %v5389_v15  ;;  %v5393_v30 = vld [vmem:[#allocation7 + $0x158] ss:$12 sps:$4 sm:$0xff]   ;;  %v5390_v39 = vld [vmem:[#allocation7 + $0x120] ss:$12 sps:$4 sm:$0xff]   ;;  %v5394_v5 = vld [vmem:[#allocation7 + $0x108] ss:$12 sps:$4 sm:$0xff]  }
 0x909   : > { %v4756_v33 = vpop.f32.mrf.mxu1  ;;  %v4784_v9 = vpop.f32.mrf.mxu0  ;;  %5092 = vmatprep.subr.bf16.mxu0 %v5393_v30  ;;  %v5396_v0 = vld [vmem:[#allocation7 + $0x10c] ss:$12 sps:$4 sm:$0xff]  }
 0x90a   : > { %v2267_v10 = vadd.f32 %v4783_v54, %v4755_v1  ;;  %v2289_v45 = vadd.f32 %v4454_v44, %v2278_v22  ;;  %v5397_v41 = vld [vmem:[#allocation7 + $0x140] ss:$12 sps:$4 sm:$0xff]   ;;  %v5401_v1 = vld [vmem:[#allocation7 + $0x128] ss:$12 sps:$4 sm:$0xff]   ;;  %v5398_v54 = vld [vmem:[#allocation7 + $0xf0] ss:$12 sps:$4 sm:$0xff]  }
 0x90b   : > { %v4757_v13 = vpop.f32.mrf.mxu1  ;;  %v4785_v12 = vpop.f32.mrf.mxu0  ;;  %v5404_v22 = vld [vmem:[#allocation7 + $0xdc] ss:$12 sps:$4 sm:$0xff]  }
 0x90c   : > { %v4758_v48 = vadd.f32 %v4757_v13, %v4756_v33  ;;  %v4786_v57 = vadd.f32 %v4785_v12, %v4784_v9  ;;  %2295 = vadd.xlane.f32.xlu0 %v2289_v45  ;;  %v2279_v21 = vadd.f32 %v2267_v10, %v6311_v28  ;;  %v5382_v28 = vld [vmem:[#allocation7 + $0x16c] ss:$12 sps:$4 sm:$0xff]   ;;  %5093 = vmatpush3.bf16.msra.mxu0 %v5393_v30  ;;  %v5405_v33 = vld [vmem:[#allocation7 + $0x110] ss:$12 sps:$4 sm:$0xff]  }
 0x90d   : > { %v4759_v23 = vpop.f32.mrf.mxu1  ;;  %v4787_v24 = vpop.f32.mrf.mxu0  ;;  %2540 = vmatprep.subr.bf16.mxu1 %v5382_v28  ;;  %5094 = vmatprep.subr.bf16.mxu0 %v5397_v41  ;;  %v5402_v9 = vld [vmem:[#allocation7 + $0xd8] ss:$12 sps:$4 sm:$0xff]   ;;  %v5406_v13 = vld [vmem:[#allocation7 + $0xc0] ss:$12 sps:$4 sm:$0xff]  }
 0x90e   : > { %v2272_v38 = vadd.f32 %v4786_v57, %v4758_v48  ;;  %v2290_v43 = vadd.f32 %v4454_v44, %v2279_v21  ;;  %2541 = vmatpush1.bf16.msra.mxu1 %v5380_v32  ;;  %v5408_v10 = vld [vmem:[#allocation7 + $0xc4] ss:$12 sps:$4 sm:$0xff]   ;;  %v5410_v12 = vld [vmem:[#allocation7 + $0xe0] ss:$12 sps:$4 sm:$0xff]   ;;  %v5411_v48 = vld [vmem:[#allocation7 + $0xc8] ss:$12 sps:$4 sm:$0xff]  }
 0x90f   : > { %v4760_v46 = vpop.f32.mrf.mxu1  ;;  %v4788_v49 = vpop.f32.mrf.mxu0  ;;  %2542 = vmatprep.subr.bf16.mxu1 %v5385_v62 }
 0x910   : > { %v4761_v58 = vadd.f32 %v4760_v46, %v4759_v23  ;;  %v4789_v55 = vadd.f32 %v4788_v49, %v4787_v24  ;;  %2297 = vadd.xlane.f32.xlu1 %v2290_v43  ;;  %v2280_v25 = vadd.f32 %v2272_v38, %v6321_v42  ;;  %5095 = vmatpush3.bf16.msra.mxu0 %v5397_v41 }
 0x911   : > { %5096 = vmatprep.subr.bf16.mxu0 %v5401_v1 }
 0x912   : > { %v2275_v40 = vadd.f32 %v4789_v55, %v4761_v58  ;;  %v2291_v37 = vadd.f32 %v4454_v44, %v2280_v25  ;;  %2543 = vmatpush1.bf16.msra.mxu1 %v5383_v47 }
 0x913   : > { %2544 = vmatprep.subr.bf16.mxu1 %v5388_v51 }
 0x914   : > { %2299 = vadd.xlane.f32.xlu0 %v2291_v37  ;;  %v2281_v17 = vadd.f32 %v2275_v40, %v6319_v36  ;;  %5097 = vmatpush3.bf16.msra.mxu0 %v5401_v1  ;;  %v6849_v1 = vsub.s32 2, %v6837_v8 }
 0x915   : > { %5098 = vmatprep.subr.bf16.mxu0 %v5405_v33 }
 0x916   : > { %v2292_v31 = vadd.f32 %v4454_v44, %v2281_v17  ;;  %2545 = vmatpush1.bf16.msra.mxu1 %v5386_v61  ;;  %v5400_v44 = vld [vmem:[#allocation7 + $0xf4] ss:$12 sps:$4 sm:$0xff]  }
 0x917   : > { %2546 = vmatprep.subr.bf16.mxu1 %v5392_v29 }
 0x918   : > { %2301 = vadd.xlane.f32.xlu1 %v2292_v31  ;;  %5099 = vmatpush3.bf16.msra.mxu0 %v5405_v33 }
 0x91a   : > { %2547 = vmatpush1.bf16.msra.mxu1 %v5390_v39 }
 0x91b   : > { %2548 = vmatprep.subr.bf16.mxu1 %v5396_v0 }
 0x91e   : > { %2549 = vmatpush1.bf16.msra.mxu1 %v5394_v5 }
 0x91f   : > { %2550 = vmatprep.subr.bf16.mxu1 %v5400_v44 }
 0x922   : > { %2551 = vmatpush1.bf16.msra.mxu1 %v5398_v54 }
 0x923   : > { %2552 = vmatprep.subr.bf16.mxu1 %v5404_v22 }
 0x926   : > { %2553 = vmatpush1.bf16.msra.mxu1 %v5402_v9 }
 0x927   : > { %2554 = vmatprep.subr.bf16.mxu1 %v5408_v10 }
 0x92a   : > { %2555 = vmatpush1.bf16.msra.mxu1 %v5406_v13 }
 0x995   : > { %v2296_v35 = vpop.xlane.xlu0 %2295 }
 0x996   : > { %v2303_v3 = vmul.f32 0.0078125, %v2296_v35 }
 0x998   : > { %v6340_v14 = vsub.f32 %v2289_v45, %v2303_v3  ;;  %v5409_v45 = vld [vmem:[#allocation7 + $0xf8] ss:$12 sps:$4 sm:$0xff]   ;;  %v4456_v3 = vld [vmem:[%s6802_s15] ss:$0 sm:$0xff] }
 0x999   : > { %v2298_v26 = vpop.xlane.xlu1 %2297  ;;  %5100 = vmatprep.subr.bf16.mxu0 %v5409_v45 }
 0x99a   : > { %v2304_v16 = vmul.f32 0.0078125, %v2298_v26  ;;  %v2311_v42 = vmul.f32 %v6340_v14, %v6340_v14  ;;  %5101 = vmatpush3.bf16.msra.mxu0 %v5409_v45 }
 0x99b   : > { %5102 = vmatprep.subr.bf16.mxu0 %v5410_v12 }
 0x99c   : > { %v6344_v27 = vsub.f32 %v2290_v43, %v2304_v16  ;;  %2315 = vadd.xlane.f32.xlu0 %v2311_v42 }
 0x99d   : > { %v2300_v60 = vpop.xlane.xlu0 %2299 }
 0x99e   : > { %v2305_v36 = vmul.f32 0.0078125, %v2300_v60  ;;  %v2312_v19 = vmul.f32 %v6344_v27, %v6344_v27  ;;  %5103 = vmatpush3.bf16.msra.mxu0 %v5410_v12 }
 0x99f   : > { %5104 = vmatprep.subr.bf16.mxu0 %v5411_v48 }
 0x9a0   : > { %v6348_v56 = vsub.f32 %v2291_v37, %v2305_v36  ;;  %2317 = vadd.xlane.f32.xlu1 %v2312_v19 }
 0x9a1   : > { %v2302_v20 = vpop.xlane.xlu1 %2301 }
 0x9a2   : > { %v2306_v34 = vmul.f32 0.0078125, %v2302_v20  ;;  %v2313_v59 = vmul.f32 %v6348_v56, %v6348_v56  ;;  %5105 = vmatpush3.bf16.msra.mxu0 %v5411_v48 }
 0x9a4   : > { %v6352_v2 = vsub.f32 %v2292_v31, %v2306_v34  ;;  %2319 = vadd.xlane.f32.xlu0 %v2313_v59  ;;  %v4455_v31 = vld [vmem:[%s6801_s14] ss:$0 sm:$0xff] }
 0x9a6   : > { %v2314_v6 = vmul.f32 %v6352_v2, %v6352_v2 }
 0x9a8   : > { %2321 = vadd.xlane.f32.xlu1 %v2314_v6 }
 0xa25   : > { %v2316_v57 = vpop.xlane.xlu0 %2315 }
 0xa26   : > { %v2323_v21 = vmul.f32 0.0078125, %v2316_v57 }
 0xa28   : > { %v2327_v23 = vadd.f32 1e-05, %v2323_v21 }
 0xa29   : > { %v2318_v24 = vpop.xlane.xlu1 %2317 }
 0xa2a   : > { %5532 = vrsqrt.f32 %v2327_v23  ;;  %v2324_v38 = vmul.f32 0.0078125, %v2318_v24 }
 0xa2c   : > { %v2328_v43 = vadd.f32 1e-05, %v2324_v38 }
 0xa2d   : > { %v2320_v46 = vpop.xlane.xlu0 %2319 }
 0xa2e   : > { %5534 = vrsqrt.f32 %v2328_v43  ;;  %v2325_v49 = vmul.f32 0.0078125, %v2320_v46 }
 0xa30   : > { %v2329_v58 = vadd.f32 1e-05, %v2325_v49 }
 0xa31   : > { %v2322_v55 = vpop.xlane.xlu1 %2321 }
 0xa32   : > { %5536 = vrsqrt.f32 %v2329_v58  ;;  %v2326_v25 = vmul.f32 0.0078125, %v2322_v55 }
 0xa34   : > { %v2330_v40 = vadd.f32 1e-05, %v2326_v25 }
 0xa36   : > { %5538 = vrsqrt.f32 %v2330_v40 }
 0xa37   : > { %v5533_v37 = vpop.eup %5532 }
 0xa38   : > { %v2335_v17 = vmul.f32 %v5533_v37, %v6340_v14 }
 0xa3a   : > { %v2345_v35 = vmul.f32 %v4455_v31, %v2335_v17  ;;  %v5585_v17 = vld [vmem:[%s6793_s6 + $0x8] sm:$0xff]  }
 0xa3b   : > { %v5535_v32 = vpop.eup %5534 }
 0xa3c   : > { %v2336_v28 = vmul.f32 %v5535_v32, %v6344_v27  ;;  %v6364_v42 = vadd.f32 %v4456_v3, %v2345_v35  ;;  %v5587_v32 = vld [vmem:[%s6793_s6 + $0x18] sm:$0xff]   ;;  %v5589_v35 = vld [vmem:[%s6793_s6 + $0x28] sm:$0xff]  }
 0xa3e   : > { %v2346_v26 = vmul.f32 %v4455_v31, %v2336_v28  ;;  %v5588_v28 = vld [vmem:[%s6793_s6 + $0x20] sm:$0xff]  }
 0xa3f   : > { %v5537_v16 = vpop.eup %5536 }
 0xa40   : > { %v6366_v60 = vadd.f32 %v4456_v3, %v2346_v26  ;;  %v2337_v14 = vmul.f32 %v5537_v16, %v6348_v56  ;;  %v5584_v56 = vld [vmem:[%s6793_s6] sm:$0xff]   ;;  %v5591_v26 = vld [vmem:[%s6793_s6 + $0x38] sm:$0xff]  }
 0xa41   : > { %v5592_v16 = vld [vmem:[%s6793_s6 + $0x40] sm:$0xff]  }
 0xa42   : > { %v2359_v36 = vpack.c.bf16 %v6366_v60, %v6364_v42  ;;  %v2347_v20 = vmul.f32 %v4455_v31, %v2337_v14  ;;  %v5593_v14 = vld [vmem:[%s6793_s6 + $0x48] sm:$0xff]  }
 0xa43   : > { %v5539_v19 = vpop.eup %5538 }
 0xa44   : > { %2573 = vmatmul.mubr.bf16.vlgmr.msra.gmra.mxu1 %v2359_v36  ;;  %5106 = vmatprep.mubr.bf16.mxu0 %v2359_v36  ;;  %v2338_v27 = vmul.f32 %v5539_v19, %v6352_v2  ;;  %v6373_v59 = vadd.f32 %v4456_v3, %v2347_v20  ;;  %v4457_v2 = vld [vmem:[%s6796_s9 + $0x3] sm:$0x7]  ;;  %v5594_v36 = vld [vmem:[%s6793_s6 + $0x50] sm:$0xff]   ;;  %v5595_v19 = vld [vmem:[%s6793_s6 + $0x58] sm:$0xff]  }
 0xa45   : > { %2582 = vmatprep.mubr.bf16.mxu1 %v6847_v53  ;;  %v2400_v51 = vrot.slane %v4457_v2, %v5955_v63  ;;  %v2408_v54 = vrot.slane %v4457_v2, %v6849_v1  ;;  %v2404_v9 = vrot.slane %v4457_v2, %v5964_v18  ;;  %v5597_v20 = vld [vmem:[%s6793_s6 + $0x68] sm:$0xff]  }
 0xa46   : > { %v2348_v34 = vmul.f32 %v4455_v31, %v2338_v27  ;;  %v5586_v31 = vld [vmem:[%s6793_s6 + $0x10] sm:$0xff]   ;;  %v5596_v27 = vld [vmem:[%s6793_s6 + $0x60] sm:$0xff]  }
 0xa48   : > { %v6375_v6 = vadd.f32 %v4456_v3, %v2348_v34  ;;  %v5590_v3 = vld [vmem:[%s6793_s6 + $0x30] sm:$0xff]  }
 0xa49   : > { %v5598_v34 = vld [vmem:[%s6793_s6 + $0x70] sm:$0xff]  }
 0xa4a   : > { %6848 = vst [vmem:[#allocation27_spill] sm:$0xff] %v6375_v6  ;;  %v2360_v62 = vpack.c.bf16 %v6375_v6, %v6373_v59 }
 0xa4c   : > { %2583 = vmatmul.mubr.bf16.gmra.mxu1 %v2360_v62  ;;  %5107 = vmatmul.mubr.bf16.vlgmr.msra.gmra.mxu0 %v2360_v62  ;;  %v5599_v62 = vld [vmem:[%s6793_s6 + $0x78] sm:$0xff]  }
 0xa4d   : > { %5114 = vmatprep.mubr.msk.bf16.mxu0 %vm621_vm0, %v5584_v56  ;;  %5150 = vmatprep.mubr.msk.bf16.mxu1 %vm621_vm0, %v5584_v56 }
 0xb04   : > { %v2574_v47 = vpop.f32.mrf.mxu1 }
 0xb05   : > { %v2575_v29 = vadd.f32 %v2574_v47, %v2400_v51 }
 0xb06   : > { %v2576_v15 = vpop.f32.mrf.mxu1 }
 0xb07   : > { %v2577_v55 = vadd.f32 %v2576_v15, %v2404_v9 }
 0xb08   : > { %v2578_v61 = vpop.f32.mrf.mxu1 }
 0xb09   : > { %v2579_v30 = vadd.f32 %v2578_v61, %v2400_v51  ;;  %v6540_v61 = vld [vmem:[%s6794_s7 + $0x38] sm:$0xff]  }
 0xb0a   : > { %v2580_v39 = vpop.f32.mrf.mxu1 }
 0xb0b   : > { %v6388_v0 = vpack.c.bf16 %v2579_v30, %v2575_v29  ;;  %v2581_v57 = vadd.f32 %v2580_v39, %v2404_v9 }
 0xb0c   : > { %v2584_v41 = vpop.f32.mrf.mxu1  ;;  %v5108_v5 = vpop.f32.mrf.mxu0 }
 0xb0d   : > { %v2585_v44 = vadd.f32 %v2584_v41, %v2400_v51  ;;  %v2636_v13 = vadd.f32 %v5108_v5, %v2408_v54  ;;  %v2644_v37 = vpack.c.bf16 %v2581_v57, %v2577_v55 }
 0xb0e   : > { %v2586_v22 = vpop.f32.mrf.mxu1  ;;  %v2627_v33 = vpop.f32.mrf.mxu0 }
 0xb0f   : > { %v2587_v21 = vadd.f32 %v2586_v22, %v2404_v9  ;;  %v2628_v23 = vadd.f32 %v2627_v33, %v2408_v54 }
 0xb10   : > { %v2588_v10 = vpop.f32.mrf.mxu1  ;;  %v5109_v45 = vpop.f32.mrf.mxu0 }
 0xb11   : > { %v2589_v12 = vadd.f32 %v2588_v10, %v2400_v51  ;;  %v2639_v48 = vadd.f32 %v5109_v45, %v2408_v54 }
 0xb12   : > { %v2590_v24 = vpop.f32.mrf.mxu1  ;;  %v2630_v38 = vpop.f32.mrf.mxu0 }
 0xb13   : > { %v6393_v43 = vpack.c.bf16 %v2589_v12, %v2585_v44  ;;  %v2647_v46 = vpack.c.bf16 %v2639_v48, %v2636_v13  ;;  %v2591_v49 = vadd.f32 %v2590_v24, %v2404_v9  ;;  %v2631_v58 = vadd.f32 %v2630_v38, %v2408_v54 }
 0xb15   : > { %v2645_v25 = vpack.c.bf16 %v2591_v49, %v2587_v21  ;;  %v2646_v40 = vpack.c.bf16 %v2631_v58, %v2628_v23  ;;  %5146 = vmatprep.subr.bf16.mxu1 %v2647_v46 }
 0xb16   : > { %5147 = vmatpush3.bf16.msra.mxu1 %v2647_v46 }
 0xb17   : > { %5110 = vmatprep.subr.bf16.mxu0 %v2645_v25  ;;  %5148 = vmatprep.subr.bf16.mxu1 %v2646_v40 }
 0xb18   : > { %5111 = vmatpush3.bf16.msra.mxu0 %v2645_v25 }
 0xb19   : > { %5112 = vmatprep.subr.bf16.mxu0 %v2644_v37 }
 0xb1a   : > { %5149 = vmatpush3.bf16.msra.mxu1 %v2646_v40 }
 0xb1c   : > { %5113 = vmatpush3.bf16.msra.mxu0 %v2644_v37 }
 0xb1d   : > { %5151 = vmatmul.mubr.msk.bf16.vlgmr.msra.gmra.mxu1 %vm621_vm0, %v5585_v17 }
 0xb1e   : > { %5154 = vmatprep.mubr.msk.bf16.mxu1 %vm621_vm0, %v5586_v31 }
 0xb1f   : > { %5115 = vmatmul.mubr.msk.bf16.vlgmr.msra.gmra.mxu0 %vm621_vm0, %v5585_v17 }
 0xb20   : > { %5118 = vmatprep.mubr.msk.bf16.mxu0 %vm621_vm0, %v5586_v31 }
 0xb25   : > { %5155 = vmatmul.mubr.msk.bf16.gmra.mxu1 %vm621_vm0, %v5587_v32 }
 0xb26   : > { %5158 = vmatprep.mubr.msk.bf16.mxu1 %vm621_vm0, %v5588_v28 }
 0xb27   : > { %5119 = vmatmul.mubr.msk.bf16.gmra.mxu0 %vm621_vm0, %v5587_v32 }
 0xb28   : > { %5122 = vmatprep.mubr.msk.bf16.mxu0 %vm621_vm0, %v5588_v28 }
 0xb2d   : > { %5159 = vmatmul.mubr.msk.bf16.gmra.mxu1 %vm621_vm0, %v5589_v35 }
 0xb2e   : > { %5162 = vmatprep.mubr.msk.bf16.mxu1 %vm621_vm0, %v5590_v3 }
 0xb2f   : > { %5123 = vmatmul.mubr.msk.bf16.gmra.mxu0 %vm621_vm0, %v5589_v35 }
 0xb30   : > { %5126 = vmatprep.mubr.msk.bf16.mxu0 %vm621_vm0, %v5590_v3 }
 0xb35   : > { %5163 = vmatmul.mubr.msk.bf16.gmra.mxu1 %vm621_vm0, %v5591_v26 }
 0xb36   : > { %5166 = vmatprep.mubr.msk.bf16.mxu1 %vm621_vm0, %v5592_v16 }
 0xb37   : > { %5127 = vmatmul.mubr.msk.bf16.gmra.mxu0 %vm621_vm0, %v5591_v26 }
 0xb38   : > { %5130 = vmatprep.mubr.msk.bf16.mxu0 %vm621_vm0, %v5592_v16 }
 0xb3d   : > { %5167 = vmatmul.mubr.msk.bf16.gmra.mxu1 %vm621_vm0, %v5593_v14 }
 0xb3e   : > { %5170 = vmatprep.mubr.msk.bf16.mxu1 %vm621_vm0, %v5594_v36 }
 0xb3f   : > { %5131 = vmatmul.mubr.msk.bf16.gmra.mxu0 %vm621_vm0, %v5593_v14 }
 0xb40   : > { %5134 = vmatprep.mubr.msk.bf16.mxu0 %vm621_vm0, %v5594_v36 }
 0xb45   : > { %5171 = vmatmul.mubr.msk.bf16.gmra.mxu1 %vm621_vm0, %v5595_v19 }
 0xb46   : > { %5174 = vmatprep.mubr.msk.bf16.mxu1 %vm621_vm0, %v5596_v27 }
 0xb47   : > { %5135 = vmatmul.mubr.msk.bf16.gmra.mxu0 %vm621_vm0, %v5595_v19 }
 0xb48   : > { %5138 = vmatprep.mubr.msk.bf16.mxu0 %vm621_vm0, %v5596_v27 }
 0xb4d   : > { %5175 = vmatmul.mubr.msk.bf16.gmra.mxu1 %vm621_vm0, %v5597_v20 }
 0xb4e   : > { %5178 = vmatprep.mubr.msk.bf16.mxu1 %vm621_vm0, %v5598_v34 }
 0xb4f   : > { %5139 = vmatmul.mubr.msk.bf16.gmra.mxu0 %vm621_vm0, %v5597_v20 }
 0xb50   : > { %5142 = vmatprep.mubr.msk.bf16.mxu0 %vm621_vm0, %v5598_v34 }
 0xb55   : > { %5179 = vmatmul.mubr.msk.bf16.gmra.mxu1 %vm621_vm0, %v5599_v62 }
 0xb57   : > { %5143 = vmatmul.mubr.msk.bf16.gmra.mxu0 %vm621_vm0, %v5599_v62 }
 0xb58   : > { %4852 = vmatprep.mubr.bf16.mxu0 %v6388_v0 }
 0xbdd   : > { %v6485_v30 = vpop.f32.mrf.mxu1 }
 0xbdf   : > { %v6471_v56 = vpop.f32.mrf.mxu0  ;;  %v6489_v41 = vpop.f32.mrf.mxu1 }
 0xbe1   : > { %v6473_v2 = vpop.f32.mrf.mxu0  ;;  %v6495_v1 = vpop.f32.mrf.mxu1 }
 0xbe3   : > { %v6475_v47 = vpop.f32.mrf.mxu0  ;;  %v6503_v9 = vpop.f32.mrf.mxu1 }
 0xbe4   : > { %v2810_v51 = vpack.c.bf16 %v6475_v47, %v6471_v56 }
 0xbe5   : > { %v6479_v15 = vpop.f32.mrf.mxu0  ;;  %v6507_v13 = vpop.f32.mrf.mxu1 }
 0xbe6   : > { %v6851_v56 = vpack.c.bf16 %v6479_v15, %v6473_v2 }
 0xbe7   : > { %v6483_v29 = vpop.f32.mrf.mxu0  ;;  %v6509_v48 = vpop.f32.mrf.mxu1 }
 0xbe9   : > { %v6487_v39 = vpop.f32.mrf.mxu0  ;;  %v6511_v21 = vpop.f32.mrf.mxu1 }
 0xbeb   : > { %v6491_v5 = vpop.f32.mrf.mxu0  ;;  %v6515_v38 = vpop.f32.mrf.mxu1 }
 0xbec   : > { %v2812_v44 = vpack.c.bf16 %v6491_v5, %v6483_v29  ;;  %v6612_v5 = vld [vmem:[%s6794_s7 + $0x48] sm:$0xff]  }
 0xbed   : > { %v6497_v54 = vpop.f32.mrf.mxu0 }
 0xbee   : > { %v2811_v33 = vpack.c.bf16 %v6497_v54, %v6487_v39  ;;  %v6627_v54 = vld [vmem:[%s6794_s7 + $0x40] sm:$0xff]  }
 0xbef   : > { %v5124_v10 = vpop.f32.mrf.mxu0 }
 0xbf1   : > { %v2714_v12 = vpop.f32.mrf.mxu0 }
 0xbf3   : > { %v5125_v57 = vpop.f32.mrf.mxu0 }
 0xbf5   : > { %v2717_v23 = vpop.f32.mrf.mxu0 }
 0xbf7   : > { %v5128_v46 = vpop.f32.mrf.mxu0 }
 0xbf9   : > { %v2730_v58 = vpop.f32.mrf.mxu0 }
 0xbfb   : > { %v5129_v55 = vpop.f32.mrf.mxu0 }
 0xbfc   : > { %v2816_v62 = vpack.c.bf16 %v5129_v55, %v5128_v46 }
 0xbfd   : > { %v2733_v25 = vpop.f32.mrf.mxu0 }
 0xbfe   : > { %v2832_v28 = vmul.bf16 %v6540_v61, %v2816_v62  ;;  %v2815_v55 = vpack.c.bf16 %v2733_v25, %v2730_v58  ;;  %v6564_v58 = vld [vmem:[%s6794_s7 + $0x28] sm:$0xff]  }
 0xbff   : > { %v6519_v40 = vpop.f32.mrf.mxu0 }
 0xc01   : > { %v6521_v37 = vpop.f32.mrf.mxu0 }
 0xc03   : > { %v6523_v17 = vpop.f32.mrf.mxu0 }
 0xc04   : > { %v2818_v31 = vpack.c.bf16 %v6523_v17, %v6519_v40  ;;  %v6534_v40 = vld [vmem:[%s6794_s7 + $0x78] sm:$0xff]  }
 0xc05   : > { %v6527_v32 = vpop.f32.mrf.mxu0 }
 0xc07   : > { %v5136_v35 = vpop.f32.mrf.mxu0 }
 0xc09   : > { %v2762_v3 = vpop.f32.mrf.mxu0 }
 0xc0b   : > { %v5137_v26 = vpop.f32.mrf.mxu0 }
 0xc0d   : > { %v2765_v16 = vpop.f32.mrf.mxu0 }
 0xc0f   : > { %v5140_v14 = vpop.f32.mrf.mxu0 }
 0xc11   : > { %v2778_v36 = vpop.f32.mrf.mxu0 }
 0xc13   : > { %v5141_v19 = vpop.f32.mrf.mxu0 }
 0xc15   : > { %v2781_v27 = vpop.f32.mrf.mxu0 }
 0xc17   : > { %v5144_v20 = vpop.f32.mrf.mxu0 }
 0xc19   : > { %v2794_v34 = vpop.f32.mrf.mxu0 }
 0xc1b   : > { %v5145_v45 = vpop.f32.mrf.mxu0 }
 0xc1c   : > { %v2824_v22 = vpack.c.bf16 %v5145_v45, %v5144_v20  ;;  %v6546_v45 = vld [vmem:[%s6794_s7 + $0x70] sm:$0xff]  }
 0xc1d   : > { %v2797_v49 = vpop.f32.mrf.mxu0 }
 0xc1e   : > { %v2840_v17 = vmul.bf16 %v6534_v40, %v2824_v22  ;;  %v2823_v24 = vpack.c.bf16 %v2797_v49, %v2794_v34  ;;  %v2822_v22 = vpack.c.bf16 %v5141_v19, %v5140_v14  ;;  %v6552_v49 = vld [vmem:[%s6794_s7 + $0x30] sm:$0xff]   ;;  %v6558_v34 = vld [vmem:[%s6794_s7 + $0x68] sm:$0xff]   ;;  %v6570_v14 = vld [vmem:[%s6794_s7 + $0x60] sm:$0xff]  }
 0xc1f   : > { %v2831_v20 = vmul.bf16 %v6552_v49, %v2815_v55  ;;  %v2819_v55 = vpack.c.bf16 %v2765_v16, %v2762_v3  ;;  %v6603_v3 = vld [vmem:[%s6794_s7 + $0x10] sm:$0xff]   ;;  %v6618_v16 = vld [vmem:[%s6794_s7 + $0x8] sm:$0xff]  }
 0xc20   : > { %v2839_v46 = vmul.bf16 %v6546_v45, %v2823_v24  ;;  %4836 = vmatprep.subr.bf16.mxu0 %v2840_v17  ;;  %v2838_v62 = vmul.bf16 %v6558_v34, %v2822_v22  ;;  %v2814_v24 = vpack.c.bf16 %v5125_v57, %v5124_v10  ;;  %v2813_v17 = vpack.c.bf16 %v2717_v23, %v2714_v12  ;;  %v6576_v10 = vld [vmem:[%s6794_s7 + $0x20] sm:$0xff]   ;;  %v6588_v12 = vld [vmem:[%s6794_s7 + $0x18] sm:$0xff]  }
 0xc21   : > { %4837 = vmatpush3.bf16.xpose.msra.mxu0 %v2832_v28  ;;  %v2821_v28 = vpack.c.bf16 %v2781_v27, %v2778_v36  ;;  %v6582_v36 = vld [vmem:[%s6794_s7 + $0x58] sm:$0xff]   ;;  %v2828_v23 = vmul.bf16 %v6588_v12, %v2812_v44  ;;  %v2827_v29 = vmul.bf16 %v6603_v3, %v2811_v33  ;;  %v2834_v44 = vmul.bf16 %v6612_v5, %v2818_v31  ;;  %v6636_v22 = vld [vmem:[%s6794_s7] sm:$0xff]  }
 0xc22   : > { %4838 = vmatprep.subr.bf16.mxu0 %v2839_v46  ;;  %v2830_v25 = vmul.bf16 %v6564_v58, %v2814_v24  ;;  %v2820_v46 = vpack.c.bf16 %v5137_v26, %v5136_v35  ;;  %v2829_v57 = vmul.bf16 %v6576_v10, %v2813_v17  ;;  %v6597_v35 = vld [vmem:[%s6794_s7 + $0x50] sm:$0xff]   ;;  %v2826_v39 = vmul.bf16 %v6618_v16, %v2810_v51 }
 0xc23   : > { %v2837_v19 = vmul.bf16 %v6570_v14, %v2821_v28  ;;  %v2835_v26 = vmul.bf16 %v6597_v35, %v2819_v55  ;;  %v6850_v33 = vpack.c.bf16 %v6527_v32, %v6521_v37  ;;  %v2825_v47 = vmul.bf16 %v6636_v22, %v6851_v56 }
 0xc24   : > { %v2836_v27 = vmul.bf16 %v6582_v36, %v2820_v46 }
 0xc25   : > { %v2833_v31 = vmul.bf16 %v6627_v54, %v6850_v33 }
 0xc29   : > { %4839 = vmatpush3.bf16.xpose.msra.mxu0 %v2831_v20 }
 0xc2a   : > { %4840 = vmatprep.subr.bf16.mxu0 %v2838_v62 }
 0xc31   : > { %4841 = vmatpush3.bf16.xpose.msra.mxu0 %v2830_v25 }
 0xc32   : > { %4842 = vmatprep.subr.bf16.mxu0 %v2837_v19 }
 0xc39   : > { %4843 = vmatpush3.bf16.xpose.msra.mxu0 %v2829_v57 }
 0xc3a   : > { %4844 = vmatprep.subr.bf16.mxu0 %v2836_v27 }
 0xc41   : > { %4845 = vmatpush3.bf16.xpose.msra.mxu0 %v2828_v23 }
 0xc42   : > { %4846 = vmatprep.subr.bf16.mxu0 %v2835_v26 }
 0xc49   : > { %4847 = vmatpush3.bf16.xpose.msra.mxu0 %v2827_v29 }
 0xc4a   : > { %4848 = vmatprep.subr.bf16.mxu0 %v2834_v44 }
 0xc51   : > { %4849 = vmatpush3.bf16.xpose.msra.mxu0 %v2826_v39 }
 0xc52   : > { %4850 = vmatprep.subr.bf16.mxu0 %v2833_v31 }
 0xc59   : > { %4851 = vmatpush3.bf16.xpose.msra.mxu0 %v2825_v47 }
 0xc5a   : > { %4884 = vmatprep.subr.bf16.mxu0 %v6534_v40 }
 0xc60   : > { %4853 = vmatmul.mubr.bf16.vlgmr.msra.gmra.mxu0 %v6388_v0  ;;  %v5160_v0 = vpop.f32.mrf.mxu1 }
 0xc61   : > { %4854 = vmatprep.mubr.bf16.mxu0 %v6393_v43  ;;  %4885 = vmatpush3.bf16.msra.mxu0 %v6540_v61 }
 0xc62   : > { %4886 = vmatprep.subr.bf16.mxu0 %v6546_v45 }
 0xc65   : > { %4887 = vmatpush3.bf16.msra.mxu0 %v6552_v49 }
 0xc66   : > { %4888 = vmatprep.subr.bf16.mxu0 %v6558_v34 }
 0xc68   : > { %4855 = vmatmul.mubr.bf16.gmra.mxu0 %v6393_v43  ;;  %v2907_v43 = vpop.f32.mrf.mxu1 }
 0xc69   : > { %4889 = vmatpush3.bf16.msra.mxu0 %v6564_v58 }
 0xc6a   : > { %4890 = vmatprep.subr.bf16.mxu0 %v6570_v14  ;;  %v5161_v2 = vpop.f32.mrf.mxu1 }
 0xc6b   : > { %v3007_v18 = vpack.c.bf16 %v5161_v2, %v5160_v0 }
 0xc6c   : > { %v2910_v51 = vpop.f32.mrf.mxu1 }
 0xc6d   : > { %4891 = vmatpush3.bf16.msra.mxu0 %v6576_v10 }
 0xc6e   : > { %4892 = vmatprep.subr.bf16.mxu0 %v6582_v36  ;;  %v5164_v15 = vpop.f32.mrf.mxu1 }
 0xc70   : > { %v2923_v37 = vpop.f32.mrf.mxu1 }
 0xc71   : > { %4893 = vmatpush3.bf16.msra.mxu0 %v6588_v12 }
 0xc72   : > { %4894 = vmatprep.subr.bf16.mxu0 %v6597_v35  ;;  %v5165_v32 = vpop.f32.mrf.mxu1 }
 0xc73   : > { %v3009_v44 = vpack.c.bf16 %v5165_v32, %v5164_v15 }
 0xc74   : > { %v2926_v20 = vpop.f32.mrf.mxu1 }
 0xc75   : > { %4895 = vmatpush3.bf16.msra.mxu0 %v6603_v3  ;;  %v3025_v56 = vmul.bf16 %v6540_v61, %v3009_v44  ;;  %v3008_v47 = vpack.c.bf16 %v2926_v20, %v2923_v37  ;;  %v3006_v61 = vpack.c.bf16 %v2910_v51, %v2907_v43 }
 0xc76   : > { %4896 = vmatprep.subr.bf16.mxu0 %v6612_v5  ;;  %v5168_v62 = vpop.f32.mrf.mxu1 }
 0xc77   : > { %v3024_v6 = vmul.bf16 %v6552_v49, %v3008_v47 }
 0xc78   : > { %v2939_v24 = vpop.f32.mrf.mxu1 }
 0xc79   : > { %4897 = vmatpush3.bf16.msra.mxu0 %v6618_v16 }
 0xc7a   : > { %4898 = vmatprep.subr.bf16.mxu0 %v6627_v54  ;;  %v5169_v28 = vpop.f32.mrf.mxu1 }
 0xc7c   : > { %v2942_v25 = vpop.f32.mrf.mxu1 }
 0xc7d   : > { %4899 = vmatpush3.bf16.msra.mxu0 %v6636_v22 }
 0xc7e   : > { %v5172_v19 = vpop.f32.mrf.mxu1 }
 0xc80   : > { %v2955_v17 = vpop.f32.mrf.mxu1 }
 0xc82   : > { %v5173_v46 = vpop.f32.mrf.mxu1 }
 0xc83   : > { %v3013_v37 = vpack.c.bf16 %v5173_v46, %v5172_v19 }
 0xc84   : > { %v2958_v57 = vpop.f32.mrf.mxu1 }
 0xc86   : > { %v5176_v27 = vpop.f32.mrf.mxu1 }
 0xc88   : > { %v2971_v55 = vpop.f32.mrf.mxu1 }
 0xc8a   : > { %v5177_v23 = vpop.f32.mrf.mxu1 }
 0xc8b   : > { %v3015_v7 = vpack.c.bf16 %v5177_v23, %v5176_v27 }
 0xc8c   : > { %v2974_v26 = vpop.f32.mrf.mxu1 }
 0xc8d   : > { %v3031_v15 = vmul.bf16 %v6558_v34, %v3015_v7  ;;  %v3014_v32 = vpack.c.bf16 %v2974_v26, %v2971_v55  ;;  %v6852_v7 = vpack.c.bf16 %v6511_v21, %v6507_v13  ;;  %v3010_v34 = vpack.c.bf16 %v2942_v25, %v2939_v24 }
 0xc8e   : > { %v5180_v29 = vpop.f32.mrf.mxu1  ;;  %v6854_v13 = vpack.c.bf16 %v6495_v1, %v6485_v30 }
 0xc8f   : > { %v3030_v20 = vmul.bf16 %v6570_v14, %v3014_v32  ;;  %v6855_v14 = vpack.c.bf16 %v6503_v9, %v6489_v41 }
 0xc90   : > { %v2987_v39 = vpop.f32.mrf.mxu1  ;;  %v3019_v21 = vmul.bf16 %v6618_v16, %v6854_v13  ;;  %v5415_v13 = vld [vmem:[#allocation9 + $0x60] sm:$0xff]  }
 0xc92   : > { %v5181_v33 = vpop.f32.mrf.mxu1 }
 0xc93   : > { %v3017_v31 = vpack.c.bf16 %v5181_v33, %v5180_v29  ;;  %v3023_v29 = vmul.bf16 %v6564_v58, %v3007_v18  ;;  %v3011_v18 = vpack.c.bf16 %v5169_v28, %v5168_v62  ;;  %v3026_v58 = vmul.bf16 %v6627_v54, %v3010_v34  ;;  %v5414_v34 = vld [vmem:[#allocation9 + $0x68] sm:$0xff]  }
 0xc94   : > { %v2990_v4 = vpop.f32.mrf.mxu1 }
 0xc95   : > { %v3033_v8 = vmul.bf16 %v6534_v40, %v3017_v31  ;;  %v3016_v11 = vpack.c.bf16 %v2990_v4, %v2987_v39  ;;  %v3022_v4 = vmul.bf16 %v6576_v10, %v3006_v61  ;;  %v6853_v40 = vpack.c.bf16 %v6515_v38, %v6509_v48 }
 0xc96   : > { %v3027_v49 = vmul.bf16 %v6612_v5, %v3011_v18  ;;  %v3018_v48 = vmul.bf16 %v6636_v22, %v6855_v14  ;;  %v5418_v14 = vld [vmem:[#allocation9 + $0x48] sm:$0xff]  }
 0xc97   : > { %v3032_v63 = vmul.bf16 %v6546_v45, %v3016_v11  ;;  %4856 = vmatprep.subr.bf16.mxu1 %v3033_v8  ;;  %v3029_v8 = vmul.bf16 %v6582_v36, %v3013_v37  ;;  %v3012_v11 = vpack.c.bf16 %v2958_v57, %v2955_v17  ;;  %v3020_v45 = vmul.bf16 %v6603_v3, %v6853_v40 }
 0xc98   : > { %4857 = vmatpush3.bf16.msra.mxu1 %v3025_v56 }
 0xc99   : > { %4858 = vmatprep.subr.bf16.mxu1 %v3032_v63  ;;  %v3021_v63 = vmul.bf16 %v6588_v12, %v6852_v7 }
 0xc9c   : > { %4859 = vmatpush3.bf16.msra.mxu1 %v3024_v6  ;;  %v3028_v6 = vmul.bf16 %v6597_v35, %v3012_v11 }
 0xc9d   : > { %4860 = vmatprep.subr.bf16.mxu1 %v3031_v15 }
 0xca0   : > { %4861 = vmatpush3.bf16.msra.mxu1 %v3023_v29 }
 0xca1   : > { %4862 = vmatprep.subr.bf16.mxu1 %v3030_v20 }
 0xca4   : > { %4863 = vmatpush3.bf16.msra.mxu1 %v3022_v4 }
 0xca5   : > { %4864 = vmatprep.subr.bf16.mxu1 %v3029_v8 }
 0xca8   : > { %4865 = vmatpush3.bf16.msra.mxu1 %v3021_v63 }
 0xca9   : > { %4866 = vmatprep.subr.bf16.mxu1 %v3028_v6 }
 0xcac   : > { %4867 = vmatpush3.bf16.msra.mxu1 %v3020_v45  ;;  %v5412_v45 = vld [vmem:[#allocation9 + $0x78] sm:$0xff]  }
 0xcad   : > { %4868 = vmatprep.subr.bf16.mxu1 %v3027_v49  ;;  %v5413_v49 = vld [vmem:[#allocation9 + $0x70] sm:$0xff]  }
 0xcb0   : > { %4869 = vmatpush3.bf16.msra.mxu1 %v3019_v21  ;;  %v5416_v21 = vld [vmem:[#allocation9 + $0x58] sm:$0xff]  }
 0xcb1   : > { %4870 = vmatprep.subr.bf16.mxu1 %v3026_v58  ;;  %v5417_v58 = vld [vmem:[#allocation9 + $0x50] sm:$0xff]  }
 0xcb4   : > { %4871 = vmatpush3.bf16.msra.mxu1 %v3018_v48  ;;  %v5419_v48 = vld [vmem:[#allocation9 + $0x40] sm:$0xff]  }
 0xcb5   : > { %5182 = vmatprep.subr.bf16.mxu1 %v5412_v45 }
 0xd20   : > { %v3068_v38 = vpop.f32.mrf.mxu0 }
 0xd21   : > { %v3069_v36 = vadd.f32 %v3068_v38, %v6268_v50 }
 0xd22   : > { %v3070_v10 = vpop.f32.mrf.mxu0 }
 0xd23   : > { %v3071_v30 = vadd.f32 %v3070_v10, %v6270_v52 }
 0xd24   : > { %v3072_v1 = vpop.f32.mrf.mxu0 }
 0xd25   : > { %v3087_v12 = vmax.f32 %v3069_v36, %v3071_v30  ;;  %v3073_v3 = vadd.f32 %v3072_v1, %v6268_v50 }
 0xd26   : > { %v3074_v35 = vpop.f32.mrf.mxu0 }
 0xd27   : > { %v3075_v5 = vadd.f32 %v3074_v35, %v6270_v52  ;;  %3088 = vmax.xlane.f32.xlu0 %v3087_v12 }
 0xd28   : > { %v3078_v41 = vpop.f32.mrf.mxu0 }
 0xd29   : > { %v3090_v9 = vmax.f32 %v3073_v3, %v3075_v5  ;;  %v3079_v54 = vadd.f32 %v3078_v41, %v6268_v50 }
 0xd2a   : > { %v3080_v16 = vpop.f32.mrf.mxu0 }
 0xd2b   : > { %v3081_v22 = vadd.f32 %v3080_v16, %v6270_v52  ;;  %3091 = vmax.xlane.f32.xlu1 %v3090_v9 }
 0xd2c   : > { %v3082_v0 = vpop.f32.mrf.mxu0 }
 0xd2d   : > { %v3093_v43 = vmax.f32 %v3079_v54, %v3081_v22  ;;  %v3083_v51 = vadd.f32 %v3082_v0, %v6268_v50 }
 0xd2e   : > { %v3084_v2 = vpop.f32.mrf.mxu0 }
 0xd2f   : > { %v3085_v62 = vadd.f32 %v3084_v2, %v6270_v52  ;;  %3094 = vmax.xlane.f32.xlu0 %v3093_v43 }
 0xd31   : > { %v3096_v24 = vmax.f32 %v3083_v51, %v3085_v62 }
 0xd33   : > { %3097 = vmax.xlane.f32.xlu1 %v3096_v24 }
 0xdb0   : > { %v3089_v28 = vpop.xlane.xlu0 %3088 }
 0xdb1   : > { %v3099_v25 = vsub.f32 %v3069_v36, %v3089_v28  ;;  %v3100_v19 = vsub.f32 %v3071_v30, %v3089_v28 }
 0xdb3   : > { %v3107_v17 = vmul.f32 1.442695, %v3099_v25  ;;  %v3109_v46 = vmul.f32 1.442695, %v3100_v19 }
 0xdb4   : > { %v3092_v57 = vpop.xlane.xlu1 %3091 }
 0xdb5   : > { %v3101_v27 = vsub.f32 %v3073_v3, %v3092_v57  ;;  %v3102_v55 = vsub.f32 %v3075_v5, %v3092_v57  ;;  %5540 = vpow2.f32 %v3107_v17 }
 0xdb6   : > { %5542 = vpow2.f32 %v3109_v46 }
 0xdb7   : > { %v3111_v23 = vmul.f32 1.442695, %v3101_v27  ;;  %v3113_v26 = vmul.f32 1.442695, %v3102_v55 }
 0xdb8   : > { %v3095_v44 = vpop.xlane.xlu0 %3094 }
 0xdb9   : > { %5544 = vpow2.f32 %v3111_v23  ;;  %v3103_v50 = vsub.f32 %v3079_v54, %v3095_v44  ;;  %v3104_v39 = vsub.f32 %v3081_v22, %v3095_v44 }
 0xdba   : > { %5546 = vpow2.f32 %v3113_v26 }
 0xdbb   : > { %v3115_v52 = vmul.f32 1.442695, %v3103_v50  ;;  %v3117_v33 = vmul.f32 1.442695, %v3104_v39 }
 0xdbc   : > { %v3098_v31 = vpop.xlane.xlu1 %3097 }
 0xdbd   : > { %v3105_v56 = vsub.f32 %v3083_v51, %v3098_v31  ;;  %v3106_v47 = vsub.f32 %v3085_v62, %v3098_v31  ;;  %5548 = vpow2.f32 %v3115_v52 }
 0xdbe   : > { %5550 = vpow2.f32 %v3117_v33 }
 0xdbf   : > { %v3119_v15 = vmul.f32 1.442695, %v3105_v56  ;;  %v3121_v32 = vmul.f32 1.442695, %v3106_v47 }
 0xdc1   : > { %5552 = vpow2.f32 %v3119_v15 }
 0xdc2   : > { %5554 = vpow2.f32 %v3121_v32  ;;  %v5541_v29 = vpop.eup %5540  ;;  %v4515_v32 = vld [vmem:[%s6798_s11 + $0x1] ss:$0 sm:$0xff] }
 0xdc3   : > { %v5543_v61 = vpop.eup %5542 }
 0xdc6   : > { %v5545_v37 = vpop.eup %5544 }
 0xdc7   : > { %v5547_v20 = vpop.eup %5546  ;;  %v3123_v4 = vpack.c.bf16 %v5545_v37, %v5541_v29 }
 0xdc8   : > { %v3124_v8 = vpack.c.bf16 %v5547_v20, %v5543_v61 }
 0xdca   : > { %3159 = vmatprep.mubr.bf16.mxu1 %v3124_v8  ;;  %3208 = vmatprep.mubr.bf16.mxu0 %v3124_v8  ;;  %v5549_v11 = vpop.eup %5548 }
 0xdcb   : > { %3160 = vmatmul.mubr.bf16.vlgmr.msra.gmra.mxu1 %v3123_v4  ;;  %3209 = vmatmul.mubr.bf16.vlgmr.msra.gmra.mxu0 %v3123_v4  ;;  %v5551_v7 = vpop.eup %5550 }
 0xdcc   : > { %5183 = vmatpush3.bf16.msra.mxu1 %v5412_v45  ;;  %v5420_v45 = vld [vmem:[#allocation10 + $0x1e0] ss:$16 sps:$4 sm:$0xff]  }
 0xdcd   : > { %5184 = vmatprep.subr.bf16.mxu1 %v5413_v49 }
 0xdce   : > { %v5553_v63 = vpop.eup %5552 }
 0xdcf   : > { %v5555_v18 = vpop.eup %5554  ;;  %v3125_v6 = vpack.c.bf16 %v5553_v63, %v5549_v11 }
 0xdd0   : > { %v3126_v40 = vpack.c.bf16 %v5555_v18, %v5551_v7  ;;  %5185 = vmatpush3.bf16.msra.mxu1 %v5413_v49  ;;  %v5422_v49 = vld [vmem:[#allocation10 + $0x1e4] ss:$16 sps:$4 sm:$0xff]  }
 0xdd1   : > { %5186 = vmatprep.subr.bf16.mxu1 %v5414_v34  ;;  %3541 = vmatprep.subr.bf16.mxu0 %v5422_v49  ;;  %v4526_v49 = vld [vmem:[%s6799_s12 + $0x1] ss:$0 sm:$0xff] }
 0xdd2   : > { %3167 = vmatprep.mubr.bf16.mxu1 %v3126_v40  ;;  %3216 = vmatprep.mubr.bf16.mxu0 %v3126_v40 }
 0xdd3   : > { %3168 = vmatmul.mubr.bf16.gmra.mxu1 %v3125_v6  ;;  %3217 = vmatmul.mubr.bf16.gmra.mxu0 %v3125_v6  ;;  %v6856_v6 = vld [vmem:[#allocation27_spill] sm:$0xff] }
 0xdd4   : > { %3573 = vmatprep.mubr.bf16.mxu0 %v6847_v53  ;;  %5187 = vmatpush3.bf16.msra.mxu1 %v5414_v34  ;;  %v5423_v34 = vld [vmem:[#allocation10 + $0x1e8] ss:$16 sps:$4 sm:$0xff]  }
 0xdd5   : > { %5188 = vmatprep.subr.bf16.mxu1 %v5415_v13  ;;  %3542 = vmatpush1.bf16.msra.mxu0 %v5420_v45 }
 0xdd8   : > { %5189 = vmatpush3.bf16.msra.mxu1 %v5415_v13  ;;  %v5425_v13 = vld [vmem:[#allocation10 + $0x1ec] ss:$16 sps:$4 sm:$0xff]  }
 0xdd9   : > { %5190 = vmatprep.subr.bf16.mxu1 %v5416_v21 }
 0xddc   : > { %5191 = vmatpush3.bf16.msra.mxu1 %v5416_v21 }
 0xddd   : > { %5192 = vmatprep.subr.bf16.mxu1 %v5417_v58 }
 0xde0   : > { %5193 = vmatpush3.bf16.msra.mxu1 %v5417_v58 }
 0xde1   : > { %5194 = vmatprep.subr.bf16.mxu1 %v5418_v14 }
 0xde4   : > { %5195 = vmatpush3.bf16.msra.mxu1 %v5418_v14 }
 0xde5   : > { %5196 = vmatprep.subr.bf16.mxu1 %v5419_v48 }
 0xde8   : > { %5197 = vmatpush3.bf16.msra.mxu1 %v5419_v48 }
 0xde9   : > { %3747 = vmatprep.subr.bf16.mxu1 %v5425_v13 }
 0xe8b   : > { %v4872_v38 = vpop.f32.mrf.mxu1  ;;  %v4900_v10 = vpop.f32.mrf.mxu0 }
 0xe8d   : > { %v4901_v36 = vpop.f32.mrf.mxu0  ;;  %v4873_v1 = vpop.f32.mrf.mxu1 }
 0xe8e   : > { %v4902_v30 = vadd.f32 %v4901_v36, %v4900_v10  ;;  %v4874_v17 = vadd.f32 %v4873_v1, %v4872_v38 }
 0xe8f   : > { %v4903_v12 = vpop.f32.mrf.mxu0  ;;  %v4875_v41 = vpop.f32.mrf.mxu1 }
 0xe90   : > { %v3211_v35 = vadd.f32 1e-30, %v4902_v30 }
 0xe91   : > { %v4904_v3 = vpop.f32.mrf.mxu0  ;;  %v4876_v0 = vpop.f32.mrf.mxu1 }
 0xe92   : > { %v4905_v5 = vadd.f32 %v4904_v3, %v4903_v12  ;;  %5556 = vrcp.f32 %v3211_v35  ;;  %v4877_v46 = vadd.f32 %v4876_v0, %v4875_v41  ;;  %v5428_v41 = vld [vmem:[#allocation10 + $0x1c4] ss:$16 sps:$4 sm:$0xff]   ;;  %v5437_v0 = vld [vmem:[#allocation10 + $0x1ac] ss:$16 sps:$4 sm:$0xff]  }
 0xe93   : > { %v4906_v9 = vpop.f32.mrf.mxu0  ;;  %v4878_v24 = vpop.f32.mrf.mxu1  ;;  %3543 = vmatprep.subr.bf16.mxu0 %v5428_v41  ;;  %v5473_v41 = vld [vmem:[#allocation12 + $0x170] sm:$0xff]  }
 0xe94   : > { %v3214_v16 = vadd.f32 1e-30, %v4905_v5 }
 0xe95   : > { %v4907_v54 = vpop.f32.mrf.mxu0  ;;  %v4879_v25 = vpop.f32.mrf.mxu1 }
 0xe96   : > { %5558 = vrcp.f32 %v3214_v16  ;;  %v4908_v22 = vadd.f32 %v4907_v54, %v4906_v9  ;;  %v4880_v39 = vadd.f32 %v4879_v25, %v4878_v24  ;;  %v5431_v9 = vld [vmem:[#allocation10 + $0x1cc] ss:$16 sps:$4 sm:$0xff]   ;;  %v5426_v16 = vld [vmem:[#allocation10 + $0x1c0] ss:$16 sps:$4 sm:$0xff]   ;;  %v5429_v54 = vld [vmem:[#allocation10 + $0x1c8] ss:$16 sps:$4 sm:$0xff]  }
 0xe97   : > { %v4909_v43 = vpop.f32.mrf.mxu0  ;;  %v4881_v27 = vpop.f32.mrf.mxu1  ;;  %3544 = vmatpush1.bf16.msra.mxu0 %v5426_v16  ;;  %v5438_v24 = vld [vmem:[#allocation10 + $0x180] ss:$16 sps:$4 sm:$0xff]   ;;  %v5446_v25 = vld [vmem:[#allocation10 + $0x164] ss:$16 sps:$4 sm:$0xff]  }
 0xe98   : > { %v3219_v2 = vadd.f32 1e-30, %v4908_v22  ;;  %v5434_v22 = vld [vmem:[#allocation10 + $0x1a4] ss:$16 sps:$4 sm:$0xff]  }
 0xe99   : > { %v4910_v51 = vpop.f32.mrf.mxu0  ;;  %v4882_v44 = vpop.f32.mrf.mxu1  ;;  %3545 = vmatprep.subr.bf16.mxu0 %v5434_v22  ;;  %v5477_v22 = vld [vmem:[#allocation12 + $0x168] sm:$0xff]  }
 0xe9a   : > { %v4911_v62 = vadd.f32 %v4910_v51, %v4909_v43  ;;  %5560 = vrcp.f32 %v3219_v2  ;;  %v4883_v52 = vadd.f32 %v4882_v44, %v4881_v27  ;;  %v5432_v43 = vld [vmem:[#allocation10 + $0x1a0] ss:$16 sps:$4 sm:$0xff]   ;;  %v5435_v2 = vld [vmem:[#allocation10 + $0x1a8] ss:$16 sps:$4 sm:$0xff]   ;;  %v5440_v51 = vld [vmem:[#allocation10 + $0x184] ss:$16 sps:$4 sm:$0xff]  }
 0xe9b   : > { %3546 = vmatpush1.bf16.msra.mxu0 %v5432_v43  ;;  %v5455_v27 = vld [vmem:[#allocation10 + $0x14c] ss:$16 sps:$4 sm:$0xff]  }
 0xe9c   : > { %v3222_v28 = vadd.f32 1e-30, %v4911_v62  ;;  %v5443_v62 = vld [vmem:[#allocation10 + $0x18c] ss:$16 sps:$4 sm:$0xff]   ;;  %3547 = vmatprep.subr.bf16.mxu0 %v5440_v51 }
 0xe9d   : > { %v5461_v44 = vld [vmem:[#allocation10 + $0x12c] ss:$16 sps:$4 sm:$0xff]  }
 0xe9e   : > { %5562 = vrcp.f32 %v3222_v28  ;;  %v5441_v28 = vld [vmem:[#allocation10 + $0x188] ss:$16 sps:$4 sm:$0xff]  }
 0xe9f   : > { %v5557_v19 = vpop.eup %5556  ;;  %3548 = vmatpush1.bf16.msra.mxu0 %v5438_v24  ;;  %v5479_v51 = vld [vmem:[#allocation12 + $0x128] sm:$0xff]   ;;  %v5482_v24 = vld [vmem:[#allocation12 + $0x1a0] sm:$0xff]  }
 0xea0   : > { %v3229_v55 = vmul.f32 %v5557_v19, %v4874_v17  ;;  %v5449_v19 = vld [vmem:[#allocation10 + $0x16c] ss:$16 sps:$4 sm:$0xff]   ;;  %v5444_v17 = vld [vmem:[#allocation10 + $0x160] ss:$16 sps:$4 sm:$0xff]   ;;  %3549 = vmatprep.subr.bf16.mxu0 %v5446_v25 }
 0xea1   : > { %v5484_v25 = vld [vmem:[#allocation12 + $0x1d8] sm:$0xff]  }
 0xea3   : > { %v5559_v57 = vpop.eup %5558  ;;  %3550 = vmatpush1.bf16.msra.mxu0 %v5444_v17  ;;  %v5486_v17 = vld [vmem:[#allocation12 + $0x198] sm:$0xff]  }
 0xea4   : > { %v3230_v23 = vmul.f32 %v5559_v57, %v4877_v46  ;;  %v5447_v46 = vld [vmem:[#allocation10 + $0x168] ss:$16 sps:$4 sm:$0xff]   ;;  %v5452_v57 = vld [vmem:[#allocation10 + $0x144] ss:$16 sps:$4 sm:$0xff]  }
 0xea5   : > { %3551 = vmatprep.subr.bf16.mxu0 %v5452_v57  ;;  %v5488_v57 = vld [vmem:[#allocation12 + $0x1d0] sm:$0xff]  }
 0xea6   : > { %v3233_v26 = vpack.c.bf16 %v3230_v23, %v3229_v55  ;;  %v5450_v55 = vld [vmem:[#allocation10 + $0x140] ss:$16 sps:$4 sm:$0xff]   ;;  %v5453_v23 = vld [vmem:[#allocation10 + $0x148] ss:$16 sps:$4 sm:$0xff]  }
 0xea7   : > { %v5561_v50 = vpop.eup %5560  ;;  %3552 = vmatpush1.bf16.msra.mxu0 %v5450_v55  ;;  %v5490_v55 = vld [vmem:[#allocation12 + $0x190] sm:$0xff]  }
 0xea8   : > { %5198 = vmatprep.mubr.bf16.mxu1 %v3233_v26  ;;  %v3231_v31 = vmul.f32 %v5561_v50, %v4880_v39  ;;  %v5458_v26 = vld [vmem:[#allocation10 + $0x124] ss:$16 sps:$4 sm:$0xff]   ;;  %v5456_v50 = vld [vmem:[#allocation10 + $0x120] ss:$16 sps:$4 sm:$0xff]   ;;  %v5459_v39 = vld [vmem:[#allocation10 + $0x128] ss:$16 sps:$4 sm:$0xff]  }
 0xea9   : > { %3553 = vmatprep.subr.bf16.mxu0 %v5458_v26  ;;  %v5492_v26 = vld [vmem:[#allocation12 + $0x1c8] sm:$0xff]  }
 0xeab   : > { %v5563_v33 = vpop.eup %5562  ;;  %3554 = vmatpush1.bf16.msra.mxu0 %v5456_v50  ;;  %v5494_v50 = vld [vmem:[#allocation12 + $0x188] sm:$0xff]  }
 0xeac   : > { %v3232_v56 = vmul.f32 %v5563_v33, %v4883_v52  ;;  %v5462_v52 = vld [vmem:[#allocation10 + $0x100] ss:$16 sps:$4 sm:$0xff]   ;;  %v5464_v33 = vld [vmem:[#allocation10 + $0x104] ss:$16 sps:$4 sm:$0xff]  }
 0xead   : > { %3555 = vmatprep.subr.bf16.mxu0 %v5464_v33  ;;  %v5497_v33 = vld [vmem:[#allocation12 + $0x140] sm:$0xff]  }
 0xeae   : > { %v3234_v47 = vpack.c.bf16 %v3232_v56, %v3231_v31  ;;  %v5465_v31 = vld [vmem:[#allocation10 + $0x108] ss:$16 sps:$4 sm:$0xff]   ;;  %v5467_v56 = vld [vmem:[#allocation10 + $0x10c] ss:$16 sps:$4 sm:$0xff]  }
 0xeaf   : > { %3556 = vmatpush1.bf16.msra.mxu0 %v5462_v52  ;;  %v5496_v52 = vld [vmem:[#allocation12 + $0x1c0] sm:$0xff]  }
 0xeb0   : > { %5199 = vmatmul.mubr.bf16.vlgmr.msra.gmra.mxu1 %v3234_v47  ;;  %v5468_v47 = vld [vmem:[#allocation12 + $0x1f8] sm:$0xff]  }
 0xeb1   : > { %3779 = vmatprep.mubr.bf16.mxu1 %v6847_v53  ;;  %3748 = vmatpush1.bf16.msra.mxu1 %v5423_v34 }
 0xeb2   : > { %3749 = vmatprep.subr.bf16.mxu1 %v5431_v9  ;;  %4922 = vmatprep.subr.bf16.mxu0 %v5468_v47  ;;  %v4528_v47 = vld [vmem:[%s6804_s17 + $0x4] sm:$0x3] }
 0xeb5   : > { %3750 = vmatpush1.bf16.msra.mxu1 %v5429_v54  ;;  %v5476_v54 = vld [vmem:[#allocation12 + $0x1e8] sm:$0xff]  }
 0xeb6   : > { %3751 = vmatprep.subr.bf16.mxu1 %v5437_v0 }
 0xeb9   : > { %3752 = vmatpush1.bf16.msra.mxu1 %v5435_v2  ;;  %v5478_v2 = vld [vmem:[#allocation12 + $0x1a8] sm:$0xff]  }
 0xeba   : > { %3753 = vmatprep.subr.bf16.mxu1 %v5443_v62  ;;  %v5481_v62 = vld [vmem:[#allocation12 + $0x160] sm:$0xff]  }
 0xebd   : > { %3754 = vmatpush1.bf16.msra.mxu1 %v5441_v28  ;;  %v5483_v28 = vld [vmem:[#allocation12 + $0x120] sm:$0xff]  }
 0xebe   : > { %3755 = vmatprep.subr.bf16.mxu1 %v5449_v19  ;;  %v5485_v19 = vld [vmem:[#allocation12 + $0x158] sm:$0xff]  }
 0xec1   : > { %3756 = vmatpush1.bf16.msra.mxu1 %v5447_v46  ;;  %v5487_v46 = vld [vmem:[#allocation12 + $0x118] sm:$0xff]  }
 0xec2   : > { %3757 = vmatprep.subr.bf16.mxu1 %v5455_v27  ;;  %v5489_v27 = vld [vmem:[#allocation12 + $0x150] sm:$0xff]  }
 0xec5   : > { %3758 = vmatpush1.bf16.msra.mxu1 %v5453_v23  ;;  %v5491_v23 = vld [vmem:[#allocation12 + $0x110] sm:$0xff]  }
 0xec6   : > { %3759 = vmatprep.subr.bf16.mxu1 %v5461_v44  ;;  %v5493_v44 = vld [vmem:[#allocation12 + $0x148] sm:$0xff]  }
 0xec9   : > { %3760 = vmatpush1.bf16.msra.mxu1 %v5459_v39  ;;  %v5495_v39 = vld [vmem:[#allocation12 + $0x108] sm:$0xff]  }
 0xeca   : > { %3761 = vmatprep.subr.bf16.mxu1 %v5467_v56  ;;  %v5499_v56 = vld [vmem:[#allocation12 + $0x100] sm:$0xff]  }
 0xecd   : > { %3762 = vmatpush1.bf16.msra.mxu1 %v5465_v31  ;;  %v5498_v31 = vld [vmem:[#allocation12 + $0x180] sm:$0xff]  }
 0xf70   : > { %v5200_v15 = vpop.f32.mrf.mxu1 }
 0xf71   : > { %v3351_v20 = vadd.f32 %v5200_v15, %v4515_v32  ;;  %v5469_v15 = vld [vmem:[#allocation12 + $0x178] sm:$0xff]  }
 0xf72   : > { %v3342_v29 = vpop.f32.mrf.mxu1  ;;  %4950 = vmatprep.subr.bf16.mxu1 %v5469_v15  ;;  %v4545_v15 = vld [vmem:[%s6804_s17 + $0x6] sm:$0x3] }
 0xf73   : > { %v3343_v61 = vadd.f32 %v4515_v32, %v3342_v29  ;;  %v3359_v18 = vadd.f32 %v3351_v20, %v6373_v59 }
 0xf74   : > { %v5201_v37 = vpop.f32.mrf.mxu1 }
 0xf75   : > { %v3357_v4 = vadd.f32 %v3343_v61, %v6364_v42  ;;  %v3354_v7 = vadd.f32 %v5201_v37, %v4515_v32 }
 0xf76   : > { %v3345_v8 = vpop.f32.mrf.mxu1 }
 0xf77   : > { %v3346_v11 = vadd.f32 %v4515_v32, %v3345_v8  ;;  %3365 = vadd.xlane.f32.xlu0 %v3357_v4  ;;  %v3360_v40 = vadd.f32 %v3354_v7, %v6856_v6 }
 0xf79   : > { %v3358_v63 = vadd.f32 %v3346_v11, %v6366_v60 }
 0xf7b   : > { %3367 = vadd.xlane.f32.xlu1 %v3358_v63  ;;  %3369 = vadd.xlane.f32.xlu0 %v3359_v18 }
 0xf7f   : > { %3371 = vadd.xlane.f32.xlu1 %v3360_v40 }
0x1000   : > { %v3366_v42 = vpop.xlane.xlu0 %3365 }
0x1001   : > { %v3373_v21 = vmul.f32 0.0078125, %v3366_v42 }
0x1003   : > { %v6706_v58 = vsub.f32 %v3357_v4, %v3373_v21 }
0x1004   : > { %v3368_v60 = vpop.xlane.xlu1 %3367  ;;  %v3370_v14 = vpop.xlane.xlu0 %3369 }
0x1005   : > { %v3374_v59 = vmul.f32 0.0078125, %v3368_v60  ;;  %v3375_v48 = vmul.f32 0.0078125, %v3370_v14  ;;  %v3381_v38 = vmul.f32 %v6706_v58, %v6706_v58  ;;  %v4527_v60 = vld [vmem:[%s6800_s13 + $0x1] ss:$0 sm:$0xff] }
0x1007   : > { %v6710_v10 = vsub.f32 %v3358_v63, %v3374_v59  ;;  %v6712_v36 = vsub.f32 %v3359_v18, %v3375_v48  ;;  %3385 = vadd.xlane.f32.xlu0 %v3381_v38 }
0x1008   : > { %v3372_v30 = vpop.xlane.xlu1 %3371 }
0x1009   : > { %v3376_v1 = vmul.f32 0.0078125, %v3372_v30  ;;  %v3382_v12 = vmul.f32 %v6710_v10, %v6710_v10  ;;  %v3383_v35 = vmul.f32 %v6712_v36, %v6712_v36 }
0x100b   : > { %v6718_v3 = vsub.f32 %v3360_v40, %v3376_v1  ;;  %3387 = vadd.xlane.f32.xlu1 %v3382_v12  ;;  %3389 = vadd.xlane.f32.xlu0 %v3383_v35  ;;  %v5471_v35 = vld [vmem:[#allocation12 + $0x138] sm:$0xff]  }
0x100d   : > { %v3384_v5 = vmul.f32 %v6718_v3, %v6718_v3 }
0x100f   : > { %3391 = vadd.xlane.f32.xlu1 %v3384_v5  ;;  %v5472_v5 = vld [vmem:[#allocation12 + $0x1f0] sm:$0xff]  }
0x1090   : > { %v3386_v32 = vpop.xlane.xlu0 %3385 }
0x1091   : > { %v3393_v29 = vmul.f32 0.0078125, %v3386_v32 }
0x1093   : > { %v3397_v61 = vadd.f32 1e-05, %v3393_v29 }
0x1094   : > { %v3388_v37 = vpop.xlane.xlu1 %3387  ;;  %v3390_v20 = vpop.xlane.xlu0 %3389 }
0x1095   : > { %5564 = vrsqrt.f32 %v3397_v61  ;;  %v3394_v4 = vmul.f32 0.0078125, %v3388_v37  ;;  %v3395_v8 = vmul.f32 0.0078125, %v3390_v20  ;;  %v6857_v61 = vld [vmem:[#allocation26_spill] sm:$0xff] }
0x1096   : > { %v3458_v37 = vrot.slane %v4528_v47, %v6857_v61  ;;  %v3664_v20 = vrot.slane %v4545_v15, %v6857_v61 }
0x1097   : > { %v3398_v11 = vadd.f32 1e-05, %v3394_v4  ;;  %v3399_v7 = vadd.f32 1e-05, %v3395_v8  ;;  %v6858_v4 = vld [vmem:[#allocation25_spill] sm:$0xff] }
0x1098   : > { %v3392_v63 = vpop.xlane.xlu1 %3391  ;;  %v3454_v8 = vrot.slane %v4528_v47, %v6858_v4 }
0x1099   : > { %5566 = vrsqrt.f32 %v3398_v11  ;;  %v3396_v18 = vmul.f32 0.0078125, %v3392_v63  ;;  %v3660_v11 = vrot.slane %v4545_v15, %v6858_v4 }
0x109a   : > { %5568 = vrsqrt.f32 %v3399_v7 }
0x109b   : > { %v3400_v6 = vadd.f32 1e-05, %v3396_v18 }
0x109d   : > { %5570 = vrsqrt.f32 %v3400_v6 }
0x10a2   : > { %v5565_v40 = vpop.eup %5564 }
0x10a3   : > { %v3405_v45 = vmul.f32 %v5565_v40, %v6706_v58 }
0x10a5   : > { %v3415_v13 = vmul.f32 %v4526_v49, %v3405_v45 }
0x10a6   : > { %v5567_v34 = vpop.eup %5566 }
0x10a7   : > { %v3406_v42 = vmul.f32 %v5567_v34, %v6710_v10  ;;  %v5569_v21 = vpop.eup %5568  ;;  %v6730_v48 = vadd.f32 %v4527_v60, %v3415_v13  ;;  %v5470_v10 = vld [vmem:[#allocation12 + $0x1b8] sm:$0xff]  }
0x10a8   : > { %v3407_v58 = vmul.f32 %v5569_v21, %v6712_v36  ;;  %v5474_v36 = vld [vmem:[#allocation12 + $0x1b0] sm:$0xff]  }
0x10a9   : > { %v3416_v14 = vmul.f32 %v4526_v49, %v3406_v42 }
0x10aa   : > { %v5571_v59 = vpop.eup %5570  ;;  %v3417_v9 = vmul.f32 %v4526_v49, %v3407_v58 }
0x10ab   : > { %v6732_v38 = vadd.f32 %v4527_v60, %v3416_v14  ;;  %v3408_v30 = vmul.f32 %v5571_v59, %v6718_v3  ;;  %v5475_v3 = vld [vmem:[#allocation12 + $0x130] sm:$0xff]  }
0x10ac   : > { %v6742_v0 = vadd.f32 %v4527_v60, %v3417_v9 }
0x10ad   : > { %v3429_v1 = vpack.c.bf16 %v6732_v38, %v6730_v48  ;;  %v3418_v12 = vmul.f32 %v4526_v49, %v3408_v30 }
0x10af   : > { %3574 = vmatmul.mubr.bf16.vlgmr.msra.gmra.mxu0 %v3429_v1  ;;  %3780 = vmatmul.mubr.bf16.vlgmr.msra.gmra.mxu1 %v3429_v1  ;;  %v6740_v16 = vadd.f32 %v4527_v60, %v3418_v12 }
0x10b0   : > { %3583 = vmatprep.mubr.bf16.mxu0 %v6847_v53  ;;  %3789 = vmatprep.mubr.bf16.mxu1 %v6847_v53  ;;  %v5480_v53 = vld [vmem:[#allocation12 + $0x1e0] sm:$0xff]  }
0x10b1   : > { %4923 = vmatpush3.bf16.msra.mxu0 %v5470_v10  ;;  %4951 = vmatpush3.bf16.msra.mxu1 %v5471_v35  ;;  %v3430_v43 = vpack.c.bf16 %v6740_v16, %v6742_v0 }
0x10b2   : > { %4924 = vmatprep.subr.bf16.mxu0 %v5472_v5  ;;  %4952 = vmatprep.subr.bf16.mxu1 %v5473_v41 }
0x10b5   : > { %4925 = vmatpush3.bf16.msra.mxu0 %v5474_v36  ;;  %4953 = vmatpush3.bf16.msra.mxu1 %v5475_v3 }
0x10b6   : > { %4926 = vmatprep.subr.bf16.mxu0 %v5476_v54  ;;  %4954 = vmatprep.subr.bf16.mxu1 %v5477_v22 }
0x10b7   : > { %3584 = vmatmul.mubr.bf16.gmra.mxu0 %v3430_v43  ;;  %3790 = vmatmul.mubr.bf16.gmra.mxu1 %v3430_v43 }
0x10b9   : > { %4927 = vmatpush3.bf16.msra.mxu0 %v5478_v2  ;;  %4955 = vmatpush3.bf16.msra.mxu1 %v5479_v51 }
0x10ba   : > { %4928 = vmatprep.subr.bf16.mxu0 %v5480_v53  ;;  %4956 = vmatprep.subr.bf16.mxu1 %v5481_v62 }
0x10bd   : > { %4929 = vmatpush3.bf16.msra.mxu0 %v5482_v24  ;;  %4957 = vmatpush3.bf16.msra.mxu1 %v5483_v28 }
0x10be   : > { %4930 = vmatprep.subr.bf16.mxu0 %v5484_v25  ;;  %4958 = vmatprep.subr.bf16.mxu1 %v5485_v19 }
0x10c1   : > { %4931 = vmatpush3.bf16.msra.mxu0 %v5486_v17  ;;  %4959 = vmatpush3.bf16.msra.mxu1 %v5487_v46 }
0x10c2   : > { %4932 = vmatprep.subr.bf16.mxu0 %v5488_v57  ;;  %4960 = vmatprep.subr.bf16.mxu1 %v5489_v27 }
0x10c5   : > { %4933 = vmatpush3.bf16.msra.mxu0 %v5490_v55  ;;  %4961 = vmatpush3.bf16.msra.mxu1 %v5491_v23 }
0x10c6   : > { %4934 = vmatprep.subr.bf16.mxu0 %v5492_v26  ;;  %4962 = vmatprep.subr.bf16.mxu1 %v5493_v44 }
0x10c9   : > { %4935 = vmatpush3.bf16.msra.mxu0 %v5494_v50  ;;  %4963 = vmatpush3.bf16.msra.mxu1 %v5495_v39 }
0x10ca   : > { %4936 = vmatprep.subr.bf16.mxu0 %v5496_v52  ;;  %4964 = vmatprep.subr.bf16.mxu1 %v5497_v33 }
0x10cd   : > { %4937 = vmatpush3.bf16.msra.mxu0 %v5498_v31  ;;  %4965 = vmatpush3.bf16.msra.mxu1 %v5499_v56 }
0x116f   : > { %v3575_v32 = vpop.f32.mrf.mxu0  ;;  %v3781_v29 = vpop.f32.mrf.mxu1 }
0x1170   : > { %v3576_v13 = vadd.f32 %v3575_v32, %v3454_v8  ;;  %v3782_v42 = vadd.f32 %v3781_v29, %v3660_v11 }
0x1171   : > { %v3577_v7 = vpop.f32.mrf.mxu0  ;;  %v3783_v63 = vpop.f32.mrf.mxu1 }
0x1172   : > { %v3578_v40 = vadd.f32 %v3577_v7, %v3458_v37  ;;  %v3784_v45 = vadd.f32 %v3783_v63, %v3664_v20  ;;  %v3594_v9 = vmax.f32 %v3576_v13, 0.0  ;;  %v3800_v36 = vmax.f32 %v3782_v42, 0.0 }
0x1173   : > { %v3579_v18 = vpop.f32.mrf.mxu0  ;;  %v3785_v6 = vpop.f32.mrf.mxu1 }
0x1174   : > { %v3580_v49 = vadd.f32 %v3579_v18, %v3454_v8  ;;  %v3786_v34 = vadd.f32 %v3785_v6, %v3660_v11  ;;  %v3595_v10 = vmax.f32 %v3578_v40, 0.0  ;;  %v3801_v35 = vmax.f32 %v3784_v45, 0.0  ;;  %v4594_v45 = vld [vmem:[#allocation13 + $0x1] ss:$0 sm:$0xff] }
0x1175   : > { %v3581_v21 = vpop.f32.mrf.mxu0  ;;  %v3787_v60 = vpop.f32.mrf.mxu1 }
0x1176   : > { %v3582_v14 = vadd.f32 %v3581_v21, %v3458_v37  ;;  %v3788_v59 = vadd.f32 %v3787_v60, %v3664_v20  ;;  %v3596_v58 = vmax.f32 %v3580_v49, 0.0  ;;  %v3802_v30 = vmax.f32 %v3786_v34, 0.0 }
0x1177   : > { %v3585_v1 = vpop.f32.mrf.mxu0  ;;  %v3791_v12 = vpop.f32.mrf.mxu1 }
0x1178   : > { %v3597_v5 = vmax.f32 %v3582_v14, 0.0  ;;  %v3803_v41 = vmax.f32 %v3788_v59, 0.0  ;;  %v3602_v2 = vpack.c.bf16 %v3596_v58, %v3594_v9  ;;  %v3808_v51 = vpack.c.bf16 %v3802_v30, %v3800_v36 }
0x1179   : > { %v3587_v3 = vpop.f32.mrf.mxu0  ;;  %v3793_v54 = vpop.f32.mrf.mxu1  ;;  %v3586_v17 = vadd.f32 %v3585_v1, %v3454_v8  ;;  %v3792_v46 = vadd.f32 %v3791_v12, %v3660_v11 }
0x117a   : > { %v3603_v22 = vpack.c.bf16 %v3597_v5, %v3595_v10  ;;  %v3809_v43 = vpack.c.bf16 %v3803_v41, %v3801_v35  ;;  %v3588_v53 = vadd.f32 %v3587_v3, %v3458_v37  ;;  %v3794_v28 = vadd.f32 %v3793_v54, %v3664_v20 }
0x117b   : > { %v3589_v62 = vpop.f32.mrf.mxu0  ;;  %v3795_v24 = vpop.f32.mrf.mxu1  ;;  %v3598_v31 = vmax.f32 %v3586_v17, 0.0  ;;  %v3804_v56 = vmax.f32 %v3792_v46, 0.0 }
0x117c   : > { %v3590_v25 = vadd.f32 %v3589_v62, %v3454_v8  ;;  %v3796_v19 = vadd.f32 %v3795_v24, %v3660_v11  ;;  %3972 = vmatprep.mubr.bf16.mxu0 %v3809_v43  ;;  %4117 = vmatprep.mubr.bf16.mxu1 %v3603_v22  ;;  %v3599_v50 = vmax.f32 %v3588_v53, 0.0  ;;  %v3805_v39 = vmax.f32 %v3794_v28, 0.0 }
0x117d   : > { %v3591_v57 = vpop.f32.mrf.mxu0  ;;  %v3797_v27 = vpop.f32.mrf.mxu1  ;;  %3973 = vmatmul.mubr.bf16.vlgmr.msra.gmra.mxu0 %v3808_v51  ;;  %4118 = vmatmul.mubr.bf16.vlgmr.msra.gmra.mxu1 %v3602_v2 }
0x117e   : > { %v3592_v55 = vadd.f32 %v3591_v57, %v3458_v37  ;;  %v3798_v23 = vadd.f32 %v3797_v27, %v3664_v20  ;;  %v3600_v26 = vmax.f32 %v3590_v25, 0.0  ;;  %v3806_v44 = vmax.f32 %v3796_v19, 0.0 }
0x1180   : > { %v3601_v52 = vmax.f32 %v3592_v55, 0.0  ;;  %v3807_v33 = vmax.f32 %v3798_v23, 0.0  ;;  %v3604_v32 = vpack.c.bf16 %v3600_v26, %v3598_v31  ;;  %v3810_v29 = vpack.c.bf16 %v3806_v44, %v3804_v56 }
0x1182   : > { %v3605_v47 = vpack.c.bf16 %v3601_v52, %v3599_v50  ;;  %v3811_v15 = vpack.c.bf16 %v3807_v33, %v3805_v39 }
0x1184   : > { %3980 = vmatprep.mubr.bf16.mxu0 %v3811_v15  ;;  %4125 = vmatprep.mubr.bf16.mxu1 %v3605_v47 }
0x1185   : > { %3981 = vmatmul.mubr.bf16.gmra.mxu0 %v3810_v29  ;;  %4126 = vmatmul.mubr.bf16.gmra.mxu1 %v3604_v32 }
0x123d   : > { %v4938_v61 = vpop.f32.mrf.mxu0  ;;  %v4966_v4 = vpop.f32.mrf.mxu1 }
0x123f   : > { %v4939_v37 = vpop.f32.mrf.mxu0  ;;  %v4967_v20 = vpop.f32.mrf.mxu1 }
0x1240   : > { %v4940_v8 = vadd.f32 %v4939_v37, %v4938_v61  ;;  %v4968_v11 = vadd.f32 %v4967_v20, %v4966_v4  ;;  %v4597_v37 = vld [vmem:[%s6801_s14 + $0x1] ss:$0 sm:$0xff] }
0x1241   : > { %v4941_v7 = vpop.f32.mrf.mxu0  ;;  %v4969_v63 = vpop.f32.mrf.mxu1 }
0x1242   : > { %v4120_v18 = vadd.f32 %v4968_v11, %v4940_v8  ;;  %v4598_v8 = vld [vmem:[%s6802_s15 + $0x1] ss:$0 sm:$0xff] }
0x1243   : > { %v4942_v6 = vpop.f32.mrf.mxu0  ;;  %v4970_v40 = vpop.f32.mrf.mxu1 }
0x1244   : > { %v4943_v49 = vadd.f32 %v4942_v6, %v4941_v7  ;;  %v4971_v34 = vadd.f32 %v4970_v40, %v4969_v63  ;;  %v4134_v13 = vadd.f32 %v4120_v18, %v6730_v48  ;;  %v4599_v63 = vld [vmem:[#allocation5] ss:$0 sm:$0xff] }
0x1245   : > { %v4944_v42 = vpop.f32.mrf.mxu0  ;;  %v4972_v21 = vpop.f32.mrf.mxu1 }
0x1246   : > { %v4123_v60 = vadd.f32 %v4971_v34, %v4943_v49  ;;  %v4146_v14 = vadd.f32 %v4594_v45, %v4134_v13 }
0x1247   : > { %v4945_v59 = vpop.f32.mrf.mxu0  ;;  %v4973_v58 = vpop.f32.mrf.mxu1 }
0x1248   : > { %v4946_v30 = vadd.f32 %v4945_v59, %v4944_v42  ;;  %v4974_v1 = vadd.f32 %v4973_v58, %v4972_v21  ;;  %4154 = vadd.xlane.f32.xlu0 %v4146_v14  ;;  %v4135_v12 = vadd.f32 %v4123_v60, %v6732_v38 }
0x1249   : > { %v4947_v10 = vpop.f32.mrf.mxu0  ;;  %v4975_v35 = vpop.f32.mrf.mxu1 }
0x124a   : > { %v4128_v5 = vadd.f32 %v4974_v1, %v4946_v30  ;;  %v4147_v41 = vadd.f32 %v4594_v45, %v4135_v12 }
0x124b   : > { %v4948_v9 = vpop.f32.mrf.mxu0  ;;  %v4976_v36 = vpop.f32.mrf.mxu1 }
0x124c   : > { %v4949_v3 = vadd.f32 %v4948_v9, %v4947_v10  ;;  %v4977_v54 = vadd.f32 %v4976_v36, %v4975_v35  ;;  %4156 = vadd.xlane.f32.xlu1 %v4147_v41  ;;  %v4136_v48 = vadd.f32 %v4128_v5, %v6742_v0  ;;  %v4238_v10 = vstv %s4600_s30  ;;  %v6859_v5 = vld [vmem:[#allocation22_spill] sm:$0xff]  ;;  %v6860_v9 = vld [vmem:[#allocation21_spill] sm:$0xff]  ;;  %v6861_v36 = vld [vmem:[#allocation23_spill] sm:$0xff] }
0x124d   : > { %vm4240_vm3 = vcmp.eq.s32.totalorder %v6859_v5, %v4238_v10  ;;  %vm4239_vm4 = vcmp.eq.s32.totalorder %v6860_v9, %v4238_v10  ;;  %vm4241_vm5 = vcmp.eq.s32.totalorder %v6861_v36, %v4238_v10 }
0x124e   : > { %v4131_v22 = vadd.f32 %v4977_v54, %v4949_v3  ;;  %v4148_v43 = vadd.f32 %v4594_v45, %v4136_v48 }
0x1250   : > { %4158 = vadd.xlane.f32.xlu0 %v4148_v43  ;;  %v4137_v2 = vadd.f32 %v4131_v22, %v6740_v16 }
0x1252   : > { %v4149_v51 = vadd.f32 %v4594_v45, %v4137_v2  ;;  %v6862_v2 = vld [vmem:[#allocation24_spill] sm:$0xff] }
0x1253   : > { %vm4242_vm6 = vcmp.eq.s32.totalorder %v6862_v2, %v4238_v10 }
0x1254   : > { %4160 = vadd.xlane.f32.xlu1 %v4149_v51 }
0x12d1   : > { %v4155_v53 = vpop.xlane.xlu0 %4154 }
0x12d2   : > { %v4162_v38 = vmul.f32 0.0078125, %v4155_v53 }
0x12d4   : > { %v4166_v62 = vsub.f32 %v4146_v14, %v4162_v38 }
0x12d5   : > { %v4157_v24 = vpop.xlane.xlu1 %4156 }
0x12d6   : > { %v4163_v28 = vmul.f32 0.0078125, %v4157_v24  ;;  %v4170_v25 = vmul.f32 %v4166_v62, %v4166_v62 }
0x12d8   : > { %v4167_v19 = vsub.f32 %v4147_v41, %v4163_v28  ;;  %4174 = vadd.xlane.f32.xlu0 %v4170_v25 }
0x12d9   : > { %v4159_v17 = vpop.xlane.xlu0 %4158 }
0x12da   : > { %v4164_v46 = vmul.f32 0.0078125, %v4159_v17  ;;  %v4171_v57 = vmul.f32 %v4167_v19, %v4167_v19 }
0x12dc   : > { %v4168_v27 = vsub.f32 %v4148_v43, %v4164_v46  ;;  %4176 = vadd.xlane.f32.xlu1 %v4171_v57  ;;  %v4257_v46 = vstv %s4256_s1 }
0x12dd   : > { %v4161_v0 = vpop.xlane.xlu1 %4160 }
0x12de   : > { %v4165_v55 = vmul.f32 0.0078125, %v4161_v0  ;;  %v4172_v23 = vmul.f32 %v4168_v27, %v4168_v27 }
0x12e0   : > { %v4169_v26 = vsub.f32 %v4149_v51, %v4165_v55  ;;  %4178 = vadd.xlane.f32.xlu0 %v4172_v23 }
0x12e2   : > { %v4173_v16 = vmul.f32 %v4169_v26, %v4169_v26 }
0x12e4   : > { %4180 = vadd.xlane.f32.xlu1 %v4173_v16 }
0x1361   : > { %v4175_v44 = vpop.xlane.xlu0 %4174 }
0x1362   : > { %v4182_v50 = vmul.f32 0.0078125, %v4175_v44 }
0x1364   : > { %v4186_v39 = vadd.f32 1e-05, %v4182_v50 }
0x1365   : > { %v4177_v52 = vpop.xlane.xlu1 %4176 }
0x1366   : > { %5572 = vrsqrt.f32 %v4186_v39  ;;  %v4183_v33 = vmul.f32 0.0078125, %v4177_v52 }
0x1368   : > { %v4187_v31 = vadd.f32 1e-05, %v4183_v33 }
0x1369   : > { %v4179_v56 = vpop.xlane.xlu0 %4178 }
0x136a   : > { %5574 = vrsqrt.f32 %v4187_v31  ;;  %v4184_v47 = vmul.f32 0.0078125, %v4179_v56 }
0x136c   : > { %v4188_v15 = vadd.f32 1e-05, %v4184_v47 }
0x136d   : > { %v4181_v32 = vpop.xlane.xlu1 %4180 }
0x136e   : > { %5576 = vrsqrt.f32 %v4188_v15  ;;  %v4185_v29 = vmul.f32 0.0078125, %v4181_v32 }
0x1370   : > { %v4189_v61 = vadd.f32 1e-05, %v4185_v29 }
0x1372   : > { %5578 = vrsqrt.f32 %v4189_v61 }
0x1373   : > { %v5573_v4 = vpop.eup %5572 }
0x1374   : > { %v4194_v20 = vmul.f32 %v5573_v4, %v4166_v62 }
0x1376   : > { %v4204_v11 = vmul.f32 %v4597_v37, %v4194_v20 }
0x1377   : > { %v5575_v7 = vpop.eup %5574 }
0x1378   : > { %v4214_v18 = vadd.f32 %v4598_v8, %v4204_v11  ;;  %v4195_v6 = vmul.f32 %v5575_v7, %v4167_v19 }
0x137a   : > { %v4225_v40 = vmul.f32 %v4599_v63, %v4214_v18  ;;  %v4205_v45 = vmul.f32 %v4597_v37, %v4195_v6 }
0x137b   : > { %v5577_v49 = vpop.eup %5576 }
0x137c   : > { %4229 = vadd.xlane.f32.xlu0 %v4225_v40  ;;  %v4215_v34 = vadd.f32 %v4598_v8, %v4205_v45  ;;  %v4196_v13 = vmul.f32 %v5577_v49, %v4168_v27 }
0x137e   : > { %v4226_v42 = vmul.f32 %v4599_v63, %v4215_v34  ;;  %v4206_v21 = vmul.f32 %v4597_v37, %v4196_v13 }
0x137f   : > { %v5579_v60 = vpop.eup %5578 }
0x1380   : > { %4231 = vadd.xlane.f32.xlu1 %v4226_v42  ;;  %v4216_v14 = vadd.f32 %v4598_v8, %v4206_v21  ;;  %v4197_v59 = vmul.f32 %v5579_v60, %v4169_v26 }
0x1382   : > { %v4227_v58 = vmul.f32 %v4599_v63, %v4216_v14  ;;  %v4207_v30 = vmul.f32 %v4597_v37, %v4197_v59 }
0x1384   : > { %4233 = vadd.xlane.f32.xlu0 %v4227_v58  ;;  %v4217_v1 = vadd.f32 %v4598_v8, %v4207_v30 }
0x1386   : > { %v4228_v12 = vmul.f32 %v4599_v63, %v4217_v1 }
0x1388   : > { %4235 = vadd.xlane.f32.xlu1 %v4228_v12 }
0x1405   : > { %v4230_v35 = vpop.xlane.xlu0 %4229 }
0x1406   : > { %v4243_v48 = vsel %vm4239_vm4, %v4230_v35, 0.0 }
0x1409   : > { %v4232_v41 = vpop.xlane.xlu1 %4231 }
0x140a   : > { %v4244_v3 = vsel %vm4240_vm3, %v4232_v41, 0.0 }
0x140b   : > { %v4247_v43 = vadd.f32 %v4244_v3, %v4243_v48 }
0x140d   : > { %v4234_v54 = vpop.xlane.xlu0 %4233 }
0x140e   : > { %v4245_v22 = vsel %vm4241_vm5, %v4234_v54, 0.0 }
0x140f   : > { %v4248_v51 = vadd.f32 %v4247_v43, %v4245_v22 }
0x1411   : > { %v4236_v53 = vpop.xlane.xlu1 %4235 }
0x1412   : > { %v4246_v38 = vsel %vm4242_vm6, %v4236_v53, 0.0 }
0x1413   : > { %v4249_v62 = vadd.f32 %v4248_v51, %v4246_v38 }
0x1415   : > { %v4250_v24 = vrot.slane %v4249_v62, 4 }
0x1417   : > { %v4251_v28 = vadd.f32 %v4250_v24, %v4249_v62 }
0x1419   : > { %v4252_v25 = vrot.slane %v4251_v28, 2 }
0x141b   : > { %v4253_v19 = vadd.f32 %v4252_v25, %v4251_v28 }
0x141d   : > { %v4254_v17 = vrot.slane %v4253_v19, 1 }
0x141f   : > { %v4255_v57 = vadd.f32 %v4254_v17, %v4253_v19  ;;  %4264 = sbr.rel (%p4601_p2) target bundleno = 5162 (0x142a), region = 116 }
0x1421   : > { %v4258_v27 = vadd.f32 %v4257_v46, %v4255_v57 }
0x1423   : > { %4260 = vst [vmem:[%s4259_s5] sm:$0x1] %v4258_v27 }
0x1424   : > { %v4265_v0 = vld [vmem:[%s6863_s25] sm:$0x1] }
0x1425   : > { %v4266_v55 = vmul.f32 %v4265_v0, %v4258_v27  ;;  %v4268_v23 = vld [vmem:[%s4267_s26] sm:$0x1] }
0x1427   : > { %v4269_v26 = vadd.f32 %v4268_v23, %v4266_v55 }
0x1429   : > { %4271 = vst [vmem:[%s4270_s27] sm:$0x1] %v4269_v26 }
0x142a PF: > { %s211_s18 = sadd.s32 1, %s5750_s18  }
0x142b   : > { %p208_p3 = scmp.ge.s32.totalorder %s211_s18, 4  }
0x142d   :  { %210 = sbr.rel (!%p208_p3) target bundleno = 230 (0xe6), region = 150 }
0x1432   :  { %4276 = vsyncpa [#allocation6], 1 }
0x1433   :  { %4277 = vsyncpa [#allocation8], 1 }
0x1434   :  { %4278 = vsyncpa [#allocation11], 1 }
0x1435   :  { %4279 = vsyncpa [#allocation14], 1 }

</bundles_post_ra>
